<compile_context>
chip_gen: v6e
topology: v6e:2x2x1
jax: 0.10.0
libtpu: 0.0.40
codegen_flags: <defaults>
</compile_context>

<pallas_src>
import functools
import jax
import jax.numpy as jnp
from jax.experimental import pallas as pl
from jax.experimental.pallas import tpu as pltpu  # noqa: F401  (not needed at this size)

LANE = 128  # TPU lane width (last dim of a vreg)


def _round_up(v, m):
    return ((v + m - 1) // m) * m


def _full_spec(shape):
    # Whole-array block (grid = ()): no (8,128) divisibility requirement.
    return pl.BlockSpec(shape, lambda: (0,) * len(shape))


def _pad2(a, rows, cols, dtype):
    out = jnp.zeros((rows, cols), dtype)
    return out.at[:a.shape[0], :a.shape[1]].set(a.astype(dtype))


# ----------------------------- fused Pallas kernel -------------------------- #

def _fused_gnn_kernel(xcol_ref, adj_ref, w_ref, b_ref, o_ref, *,
                      num_layers, n_pad, feat, inv_feat):
    """Entire GNN forward in one kernel; activations stay VMEM/vreg resident.

    w_ref: bf16 [n_w,128,128] stacked 128x128 weight tiles (static ref[i] unpack).
    b_ref: f32  [n_b,128]     stacked bias rows (+ the Linear(1,C) weight row).
    """
    cp = LANE
    b = b_ref[...]  # tiny; load the whole bias stack once

    def mm(a_bf16, wi):  # bf16 MXU operands, f32 accumulation
        return jnp.dot(a_bf16, w_ref[wi], preferred_element_type=jnp.float32)

    # --- phi first Linear(1,C) + ReLU: pure VPU broadcast (no K=1 matmul) ----
    xcol = xcol_ref[...]                                        # [n_pad*feat, 1] f32
    h = jnp.maximum(xcol * b[0:1, :] + b[1:2, :], 0.0)          # [n_pad*feat, 128]
    # mean over per-node feature axis (major-dim reshape + sublane reduce)
    pooled = jnp.sum(h.reshape(n_pad, feat, cp), axis=1) * inv_feat   # [n_pad, 128]
    # phi second Linear (the feature-mean commutes with it), then rho MLP
    x = mm(pooled.astype(jnp.bfloat16), 0) + b[2:3, :]
    x = jnp.maximum(mm(x.astype(jnp.bfloat16), 1) + b[3:4, :], 0.0)
    x = mm(x.astype(jnp.bfloat16), 2) + b[4:5, :]

    # --- message passing (GIN, eps=0, sum agg); self term folded into adj ----
    # F.dropout(p=0.6, training=False) between layers is the identity.
    adj = adj_ref[...]                                          # bf16 [n_pad, n_pad]
    x_bf = x.astype(jnp.bfloat16)
    for layer in range(num_layers):
        wi1, wi2 = 3 + 2 * layer, 4 + 2 * layer
        bi1, bi2 = 5 + 2 * layer, 6 + 2 * layer
        agg = jnp.dot(adj, x_bf, preferred_element_type=jnp.float32)   # (A+I) @ x
        hh = jnp.maximum(mm(agg.astype(jnp.bfloat16), wi1) + b[bi1:bi1 + 1, :], 0.0)
        x_bf = jnp.maximum(mm(hh.astype(jnp.bfloat16), wi2) + b[bi2:bi2 + 1, :],
                           0.0).astype(jnp.bfloat16)

    # --- final classifier (lane-dense padded output, sliced by the wrapper) --
    o_ref[...] = mm(x_bf, 3 + 2 * num_layers) + b[5 + 2 * num_layers:6 + 2 * num_layers, :]


# ------------------------------ parameter setup ----------------------------- #

def init_linear(key, fan_in, fan_out):
    # PyTorch nn.Linear default: U(-1/sqrt(fan_in), 1/sqrt(fan_in))
    kw, kb = jax.random.split(key)
    bound = 1.0 / jnp.sqrt(float(fan_in))
    w = jax.random.uniform(kw, (fan_in, fan_out), jnp.float32, -bound, bound)
    b = jax.random.uniform(kb, (1, fan_out), jnp.float32, -bound, bound)
    return w, b


def init_gnn_params(key, in_channels, hidden_channels, heads, out_channels, num_layers):
    H = hidden_channels * heads
    keys = jax.random.split(key, 16)
    p = {}
    # method='normalized' encoder
    p["phi_w1"], p["phi_b1"] = init_linear(keys[0], 1, in_channels)
    p["phi_w2"], p["phi_b2"] = init_linear(keys[1], in_channels, in_channels)
    p["rho_w1"], p["rho_b1"] = init_linear(keys[2], in_channels, in_channels)
    p["rho_w2"], p["rho_b2"] = init_linear(keys[3], in_channels, in_channels)
    # MPNN (GIN) layers: first maps in_channels -> H, the rest H -> H
    gin = []
    dims = [in_channels] + [H] * num_layers
    for i in range(num_layers):
        w1, b1 = init_linear(keys[4 + 2 * i], dims[i], H)
        w2, b2 = init_linear(keys[5 + 2 * i], H, H)
        gin.append((w1, b1, w2, b2))
    p["gin_layers"] = gin
    # final classifier
    p["out_w"], p["out_b"] = init_linear(keys[15], H, out_channels)
    return p


# ----------------------- one-time (hoisted) host-side prep ------------------ #

def pack_params(params):
    """Pad every weight/bias to 128 lanes and stack into two kernel operands.

    Run ONCE per parameter set (outside the forward path).
    Weight stack layout (bf16 [n_w,128,128]):
        0 phi_w2, 1 rho_w1, 2 rho_w2, then per GIN layer (w1, w2), last out_w.
    Bias stack layout (f32 [n_b,128]):
        0 phi_w1 (Linear(1,C) row), 1 phi_b1, 2 phi_b2, 3 rho_b1, 4 rho_b2,
        then per GIN layer (b1, b2), last out_b.
    """
    Cp = LANE
    w_list = [params["phi_w2"], params["rho_w1"], params["rho_w2"]]
    b_list = [params["phi_w1"], params["phi_b1"], params["phi_b2"],
              params["rho_b1"], params["rho_b2"]]
    for (w1, b1, w2, b2) in params["gin_layers"]:
        w_list += [w1, w2]
        b_list += [b1, b2]
    w_list.append(params["out_w"])
    b_list.append(params["out_b"])
    w_stack = jnp.stack([_pad2(w, Cp, Cp, jnp.bfloat16) for w in w_list])
    b_stack = jnp.stack([_pad2(b, 1, Cp, jnp.float32)[0] for b in b_list])
    return w_stack, b_stack


def build_adjacency(edge_index, num_nodes, n_pad):
    """Dense padded bf16 adjacency (dst <- src sum aggregation) with the GIN
    eps=0 self term folded onto the diagonal of real nodes.  Run ONCE per graph."""
    src, dst = edge_index[0], edge_index[1]
    adj = jnp.zeros((n_pad, n_pad), jnp.float32)
    adj = adj.at[dst, src].add(1.0)            # duplicate edges accumulate (scatter-add)
    idx = jnp.arange(num_nodes)
    adj = adj.at[idx, idx].add(1.0)            # self term: (A + I) @ x
    return adj.astype(jnp.bfloat16)


# ---------------------------------- forward --------------------------------- #

@functools.partial(jax.jit, static_argnames=("out_channels",))
def gnn_forward(w_stack, b_stack, adj, x_normalized, *, out_channels):
    N, F = x_normalized.shape
    Np = adj.shape[0]
    num_layers = (w_stack.shape[0] - 4) // 2

    # per-node scalars as a column vector (padded nodes stay zero, sliced later)
    xpad = jnp.zeros((Np, F), jnp.float32).at[:N, :].set(x_normalized.astype(jnp.float32))
    xcol = xpad.reshape(Np * F, 1)

    kern = functools.partial(_fused_gnn_kernel, num_layers=num_layers,
                             n_pad=Np, feat=F, inv_feat=1.0 / float(F))
    out_pad = pl.pallas_call(
        kern,
        out_shape=jax.ShapeDtypeStruct((Np, LANE), jnp.float32),
        in_specs=[_full_spec(xcol.shape), _full_spec(adj.shape),
                  _full_spec(w_stack.shape), _full_spec(b_stack.shape)],
        out_specs=_full_spec((Np, LANE)),
    )(xcol, adj, w_stack, b_stack)
    return out_pad[:N, :out_channels]


# ------------------------------------ main ----------------------------------- #

if __name__ == "__main__":
    in_channels = 16
    hidden_channels = 16
    heads = 2
    out_channels = 8
    num_layers = 2

    N = 16   # nodes
    F = 8    # raw per-node scalar features (x_normalized width)
    E = 40   # edges

    key = jax.random.PRNGKey(0)
    k_param, k_x, k_src, k_dst = jax.random.split(key, 4)

    params = init_gnn_params(k_param, in_channels, hidden_channels, heads,
                             out_channels, num_layers)

    x_normalized = jax.random.normal(k_x, (N, F), jnp.float32)
    edge_index = jnp.stack([
        jax.random.randint(k_src, (E,), 0, N),
        jax.random.randint(k_dst, (E,), 0, N),
    ], axis=0)

    # One-time prep, hoisted out of the forward path (perf review item #1/#2):
    Np = _round_up(N, LANE)                     # lane-aligned node pad: exact MXU tiles
    w_stack, b_stack = pack_params(params)
    adj = build_adjacency(edge_index, N, Np)
    w_stack, b_stack, adj = jax.block_until_ready((w_stack, b_stack, adj))

    out = gnn_forward(w_stack, b_stack, adj, x_normalized, out_channels=out_channels)
    out = jax.block_until_ready(out)
    assert out.shape == (N, out_channels)
    print("KERNEL_OK")
</pallas_src>

<mosaic_0001>
module attributes {stable_mosaic.version = 11 : i64} {
  func.func @_fused_gnn_kernel(%arg0: memref<1024x1xf32, #tpu.memory_space<vmem>>, %arg1: memref<128x128xbf16, #tpu.memory_space<vmem>>, %arg2: memref<8x128x128xbf16, #tpu.memory_space<vmem>>, %arg3: memref<10x128xf32, #tpu.memory_space<vmem>>, %arg4: memref<128x128xf32, #tpu.memory_space<vmem>>) attributes {dimension_semantics = [], scalar_prefetch = 0 : i64, scratch_operands = 0 : i64, tpu.core_type = #tpu.core_type<tc>} {
    %c0 = arith.constant 0 : index
    %c0_0 = arith.constant 0 : index
    %0 = vector.load %arg3[%c0, %c0_0] : memref<10x128xf32, #tpu.memory_space<vmem>>, vector<10x128xf32>
    %c0_1 = arith.constant 0 : index
    %c0_2 = arith.constant 0 : index
    %1 = vector.load %arg0[%c0_1, %c0_2] : memref<1024x1xf32, #tpu.memory_space<vmem>>, vector<1024x1xf32>
    %2 = vector.extract_strided_slice %0 {offsets = [0, 0], sizes = [1, 128], strides = [1, 1]} : vector<10x128xf32> to vector<1x128xf32>
    %3 = vector.broadcast %1 : vector<1024x1xf32> to vector<1024x128xf32>
    %4 = vector.broadcast %2 : vector<1x128xf32> to vector<1024x128xf32>
    %5 = arith.mulf %3, %4 : vector<1024x128xf32>
    %6 = vector.extract_strided_slice %0 {offsets = [1, 0], sizes = [1, 128], strides = [1, 1]} : vector<10x128xf32> to vector<1x128xf32>
    %7 = vector.broadcast %6 : vector<1x128xf32> to vector<1024x128xf32>
    %8 = arith.addf %5, %7 : vector<1024x128xf32>
    %cst = arith.constant 0.000000e+00 : f32
    %9 = vector.broadcast %cst : f32 to vector<1024x128xf32>
    %10 = arith.maximumf %8, %9 : vector<1024x128xf32>
    %11 = vector.shape_cast %10 : vector<1024x128xf32> to vector<128x8x128xf32>
    %cst_3 = arith.constant dense<0.000000e+00> : vector<128x128xf32>
    %12 = vector.multi_reduction <add>, %11, %cst_3 [1] : vector<128x8x128xf32> to vector<128x128xf32>
    %cst_4 = arith.constant 1.250000e-01 : f32
    %13 = vector.broadcast %cst_4 : f32 to vector<128x128xf32>
    %14 = arith.mulf %12, %13 : vector<128x128xf32>
    %15 = arith.truncf %14 : vector<128x128xf32> to vector<128x128xbf16>
    %c0_5 = arith.constant 0 : index
    %c0_6 = arith.constant 0 : index
    %c0_7 = arith.constant 0 : index
    %16 = vector.load %arg2[%c0_5, %c0_6, %c0_7] : memref<8x128x128xbf16, #tpu.memory_space<vmem>>, vector<1x128x128xbf16>
    %17 = vector.shape_cast %16 : vector<1x128x128xbf16> to vector<128x128xbf16>
    %cst_8 = arith.constant dense<0.000000e+00> : vector<128x128xf32>
    %18 = tpu.matmul %15, %17, %cst_8 {dimension_numbers = #tpu.dot_dimension_numbers<[1], [0], [0], [1], [0, 0, 1, 1], [], []>} : vector<128x128xbf16>, vector<128x128xbf16>, vector<128x128xf32> -> vector<128x128xf32>
    %19 = vector.extract_strided_slice %0 {offsets = [2, 0], sizes = [1, 128], strides = [1, 1]} : vector<10x128xf32> to vector<1x128xf32>
    %20 = vector.broadcast %19 : vector<1x128xf32> to vector<128x128xf32>
    %21 = arith.addf %18, %20 : vector<128x128xf32>
    %22 = arith.truncf %21 : vector<128x128xf32> to vector<128x128xbf16>
    %c1 = arith.constant 1 : index
    %c0_9 = arith.constant 0 : index
    %c0_10 = arith.constant 0 : index
    %23 = vector.load %arg2[%c1, %c0_9, %c0_10] : memref<8x128x128xbf16, #tpu.memory_space<vmem>>, vector<1x128x128xbf16>
    %24 = vector.shape_cast %23 : vector<1x128x128xbf16> to vector<128x128xbf16>
    %cst_11 = arith.constant dense<0.000000e+00> : vector<128x128xf32>
    %25 = tpu.matmul %22, %24, %cst_11 {dimension_numbers = #tpu.dot_dimension_numbers<[1], [0], [0], [1], [0, 0, 1, 1], [], []>} : vector<128x128xbf16>, vector<128x128xbf16>, vector<128x128xf32> -> vector<128x128xf32>
    %26 = vector.extract_strided_slice %0 {offsets = [3, 0], sizes = [1, 128], strides = [1, 1]} : vector<10x128xf32> to vector<1x128xf32>
    %27 = vector.broadcast %26 : vector<1x128xf32> to vector<128x128xf32>
    %28 = arith.addf %25, %27 : vector<128x128xf32>
    %cst_12 = arith.constant 0.000000e+00 : f32
    %29 = vector.broadcast %cst_12 : f32 to vector<128x128xf32>
    %30 = arith.maximumf %28, %29 : vector<128x128xf32>
    %31 = arith.truncf %30 : vector<128x128xf32> to vector<128x128xbf16>
    %c2 = arith.constant 2 : index
    %c0_13 = arith.constant 0 : index
    %c0_14 = arith.constant 0 : index
    %32 = vector.load %arg2[%c2, %c0_13, %c0_14] : memref<8x128x128xbf16, #tpu.memory_space<vmem>>, vector<1x128x128xbf16>
    %33 = vector.shape_cast %32 : vector<1x128x128xbf16> to vector<128x128xbf16>
    %cst_15 = arith.constant dense<0.000000e+00> : vector<128x128xf32>
    %34 = tpu.matmul %31, %33, %cst_15 {dimension_numbers = #tpu.dot_dimension_numbers<[1], [0], [0], [1], [0, 0, 1, 1], [], []>} : vector<128x128xbf16>, vector<128x128xbf16>, vector<128x128xf32> -> vector<128x128xf32>
    %35 = vector.extract_strided_slice %0 {offsets = [4, 0], sizes = [1, 128], strides = [1, 1]} : vector<10x128xf32> to vector<1x128xf32>
    %36 = vector.broadcast %35 : vector<1x128xf32> to vector<128x128xf32>
    %37 = arith.addf %34, %36 : vector<128x128xf32>
    %c0_16 = arith.constant 0 : index
    %c0_17 = arith.constant 0 : index
    %38 = vector.load %arg1[%c0_16, %c0_17] : memref<128x128xbf16, #tpu.memory_space<vmem>>, vector<128x128xbf16>
    %39 = arith.truncf %37 : vector<128x128xf32> to vector<128x128xbf16>
    %cst_18 = arith.constant dense<0.000000e+00> : vector<128x128xf32>
    %40 = tpu.matmul %38, %39, %cst_18 {dimension_numbers = #tpu.dot_dimension_numbers<[1], [0], [0], [1], [0, 0, 1, 1], [], []>} : vector<128x128xbf16>, vector<128x128xbf16>, vector<128x128xf32> -> vector<128x128xf32>
    %41 = arith.truncf %40 : vector<128x128xf32> to vector<128x128xbf16>
    %c3 = arith.constant 3 : index
    %c0_19 = arith.constant 0 : index
    %c0_20 = arith.constant 0 : index
    %42 = vector.load %arg2[%c3, %c0_19, %c0_20] : memref<8x128x128xbf16, #tpu.memory_space<vmem>>, vector<1x128x128xbf16>
    %43 = vector.shape_cast %42 : vector<1x128x128xbf16> to vector<128x128xbf16>
    %cst_21 = arith.constant dense<0.000000e+00> : vector<128x128xf32>
    %44 = tpu.matmul %41, %43, %cst_21 {dimension_numbers = #tpu.dot_dimension_numbers<[1], [0], [0], [1], [0, 0, 1, 1], [], []>} : vector<128x128xbf16>, vector<128x128xbf16>, vector<128x128xf32> -> vector<128x128xf32>
    %45 = vector.extract_strided_slice %0 {offsets = [5, 0], sizes = [1, 128], strides = [1, 1]} : vector<10x128xf32> to vector<1x128xf32>
    %46 = vector.broadcast %45 : vector<1x128xf32> to vector<128x128xf32>
    %47 = arith.addf %44, %46 : vector<128x128xf32>
    %cst_22 = arith.constant 0.000000e+00 : f32
    %48 = vector.broadcast %cst_22 : f32 to vector<128x128xf32>
    %49 = arith.maximumf %47, %48 : vector<128x128xf32>
    %50 = arith.truncf %49 : vector<128x128xf32> to vector<128x128xbf16>
    %c4 = arith.constant 4 : index
    %c0_23 = arith.constant 0 : index
    %c0_24 = arith.constant 0 : index
    %51 = vector.load %arg2[%c4, %c0_23, %c0_24] : memref<8x128x128xbf16, #tpu.memory_space<vmem>>, vector<1x128x128xbf16>
    %52 = vector.shape_cast %51 : vector<1x128x128xbf16> to vector<128x128xbf16>
    %cst_25 = arith.constant dense<0.000000e+00> : vector<128x128xf32>
    %53 = tpu.matmul %50, %52, %cst_25 {dimension_numbers = #tpu.dot_dimension_numbers<[1], [0], [0], [1], [0, 0, 1, 1], [], []>} : vector<128x128xbf16>, vector<128x128xbf16>, vector<128x128xf32> -> vector<128x128xf32>
    %54 = vector.extract_strided_slice %0 {offsets = [6, 0], sizes = [1, 128], strides = [1, 1]} : vector<10x128xf32> to vector<1x128xf32>
    %55 = vector.broadcast %54 : vector<1x128xf32> to vector<128x128xf32>
    %56 = arith.addf %53, %55 : vector<128x128xf32>
    %cst_26 = arith.constant 0.000000e+00 : f32
    %57 = vector.broadcast %cst_26 : f32 to vector<128x128xf32>
    %58 = arith.maximumf %56, %57 : vector<128x128xf32>
    %59 = arith.truncf %58 : vector<128x128xf32> to vector<128x128xbf16>
    %cst_27 = arith.constant dense<0.000000e+00> : vector<128x128xf32>
    %60 = tpu.matmul %38, %59, %cst_27 {dimension_numbers = #tpu.dot_dimension_numbers<[1], [0], [0], [1], [0, 0, 1, 1], [], []>} : vector<128x128xbf16>, vector<128x128xbf16>, vector<128x128xf32> -> vector<128x128xf32>
    %61 = arith.truncf %60 : vector<128x128xf32> to vector<128x128xbf16>
    %c5 = arith.constant 5 : index
    %c0_28 = arith.constant 0 : index
    %c0_29 = arith.constant 0 : index
    %62 = vector.load %arg2[%c5, %c0_28, %c0_29] : memref<8x128x128xbf16, #tpu.memory_space<vmem>>, vector<1x128x128xbf16>
    %63 = vector.shape_cast %62 : vector<1x128x128xbf16> to vector<128x128xbf16>
    %cst_30 = arith.constant dense<0.000000e+00> : vector<128x128xf32>
    %64 = tpu.matmul %61, %63, %cst_30 {dimension_numbers = #tpu.dot_dimension_numbers<[1], [0], [0], [1], [0, 0, 1, 1], [], []>} : vector<128x128xbf16>, vector<128x128xbf16>, vector<128x128xf32> -> vector<128x128xf32>
    %65 = vector.extract_strided_slice %0 {offsets = [7, 0], sizes = [1, 128], strides = [1, 1]} : vector<10x128xf32> to vector<1x128xf32>
    %66 = vector.broadcast %65 : vector<1x128xf32> to vector<128x128xf32>
    %67 = arith.addf %64, %66 : vector<128x128xf32>
    %cst_31 = arith.constant 0.000000e+00 : f32
    %68 = vector.broadcast %cst_31 : f32 to vector<128x128xf32>
    %69 = arith.maximumf %67, %68 : vector<128x128xf32>
    %70 = arith.truncf %69 : vector<128x128xf32> to vector<128x128xbf16>
    %c6 = arith.constant 6 : index
    %c0_32 = arith.constant 0 : index
    %c0_33 = arith.constant 0 : index
    %71 = vector.load %arg2[%c6, %c0_32, %c0_33] : memref<8x128x128xbf16, #tpu.memory_space<vmem>>, vector<1x128x128xbf16>
    %72 = vector.shape_cast %71 : vector<1x128x128xbf16> to vector<128x128xbf16>
    %cst_34 = arith.constant dense<0.000000e+00> : vector<128x128xf32>
    %73 = tpu.matmul %70, %72, %cst_34 {dimension_numbers = #tpu.dot_dimension_numbers<[1], [0], [0], [1], [0, 0, 1, 1], [], []>} : vector<128x128xbf16>, vector<128x128xbf16>, vector<128x128xf32> -> vector<128x128xf32>
    %74 = vector.extract_strided_slice %0 {offsets = [8, 0], sizes = [1, 128], strides = [1, 1]} : vector<10x128xf32> to vector<1x128xf32>
    %75 = vector.broadcast %74 : vector<1x128xf32> to vector<128x128xf32>
    %76 = arith.addf %73, %75 : vector<128x128xf32>
    %cst_35 = arith.constant 0.000000e+00 : f32
    %77 = vector.broadcast %cst_35 : f32 to vector<128x128xf32>
    %78 = arith.maximumf %76, %77 : vector<128x128xf32>
    %79 = arith.truncf %78 : vector<128x128xf32> to vector<128x128xbf16>
    %c7 = arith.constant 7 : index
    %c0_36 = arith.constant 0 : index
    %c0_37 = arith.constant 0 : index
    %80 = vector.load %arg2[%c7, %c0_36, %c0_37] : memref<8x128x128xbf16, #tpu.memory_space<vmem>>, vector<1x128x128xbf16>
    %81 = vector.shape_cast %80 : vector<1x128x128xbf16> to vector<128x128xbf16>
    %cst_38 = arith.constant dense<0.000000e+00> : vector<128x128xf32>
    %82 = tpu.matmul %79, %81, %cst_38 {dimension_numbers = #tpu.dot_dimension_numbers<[1], [0], [0], [1], [0, 0, 1, 1], [], []>} : vector<128x128xbf16>, vector<128x128xbf16>, vector<128x128xf32> -> vector<128x128xf32>
    %83 = vector.extract_strided_slice %0 {offsets = [9, 0], sizes = [1, 128], strides = [1, 1]} : vector<10x128xf32> to vector<1x128xf32>
    %84 = vector.broadcast %83 : vector<1x128xf32> to vector<128x128xf32>
    %85 = arith.addf %82, %84 : vector<128x128xf32>
    %c0_39 = arith.constant 0 : index
    %c0_40 = arith.constant 0 : index
    %86 = vector.load %arg4[%c0_39, %c0_40] : memref<128x128xf32, #tpu.memory_space<vmem>>, vector<128x128xf32>
    tpu.vector_store %arg4[%c0_39, %c0_40], %85 {strides = array<i32>} : memref<128x128xf32, #tpu.memory_space<vmem>>, vector<128x128xf32>,
    return
  }
}

</mosaic_0001>

<bundles_post_ra>
// kernel: gnn_forward.1
= control target key start
LH: loop header
LB: loop body
LE: loop exit
PB: predicated region body
PF: predicated region fallthrough
CT: control target
= control target key end

     0   :  { %v5093_v0 = vmov 0   ;;  %v788_v55 = vlaneseq  ;;  %vm2480_vm0 = vcmask 1041409   ;;  %vm2482_vm1 = vcmask 1042434   ;;  %s6801_s0 = inlined_call_operand.vmem [shape: f32[1024,1], index: 0, kind: input, shape index: {}]   ;;  %s6802_s2 = inlined_call_operand.vmem [shape: bf16[8,128,128], index: 2, kind: input, shape index: {}]   ;;  %s6803_s3 = inlined_call_operand.vmem [shape: f32[10,128], index: 3, kind: input, shape index: {}]   ;;  %s6804_s1 = inlined_call_operand.vmem [shape: bf16[128,128], index: 1, kind: input, shape index: {}]   ;;  %s6805_s4 = inlined_call_operand.vmem [shape: f32[128,128], index: 4, kind: output, shape index: {}]  }
   0x1   :  { %5018 = vset.pattern.permute.xlu1 %v5093_v0  ;;  %5017 = vset.pattern.permute.xlu0 %v5093_v0  ;;  %v28_v1 = vld [vmem:[%s6801_s0 + $0x40] sm:$0xff]  ;;  %v29_v3 = vld [vmem:[%s6801_s0 + $0x48] sm:$0xff]  ;;  %v30_v5 = vld [vmem:[%s6801_s0 + $0x50] sm:$0xff]  ;;  %vm2484_vm2 = vcmask 1043459   ;;  %vm2486_vm3 = vcmask 1044484   ;;  %vm2488_vm4 = vcmask 1045509  }
   0x2   :  { %v20_v2 = vld [vmem:[%s6801_s0] sm:$0xff]  ;;  %190 = vperm.xlu1 %5018, %v28_v1   ;;  %v21_v4 = vld [vmem:[%s6801_s0 + $0x8] sm:$0xff]  ;;  %v22_v6 = vld [vmem:[%s6801_s0 + $0x10] sm:$0xff]  ;;  %v5290_v59 = vshrl.u32 %v788_v55, 7  ;;  %vm2490_vm5 = vcmask 1046534   ;;  %vm2492_vm6 = vcmask 1047559  }
   0x3   :  { %150 = vperm.xlu0 %5017, %v20_v2   ;;  %v37_v7 = vld [vmem:[%s6801_s0 + $0x88] sm:$0xff]  ;;  %v36_v8 = vld [vmem:[%s6801_s0 + $0x80] sm:$0xff]  ;;  %v31_v11 = vld [vmem:[%s6801_s0 + $0x58] sm:$0xff] }
   0x4   :  { %v45_v9 = vld [vmem:[%s6801_s0 + $0xc8] sm:$0xff]  ;;  %v44_v10 = vld [vmem:[%s6801_s0 + $0xc0] sm:$0xff]  ;;  %v23_v12 = vld [vmem:[%s6801_s0 + $0x18] sm:$0xff]  ;;  %v6807_v63 = vsub.s32 0, %v5290_v59  ;;  %v6806_v0 = vsub.s32 1, %v5290_v59 }
   0x5   :  { %v46_v13 = vld [vmem:[%s6801_s0 + $0xd0] sm:$0xff]  ;;  %v32_v15 = vld [vmem:[%s6801_s0 + $0x60] sm:$0xff]  ;;  %v47_v17 = vld [vmem:[%s6801_s0 + $0xd8] sm:$0xff] }
   0x6   :  { %195 = vperm.xlu1 %5018, %v29_v3   ;;  %v38_v14 = vld [vmem:[%s6801_s0 + $0x90] sm:$0xff]  ;;  %v24_v16 = vld [vmem:[%s6801_s0 + $0x20] sm:$0xff]  ;;  %v39_v18 = vld [vmem:[%s6801_s0 + $0x98] sm:$0xff] }
   0x7   :  { %155 = vperm.xlu0 %5017, %v21_v4   ;;  %v33_v19 = vld [vmem:[%s6801_s0 + $0x68] sm:$0xff]  ;;  %v48_v21 = vld [vmem:[%s6801_s0 + $0xe0] sm:$0xff]  ;;  %v34_v23 = vld [vmem:[%s6801_s0 + $0x70] sm:$0xff] }
   0x8   :  { %v25_v20 = vld [vmem:[%s6801_s0 + $0x28] sm:$0xff]  ;;  %v40_v22 = vld [vmem:[%s6801_s0 + $0xa0] sm:$0xff]  ;;  %v26_v24 = vld [vmem:[%s6801_s0 + $0x30] sm:$0xff] }
   0x9   :  { %v49_v25 = vld [vmem:[%s6801_s0 + $0xe8] sm:$0xff]  ;;  %v35_v27 = vld [vmem:[%s6801_s0 + $0x78] sm:$0xff]  ;;  %v50_v29 = vld [vmem:[%s6801_s0 + $0xf0] sm:$0xff] }
   0xa   :  { %200 = vperm.xlu1 %5018, %v30_v5   ;;  %v41_v26 = vld [vmem:[%s6801_s0 + $0xa8] sm:$0xff]  ;;  %v27_v28 = vld [vmem:[%s6801_s0 + $0x38] sm:$0xff]  ;;  %v42_v30 = vld [vmem:[%s6801_s0 + $0xb0] sm:$0xff] }
   0xb   :  { %160 = vperm.xlu0 %5017, %v22_v6   ;;  %v51_v31 = vld [vmem:[%s6801_s0 + $0xf8] sm:$0xff]  ;;  %v53_v33 = vld [vmem:[%s6801_s0 + $0x108] sm:$0xff]  ;;  %v52_v34 = vld [vmem:[%s6801_s0 + $0x100] sm:$0xff] }
   0xc   :  { %v43_v32 = vld [vmem:[%s6801_s0 + $0xb8] sm:$0xff]  ;;  %v61_v35 = vld [vmem:[%s6801_s0 + $0x148] sm:$0xff]  ;;  %v60_v36 = vld [vmem:[%s6801_s0 + $0x140] sm:$0xff] }
   0xd   :  { %v62_v37 = vld [vmem:[%s6801_s0 + $0x150] sm:$0xff]  ;;  %v69_v39 = vld [vmem:[%s6801_s0 + $0x188] sm:$0xff]  ;;  %v68_v40 = vld [vmem:[%s6801_s0 + $0x180] sm:$0xff] }
   0xe   :  { %235 = vperm.xlu1 %5018, %v37_v7   ;;  %v54_v38 = vld [vmem:[%s6801_s0 + $0x110] sm:$0xff]  ;;  %v5019_v41 = vld [vmem:[%s6802_s2 + $0x38] sm:$0xff]   ;;  %v77_v42 = vld [vmem:[%s6801_s0 + $0x1c8] sm:$0xff] }
   0xf   :  { %230 = vperm.xlu0 %5017, %v36_v8   ;;  %v76_v43 = vld [vmem:[%s6801_s0 + $0x1c0] sm:$0xff]  ;;  %4696 = vmatprep.subr.bf16.mxu0 %v5019_v41  ;;  %v5020_v44 = vld [vmem:[%s6802_s2 + $0x30] sm:$0xff]   ;;  %v63_v45 = vld [vmem:[%s6801_s0 + $0x158] sm:$0xff] }
  0x10   :  { %4697 = vmatpush3.bf16.msra.mxu0 %v5019_v41  ;;  %v55_v46 = vld [vmem:[%s6801_s0 + $0x118] sm:$0xff]  ;;  %v5021_v47 = vld [vmem:[%s6802_s2 + $0x28] sm:$0xff]   ;;  %v78_v48 = vld [vmem:[%s6801_s0 + $0x1d0] sm:$0xff] }
  0x11   :  { %4698 = vmatprep.subr.bf16.mxu0 %v5020_v44  ;;  %v70_v49 = vld [vmem:[%s6801_s0 + $0x190] sm:$0xff]  ;;  %v5022_v50 = vld [vmem:[%s6802_s2 + $0x20] sm:$0xff]   ;;  %v79_v53 = vld [vmem:[%s6801_s0 + $0x1d8] sm:$0xff] }
  0x12   :  { %275 = vperm.xlu1 %5018, %v45_v9   ;;  %v64_v51 = vld [vmem:[%s6801_s0 + $0x160] sm:$0xff]  ;;  %v71_v54 = vld [vmem:[%s6801_s0 + $0x198] sm:$0xff]  ;;  %v65_v57 = vld [vmem:[%s6801_s0 + $0x168] sm:$0xff] }
  0x13   :  { %270 = vperm.xlu0 %5017, %v44_v10   ;;  %v56_v52 = vld [vmem:[%s6801_s0 + $0x120] sm:$0xff]  ;;  %v5023_v56 = vld [vmem:[%s6802_s2 + $0x18] sm:$0xff]   ;;  %v57_v58 = vld [vmem:[%s6801_s0 + $0x128] sm:$0xff] }
  0x14   :  { %4699 = vmatpush3.bf16.msra.mxu0 %v5020_v44  ;;  %v5024_v60 = vld [vmem:[%s6802_s2 + $0x10] sm:$0xff]   ;;  %v80_v61 = vld [vmem:[%s6801_s0 + $0x1e0] sm:$0xff]  ;;  %v5025_v1 = vld [vmem:[%s6802_s2 + $0x8] sm:$0xff]  }
  0x15   :  { %4700 = vmatprep.subr.bf16.mxu0 %v5021_v47  ;;  %v72_v62 = vld [vmem:[%s6801_s0 + $0x1a0] sm:$0xff]  ;;  %v66_v2 = vld [vmem:[%s6801_s0 + $0x170] sm:$0xff]  ;;  %v81_v4 = vld [vmem:[%s6801_s0 + $0x1e8] sm:$0xff] }
  0x16   :  { %205 = vperm.xlu1 %5018, %v31_v11   ;;  %v58_v3 = vld [vmem:[%s6801_s0 + $0x130] sm:$0xff]  ;;  %v73_v5 = vld [vmem:[%s6801_s0 + $0x1a8] sm:$0xff]  ;;  %v67_v6 = vld [vmem:[%s6801_s0 + $0x178] sm:$0xff] }
  0x17   :  { %165 = vperm.xlu0 %5017, %v23_v12   ;;  %v59_v7 = vld [vmem:[%s6801_s0 + $0x138] sm:$0xff]  ;;  %v82_v8 = vld [vmem:[%s6801_s0 + $0x1f0] sm:$0xff]  ;;  %v18_v10 = vld [vmem:[%s6803_s3] sm:$0xff] }
  0x18   :  { %4701 = vmatpush3.bf16.msra.mxu0 %v5021_v47  ;;  %v74_v9 = vld [vmem:[%s6801_s0 + $0x1b0] sm:$0xff]  ;;  %v83_v11 = vld [vmem:[%s6801_s0 + $0x1f8] sm:$0xff] }
  0x19   :  { %4702 = vmatprep.subr.bf16.mxu0 %v5022_v50  ;;  %v75_v12 = vld [vmem:[%s6801_s0 + $0x1b8] sm:$0xff] }
  0x1a   :  { %280 = vperm.xlu1 %5018, %v46_v13   ;;  %v5341_v13 = vrot.slane %v18_v10, %v6807_v63 }
  0x1b   :  { %240 = vperm.xlu0 %5017, %v38_v14   ;;  %v5345_v14 = vrot.slane %v18_v10, %v6806_v0 }
  0x1c   :  { %4703 = vmatpush3.bf16.msra.mxu0 %v5022_v50 }
  0x1d   :  { %4704 = vmatprep.subr.bf16.mxu0 %v5023_v56 }
  0x1e   :  { %210 = vperm.xlu1 %5018, %v32_v15  }
  0x1f   :  { %170 = vperm.xlu0 %5017, %v24_v16  }
  0x20   :  { %4705 = vmatpush3.bf16.msra.mxu0 %v5023_v56 }
  0x21   :  { %4706 = vmatprep.subr.bf16.mxu0 %v5024_v60 }
  0x22   :  { %285 = vperm.xlu1 %5018, %v47_v17  }
  0x23   :  { %245 = vperm.xlu0 %5017, %v39_v18  }
  0x24   :  { %4707 = vmatpush3.bf16.msra.mxu0 %v5024_v60 }
  0x25   :  { %4708 = vmatprep.subr.bf16.mxu0 %v5025_v1 }
  0x26   :  { %215 = vperm.xlu1 %5018, %v33_v19   ;;  %v85_v19 = vld [vmem:[%s6801_s0 + $0x208] sm:$0xff] }
  0x27   :  { %175 = vperm.xlu0 %5017, %v25_v20   ;;  %v84_v20 = vld [vmem:[%s6801_s0 + $0x200] sm:$0xff] }
  0x28   :  { %4709 = vmatpush3.bf16.msra.mxu0 %v5025_v1 }
  0x2a   :  { %290 = vperm.xlu1 %5018, %v48_v21  }
  0x2b   :  { %250 = vperm.xlu0 %5017, %v40_v22  }
  0x2e   :  { %220 = vperm.xlu1 %5018, %v34_v23  }
  0x2f   :  { %180 = vperm.xlu0 %5017, %v26_v24  }
  0x32   :  { %295 = vperm.xlu1 %5018, %v49_v25  }
  0x33   :  { %255 = vperm.xlu0 %5017, %v41_v26  }
  0x36   :  { %225 = vperm.xlu1 %5018, %v35_v27  }
  0x37   :  { %185 = vperm.xlu0 %5017, %v27_v28  }
  0x3a   :  { %300 = vperm.xlu1 %5018, %v50_v29   ;;  %v93_v29 = vld [vmem:[%s6801_s0 + $0x248] sm:$0xff] }
  0x3b   :  { %260 = vperm.xlu0 %5017, %v42_v30   ;;  %v92_v30 = vld [vmem:[%s6801_s0 + $0x240] sm:$0xff] }
  0x3e   :  { %305 = vperm.xlu1 %5018, %v51_v31  }
  0x3f   :  { %265 = vperm.xlu0 %5017, %v43_v32  }
  0x42   :  { %315 = vperm.xlu1 %5018, %v53_v33  }
  0x43   :  { %310 = vperm.xlu0 %5017, %v52_v34  }
  0x46   :  { %355 = vperm.xlu1 %5018, %v61_v35  }
  0x47   :  { %350 = vperm.xlu0 %5017, %v60_v36  }
  0x4a   :  { %360 = vperm.xlu1 %5018, %v62_v37  }
  0x4b   :  { %320 = vperm.xlu0 %5017, %v54_v38  }
  0x4e   :  { %395 = vperm.xlu1 %5018, %v69_v39  }
  0x4f   :  { %390 = vperm.xlu0 %5017, %v68_v40  }
  0x52   :  { %435 = vperm.xlu1 %5018, %v77_v42  }
  0x53   :  { %430 = vperm.xlu0 %5017, %v76_v43   ;;  %v94_v43 = vld [vmem:[%s6801_s0 + $0x250] sm:$0xff] }
  0x56   :  { %365 = vperm.xlu1 %5018, %v63_v45  }
  0x57   :  { %325 = vperm.xlu0 %5017, %v55_v46  }
  0x5a   :  { %440 = vperm.xlu1 %5018, %v78_v48   ;;  %v86_v48 = vld [vmem:[%s6801_s0 + $0x210] sm:$0xff] }
  0x5b   :  { %400 = vperm.xlu0 %5017, %v70_v49  }
  0x5e   :  { %370 = vperm.xlu1 %5018, %v64_v51  }
  0x5f   :  { %330 = vperm.xlu0 %5017, %v56_v52  }
  0x62   :  { %445 = vperm.xlu1 %5018, %v79_v53  }
  0x63   :  { %405 = vperm.xlu0 %5017, %v71_v54  }
  0x66   :  { %375 = vperm.xlu1 %5018, %v65_v57  }
  0x67   :  { %335 = vperm.xlu0 %5017, %v57_v58  }
  0x6a   :  { %450 = vperm.xlu1 %5018, %v80_v61  }
  0x6b   :  { %410 = vperm.xlu0 %5017, %v72_v62   ;;  %v101_v62 = vld [vmem:[%s6801_s0 + $0x288] sm:$0xff] }
  0x6e   :  { %380 = vperm.xlu1 %5018, %v66_v2  }
  0x6f   :  { %340 = vperm.xlu0 %5017, %v58_v3  }
  0x72   :  { %455 = vperm.xlu1 %5018, %v81_v4  }
  0x73   :  { %415 = vperm.xlu0 %5017, %v73_v5   ;;  %v100_v5 = vld [vmem:[%s6801_s0 + $0x280] sm:$0xff] }
  0x76   :  { %385 = vperm.xlu1 %5018, %v67_v6  }
  0x77   :  { %345 = vperm.xlu0 %5017, %v59_v7  }
  0x7a   :  { %460 = vperm.xlu1 %5018, %v82_v8  }
  0x7b   :  { %420 = vperm.xlu0 %5017, %v74_v9  }
  0x7d   :  { %v191_v15 = vpop.permute.xlu1 %190 }
  0x7e   :  { %v151_v16 = vpop.permute.xlu0 %150  ;;  %v800_v17 = vmul.f32 %v5341_v13, %v191_v15  ;;  %465 = vperm.xlu1 %5018, %v83_v11  }
  0x7f   :  { %v792_v18 = vmul.f32 %v5341_v13, %v151_v16  ;;  %425 = vperm.xlu0 %5017, %v75_v12  }
  0x80   :  { %v932_v21 = vadd.f32 %v5345_v14, %v800_v17 }
  0x81   :  { %v924_v22 = vadd.f32 %v5345_v14, %v792_v18  ;;  %v196_v23 = vpop.permute.xlu1 %195 }
  0x82   :  { %v156_v24 = vpop.permute.xlu0 %155  ;;  %v1060_v25 = vmax.f32 %v932_v21, 0.0  ;;  %v801_v27 = vmul.f32 %v5341_v13, %v196_v23  ;;  %475 = vperm.xlu1 %5018, %v85_v19  }
  0x83   :  { %v1052_v26 = vmax.f32 %v924_v22, 0.0  ;;  %v793_v28 = vmul.f32 %v5341_v13, %v156_v24  ;;  %470 = vperm.xlu0 %5017, %v84_v20   ;;  %v109_v22 = vld [vmem:[%s6801_s0 + $0x2c8] sm:$0xff] }
  0x84   :  { %v1228_v31 = vrot.slane %v1060_v25, 4  ;;  %v933_v33 = vadd.f32 %v5345_v14, %v801_v27 }
  0x85   :  { %v1180_v32 = vrot.slane %v1052_v26, 4  ;;  %v925_v34 = vadd.f32 %v5345_v14, %v793_v28  ;;  %v201_v35 = vpop.permute.xlu1 %200 }
  0x86   :  { %v161_v36 = vpop.permute.xlu0 %160  ;;  %v1229_v37 = vadd.f32 %v1228_v31, %v1060_v25  ;;  %v1061_v39 = vmax.f32 %v933_v33, 0.0  ;;  %515 = vperm.xlu1 %5018, %v93_v29   ;;  %v802_v41 = vmul.f32 %v5341_v13, %v201_v35  ;;  %v108_v25 = vld [vmem:[%s6801_s0 + $0x2c0] sm:$0xff] }
  0x87   :  { %v1181_v38 = vadd.f32 %v1180_v32, %v1052_v26  ;;  %v1053_v40 = vmax.f32 %v925_v34, 0.0  ;;  %510 = vperm.xlu0 %5017, %v92_v30   ;;  %v794_v42 = vmul.f32 %v5341_v13, %v161_v36 }
  0x88   :  { %v1230_v44 = vrot.slane %v1229_v37, 2  ;;  %v1234_v46 = vrot.slane %v1061_v39, 4  ;;  %v934_v49 = vadd.f32 %v5345_v14, %v802_v41 }
  0x89   :  { %v1182_v45 = vrot.slane %v1181_v38, 2  ;;  %v1186_v47 = vrot.slane %v1053_v40, 4  ;;  %v926_v50 = vadd.f32 %v5345_v14, %v794_v42  ;;  %v236_v51 = vpop.permute.xlu1 %235 }
  0x8a   :  { %v231_v52 = vpop.permute.xlu0 %230  ;;  %v1231_v53 = vadd.f32 %v1230_v44, %v1229_v37  ;;  %v1235_v55 = vadd.f32 %v1234_v46, %v1061_v39  ;;  %520 = vperm.xlu1 %5018, %v94_v43   ;;  %v1062_v57 = vmax.f32 %v934_v49, 0.0  ;;  %v809_v60 = vmul.f32 %v5341_v13, %v236_v51 }
  0x8b   :  { %v1183_v54 = vadd.f32 %v1182_v45, %v1181_v38  ;;  %v1187_v56 = vadd.f32 %v1186_v47, %v1053_v40  ;;  %v1054_v58 = vmax.f32 %v926_v50, 0.0  ;;  %v808_v61 = vmul.f32 %v5341_v13, %v231_v52  ;;  %480 = vperm.xlu0 %5017, %v86_v48   ;;  %v95_v38 = vld [vmem:[%s6801_s0 + $0x258] sm:$0xff] }
  0x8c   :  { %v1232_v1 = vrot.slane %v1231_v53, 1  ;;  %v1236_v3 = vrot.slane %v1235_v55, 2  ;;  %v1240_v6 = vrot.slane %v1062_v57, 4  ;;  %v941_v8 = vadd.f32 %v5345_v14, %v809_v60  ;;  %v87_v40 = vld [vmem:[%s6801_s0 + $0x218] sm:$0xff] }
  0x8d   :  { %v1184_v2 = vrot.slane %v1183_v54, 1  ;;  %v1188_v4 = vrot.slane %v1187_v56, 2  ;;  %v1192_v7 = vrot.slane %v1054_v58, 4  ;;  %v940_v9 = vadd.f32 %v5345_v14, %v808_v61  ;;  %v276_v10 = vpop.permute.xlu1 %275 }
  0x8e   :  { %v271_v11 = vpop.permute.xlu0 %270  ;;  %v1233_v12 = vadd.f32 %v1232_v1, %v1231_v53  ;;  %v1237_v16 = vadd.f32 %v1236_v3, %v1235_v55  ;;  %555 = vperm.xlu1 %5018, %v101_v62   ;;  %v1241_v18 = vadd.f32 %v1240_v6, %v1062_v57  ;;  %v1069_v20 = vmax.f32 %v941_v8, 0.0  ;;  %v5026_v55 = vld [vmem:[%s6802_s2] sm:$0xff]  }
  0x8f   :  { %v1185_v15 = vadd.f32 %v1184_v2, %v1183_v54  ;;  %v1189_v17 = vadd.f32 %v1188_v4, %v1187_v56  ;;  %v1193_v19 = vadd.f32 %v1192_v7, %v1054_v58  ;;  %v1068_v21 = vmax.f32 %v940_v9, 0.0  ;;  %550 = vperm.xlu0 %5017, %v100_v5   ;;  %v110_v54 = vld [vmem:[%s6801_s0 + $0x2d0] sm:$0xff]  ;;  %4710 = vmatprep.subr.bf16.mxu0 %v5026_v55 }
  0x90   :  { %v1238_v23 = vrot.slane %v1237_v16, 1  ;;  %v1242_v26 = vrot.slane %v1241_v18, 2  ;;  %v1282_v28 = vrot.slane %v1069_v20, 4  ;;  %v1956_v32 = vmul.f32 0.125, %v1233_v12  ;;  %v102_v58 = vld [vmem:[%s6801_s0 + $0x290] sm:$0xff]  ;;  %4711 = vmatpush3.bf16.msra.mxu0 %v5026_v55  ;;  %v96_v12 = vld [vmem:[%s6801_s0 + $0x260] sm:$0xff] }
  0x91   :  { %v1190_v24 = vrot.slane %v1189_v17, 1  ;;  %v1194_v27 = vrot.slane %v1193_v19, 2  ;;  %v1276_v29 = vrot.slane %v1068_v21, 4  ;;  %v206_v30 = vpop.permute.xlu1 %205  ;;  %v1948_v34 = vmul.f32 0.125, %v1185_v15 }
  0x92   :  { %v166_v31 = vpop.permute.xlu0 %165  ;;  %v1239_v33 = vadd.f32 %v1238_v23, %v1237_v16  ;;  %595 = vperm.xlu1 %5018, %v109_v22   ;;  %v1243_v35 = vadd.f32 %v1242_v26, %v1241_v18  ;;  %v1283_v36 = vadd.f32 %v1282_v28, %v1069_v20  ;;  %v2084_v47 = vpack.c.bf16 %v1956_v32, %v1956_v32 }
  0x93   :  { %v1277_v37 = vadd.f32 %v1276_v29, %v1068_v21  ;;  %590 = vperm.xlu0 %5017, %v108_v25   ;;  %v1191_v39 = vadd.f32 %v1190_v24, %v1189_v17  ;;  %v1195_v42 = vadd.f32 %v1194_v27, %v1193_v19  ;;  %v817_v48 = vmul.f32 %v5341_v13, %v276_v10  ;;  %v88_v19 = vld [vmem:[%s6801_s0 + $0x220] sm:$0xff] }
  0x94   :  { %v1957_v41 = vmul.f32 0.125, %v1239_v33  ;;  %v1284_v43 = vrot.slane %v1283_v36, 2  ;;  %v816_v49 = vmul.f32 %v5341_v13, %v271_v11  ;;  %v2076_v50 = vpack.c.bf16 %v1948_v34, %v1948_v34  ;;  %v111_v34 = vld [vmem:[%s6801_s0 + $0x2d8] sm:$0xff] }
  0x95   :  { %v1278_v44 = vrot.slane %v1277_v37, 2  ;;  %v281_v45 = vpop.permute.xlu1 %280  ;;  %v1244_v51 = vrot.slane %v1243_v35, 1  ;;  %v949_v56 = vadd.f32 %v5345_v14, %v817_v48  ;;  %v5412_v61 = vmul.f32 0.125, %v1191_v39  ;;  %v103_v39 = vld [vmem:[%s6801_s0 + $0x298] sm:$0xff] }
  0x96   :  { %v241_v46 = vpop.permute.xlu0 %240  ;;  %525 = vperm.xlu1 %5018, %v95_v38   ;;  %v1285_v52 = vadd.f32 %v1284_v43, %v1283_v36  ;;  %v948_v57 = vadd.f32 %v5345_v14, %v816_v49  ;;  %v2085_v60 = vpack.c.bf16 %v1957_v41, %v1957_v41  ;;  %v1196_v62 = vrot.slane %v1195_v42, 1 }
  0x97   :  { %v1279_v53 = vadd.f32 %v1278_v44, %v1277_v37  ;;  %485 = vperm.xlu0 %5017, %v87_v40   ;;  %v1077_v4 = vmax.f32 %v949_v56, 0.0  ;;  %v803_v6 = vmul.f32 %v5341_v13, %v206_v30  ;;  %v795_v7 = vmul.f32 %v5341_v13, %v166_v31 }
  0x98   :  { %v1286_v1 = vrot.slane %v1285_v52, 1  ;;  %v1076_v5 = vmax.f32 %v948_v57, 0.0  ;;  %v5418_v8 = vunpack.c.l.b16 %v2084_v47  ;;  %v5420_v9 = vunpack.c.l.b16 %v2076_v50 }
  0x99   :  { %v211_v2 = vpop.permute.xlu1 %210  ;;  %v1245_v10 = vadd.f32 %v1244_v51, %v1243_v35  ;;  %v1280_v11 = vrot.slane %v1279_v53, 1  ;;  %v1330_v15 = vrot.slane %v1077_v4, 4  ;;  %v935_v17 = vadd.f32 %v5345_v14, %v803_v6 }
  0x9a   :  { %v5414_v3 = vpop.permute.xlu0 %170  ;;  %600 = vperm.xlu1 %5018, %v110_v54   ;;  %v1324_v16 = vrot.slane %v1076_v5, 4  ;;  %v927_v18 = vadd.f32 %v5345_v14, %v795_v7  ;;  %v5430_v20 = vunpack.c.l.b16 %v2085_v60  ;;  %v2077_v21 = vpack.c.bf16 %v5412_v61, %v5412_v61  ;;  %v89_v60 = vld [vmem:[%s6801_s0 + $0x228] sm:$0xff] }
  0x9b   :  { %560 = vperm.xlu0 %5017, %v102_v58   ;;  %v1197_v22 = vadd.f32 %v1196_v62, %v1195_v42  ;;  %v1287_v23 = vadd.f32 %v1286_v1, %v1285_v52  ;;  %v1331_v24 = vadd.f32 %v1330_v15, %v1077_v4  ;;  %v1063_v26 = vmax.f32 %v935_v17, 0.0  ;;  %v97_v52 = vld [vmem:[%s6801_s0 + $0x268] sm:$0xff]  ;;  %v112_v17 = vld [vmem:[%s6801_s0 + $0x2e0] sm:$0xff] }
  0x9c   :  { %v1325_v25 = vadd.f32 %v1324_v16, %v1076_v5  ;;  %v1055_v27 = vmax.f32 %v927_v18, 0.0  ;;  %v5438_v30 = vmul.f32 0.125, %v1245_v10  ;;  %v1281_v31 = vadd.f32 %v1280_v11, %v1279_v53 }
  0x9d   :  { %v5434_v28 = vpop.permute.xlu1 %285  ;;  %v818_v32 = vmul.f32 %v5341_v13, %v281_v45  ;;  %v810_v33 = vmul.f32 %v5341_v13, %v241_v46  ;;  %v1332_v35 = vrot.slane %v1331_v24, 2  ;;  %v1246_v37 = vrot.slane %v1063_v26, 4 }
  0x9e   :  { %v5436_v29 = vpop.permute.xlu0 %245  ;;  %530 = vperm.xlu1 %5018, %v96_v12   ;;  %v1326_v36 = vrot.slane %v1325_v25, 2  ;;  %v1198_v38 = vrot.slane %v1055_v27, 4  ;;  %v5448_v40 = vmul.f32 0.125, %v1197_v22  ;;  %v1965_v41 = vmul.f32 0.125, %v1287_v23  ;;  %v104_v23 = vld [vmem:[%s6801_s0 + $0x2a0] sm:$0xff] }
  0x9f   :  { %490 = vperm.xlu0 %5017, %v88_v19   ;;  %v950_v42 = vadd.f32 %v5345_v14, %v818_v32  ;;  %v942_v43 = vadd.f32 %v5345_v14, %v810_v33  ;;  %v1333_v44 = vadd.f32 %v1332_v35, %v1331_v24  ;;  %v1247_v46 = vadd.f32 %v1246_v37, %v1063_v26 }
  0xa0   :  { %v1327_v45 = vadd.f32 %v1326_v36, %v1325_v25  ;;  %v1199_v47 = vadd.f32 %v1198_v38, %v1055_v27  ;;  %v1964_v48 = vmul.f32 0.125, %v1281_v31  ;;  %v804_v51 = vmul.f32 %v5341_v13, %v211_v2 }
  0xa1   :  { %v1078_v49 = vmax.f32 %v950_v42, 0.0  ;;  %v1070_v50 = vmax.f32 %v942_v43, 0.0  ;;  %v1334_v53 = vrot.slane %v1333_v44, 1  ;;  %v1248_v55 = vrot.slane %v1247_v46, 2  ;;  %v5456_v57 = vpop.permute.xlu1 %215  ;;  %v98_v42 = vld [vmem:[%s6801_s0 + $0x270] sm:$0xff] }
  0xa2   :  { %605 = vperm.xlu1 %5018, %v111_v34   ;;  %v1328_v54 = vrot.slane %v1327_v45, 1  ;;  %v1200_v56 = vrot.slane %v1199_v47, 2  ;;  %v5458_v58 = vpop.permute.xlu0 %175  ;;  %v936_v2 = vadd.f32 %v5345_v14, %v804_v51  ;;  %v796_v4 = vmul.f32 %v5341_v13, %v5414_v3 }
  0xa3   :  { %565 = vperm.xlu0 %5017, %v103_v39   ;;  %v1336_v62 = vrot.slane %v1078_v49, 4  ;;  %v1288_v1 = vrot.slane %v1070_v50, 4  ;;  %v1335_v5 = vadd.f32 %v1334_v53, %v1333_v44  ;;  %v1249_v7 = vadd.f32 %v1248_v55, %v1247_v46 }
  0xa4   :  { %v1329_v6 = vadd.f32 %v1328_v54, %v1327_v45  ;;  %v1201_v10 = vadd.f32 %v1200_v56, %v1199_v47  ;;  %v1064_v15 = vmax.f32 %v936_v2, 0.0  ;;  %v928_v16 = vadd.f32 %v5345_v14, %v796_v4  ;;  %v90_v45 = vld [vmem:[%s6801_s0 + $0x230] sm:$0xff]  ;;  %v113_v56 = vld [vmem:[%s6801_s0 + $0x2e8] sm:$0xff] }
  0xa5   :  { %v1337_v11 = vadd.f32 %v1336_v62, %v1078_v49  ;;  %v1289_v12 = vadd.f32 %v1288_v1, %v1070_v50  ;;  %v2093_v18 = vpack.c.bf16 %v1965_v41, %v1965_v41  ;;  %v2092_v19 = vpack.c.bf16 %v1964_v48, %v1964_v48  ;;  %v5477_v35 = vpop.permute.xlu1 %290 }
  0xa6   :  { %535 = vperm.xlu1 %5018, %v97_v52   ;;  %v1250_v22 = vrot.slane %v1249_v7, 1  ;;  %v1202_v3 = vrot.slane %v1201_v10, 1  ;;  %v1252_v26 = vrot.slane %v1064_v15, 4  ;;  %v1056_v27 = vmax.f32 %v928_v16, 0.0  ;;  %v5479_v36 = vpop.permute.xlu0 %250 }
  0xa7   :  { %495 = vperm.xlu0 %5017, %v89_v60   ;;  %v1338_v24 = vrot.slane %v1337_v11, 2  ;;  %v1290_v25 = vrot.slane %v1289_v12, 2  ;;  %v2086_v31 = vpack.c.bf16 %v5438_v30, %v5438_v30  ;;  %v2078_v32 = vpack.c.bf16 %v5448_v40, %v5448_v40 }
  0xa8   :  { %v1973_v33 = vmul.f32 0.125, %v1335_v5  ;;  %v1972_v34 = vmul.f32 0.125, %v1329_v6  ;;  %v1253_v39 = vadd.f32 %v1252_v26, %v1064_v15  ;;  %v1204_v41 = vrot.slane %v1056_v27, 4  ;;  %v105_v5 = vld [vmem:[%s6801_s0 + $0x2a8] sm:$0xff] }
  0xa9   :  { %v1339_v37 = vadd.f32 %v1338_v24, %v1337_v11  ;;  %v1291_v38 = vadd.f32 %v1290_v25, %v1289_v12  ;;  %v5487_v30 = vunpack.c.l.b16 %v2077_v21  ;;  %v2369_v40 = vunpack.c.l.b16 %v2093_v18  ;;  %v221_v2 = vpop.permute.xlu1 %220 }
  0xaa   :  { %610 = vperm.xlu1 %5018, %v112_v17   ;;  %v2368_v43 = vunpack.c.l.b16 %v2092_v19  ;;  %v1251_v44 = vadd.f32 %v1250_v22, %v1249_v7  ;;  %v1203_v46 = vadd.f32 %v1202_v3, %v1201_v10  ;;  %v1254_v48 = vrot.slane %v1253_v39, 2  ;;  %v5509_v4 = vpop.permute.xlu0 %180  ;;  %v99_v3 = vld [vmem:[%s6801_s0 + $0x278] sm:$0xff] }
  0xab   :  { %570 = vperm.xlu0 %5017, %v104_v23   ;;  %v1340_v47 = vrot.slane %v1339_v37, 1  ;;  %v1205_v49 = vadd.f32 %v1204_v41, %v1056_v27  ;;  %v5492_v50 = vunpack.c.l.b16 %v2086_v31  ;;  %v5494_v51 = vunpack.c.l.b16 %v2078_v32 }
  0xac   :  { %v2101_v52 = vpack.c.bf16 %v1973_v33, %v1973_v33  ;;  %v819_v61 = vmul.f32 %v5341_v13, %v5434_v28  ;;  %v2100_v21 = vpack.c.bf16 %v1972_v34, %v1972_v34  ;;  %v1292_v53 = vrot.slane %v1291_v38, 1 }
  0xad   :  { %v1255_v54 = vadd.f32 %v1254_v48, %v1253_v39  ;;  %v1206_v55 = vrot.slane %v1205_v49, 2  ;;  %v5502_v60 = vsel %vm2480_vm0, %v2369_v40, %v2368_v43  ;;  %v5504_v62 = vmul.f32 0.125, %v1251_v44  ;;  %v5539_v39 = vpop.permute.xlu1 %295 }
  0xae   :  { %540 = vperm.xlu1 %5018, %v98_v42   ;;  %v951_v1 = vadd.f32 %v5345_v14, %v819_v61  ;;  %v811_v28 = vmul.f32 %v5341_v13, %v5436_v29  ;;  %v5514_v6 = vmul.f32 0.125, %v1203_v46  ;;  %v1341_v7 = vadd.f32 %v1340_v47, %v1339_v37  ;;  %v5541_v41 = vpop.permute.xlu0 %255 }
  0xaf   :  { %500 = vperm.xlu0 %5017, %v90_v45   ;;  %v1256_v10 = vrot.slane %v1255_v54, 1  ;;  %v1207_v11 = vadd.f32 %v1206_v55, %v1205_v49  ;;  %v805_v16 = vmul.f32 %v5341_v13, %v5456_v57  ;;  %v797_v29 = vmul.f32 %v5341_v13, %v5458_v58  ;;  %v91_v58 = vld [vmem:[%s6801_s0 + $0x238] sm:$0xff]  ;;  %v114_v45 = vld [vmem:[%s6801_s0 + $0x2f0] sm:$0xff] }
  0xb0   :  { %v1079_v12 = vmax.f32 %v951_v1, 0.0  ;;  %v943_v15 = vadd.f32 %v5345_v14, %v811_v28  ;;  %v5521_v17 = vunpack.c.l.b16 %v2101_v52  ;;  %v5523_v18 = vunpack.c.l.b16 %v2100_v21  ;;  %v106_v52 = vld [vmem:[%s6801_s0 + $0x2b0] sm:$0xff] }
  0xb1   :  { %v1293_v19 = vadd.f32 %v1292_v53, %v1291_v38  ;;  %v1208_v22 = vrot.slane %v1207_v11, 1  ;;  %v937_v25 = vadd.f32 %v5345_v14, %v805_v16  ;;  %v929_v57 = vadd.f32 %v5345_v14, %v797_v29  ;;  %v226_v29 = vpop.permute.xlu1 %225 }
  0xb2   :  { %615 = vperm.xlu1 %5018, %v113_v56   ;;  %v1342_v23 = vrot.slane %v1079_v12, 4  ;;  %v1071_v24 = vmax.f32 %v943_v15, 0.0  ;;  %v2087_v26 = vpack.c.bf16 %v5504_v62, %v5504_v62  ;;  %v2079_v27 = vpack.c.bf16 %v5514_v6, %v5514_v6 }
  0xb3   :  { %575 = vperm.xlu0 %5017, %v105_v5   ;;  %v5537_v31 = vmul.f32 0.125, %v1341_v7  ;;  %v1257_v32 = vadd.f32 %v1256_v10, %v1255_v54  ;;  %v1065_v37 = vmax.f32 %v937_v25, 0.0  ;;  %v1057_v38 = vmax.f32 %v929_v57, 0.0  ;;  %v115_v10 = vld [vmem:[%s6801_s0 + $0x2f8] sm:$0xff] }
  0xb4   :  { %v1343_v33 = vadd.f32 %v1342_v23, %v1079_v12  ;;  %v1294_v34 = vrot.slane %v1071_v24, 4  ;;  %v5543_v42 = vmul.f32 0.125, %v1293_v19  ;;  %v1209_v40 = vadd.f32 %v1208_v22, %v1207_v11  ;;  %v186_v19 = vpop.permute.xlu0 %185  ;;  %v107_v22 = vld [vmem:[%s6801_s0 + $0x2b8] sm:$0xff] }
  0xb5   :  { %v820_v43 = vmul.f32 %v5341_v13, %v5477_v35  ;;  %v812_v44 = vmul.f32 %v5341_v13, %v5479_v36  ;;  %v1258_v48 = vrot.slane %v1065_v37, 4  ;;  %v1210_v49 = vrot.slane %v1057_v38, 4 }
  0xb6   :  { %545 = vperm.xlu1 %5018, %v99_v3   ;;  %v1344_v46 = vrot.slane %v1343_v33, 2  ;;  %v1295_v47 = vadd.f32 %v1294_v34, %v1071_v24  ;;  %v2102_v61 = vpack.c.bf16 %v5537_v31, %v5537_v31  ;;  %v1960_v35 = vmul.f32 0.125, %v1257_v32 }
  0xb7   :  { %505 = vperm.xlu0 %5017, %v91_v58   ;;  %v952_v21 = vadd.f32 %v5345_v14, %v820_v43  ;;  %v944_v36 = vadd.f32 %v5345_v14, %v812_v44  ;;  %v1259_v55 = vadd.f32 %v1258_v48, %v1065_v37  ;;  %v1211_v56 = vadd.f32 %v1210_v49, %v1057_v38  ;;  %v117_v38 = vld [vmem:[%s6801_s0 + $0x308] sm:$0xff] }
  0xb8   :  { %v1345_v53 = vadd.f32 %v1344_v46, %v1343_v33  ;;  %v1296_v54 = vrot.slane %v1295_v47, 2  ;;  %v1952_v1 = vmul.f32 0.125, %v1209_v40  ;;  %v806_v7 = vmul.f32 %v5341_v13, %v221_v2 }
  0xb9   :  { %v1080_v28 = vmax.f32 %v952_v21, 0.0  ;;  %v1072_v5 = vmax.f32 %v944_v36, 0.0  ;;  %v1260_v15 = vrot.slane %v1259_v55, 2  ;;  %v1212_v16 = vrot.slane %v1211_v56, 2  ;;  %v301_v36 = vpop.permute.xlu1 %300 }
  0xba   :  { %620 = vperm.xlu1 %5018, %v114_v45   ;;  %v1346_v11 = vrot.slane %v1345_v53, 1  ;;  %v1297_v12 = vadd.f32 %v1296_v54, %v1295_v47  ;;  %v938_v24 = vadd.f32 %v5345_v14, %v806_v7  ;;  %v798_v2 = vmul.f32 %v5341_v13, %v5509_v4  ;;  %v116_v45 = vld [vmem:[%s6801_s0 + $0x300] sm:$0xff] }
  0xbb   :  { %580 = vperm.xlu0 %5017, %v106_v52   ;;  %v1348_v3 = vrot.slane %v1080_v28, 4  ;;  %v1300_v23 = vrot.slane %v1072_v5, 4  ;;  %v1261_v58 = vadd.f32 %v1260_v15, %v1259_v55  ;;  %v1213_v31 = vadd.f32 %v1212_v16, %v1211_v56 }
  0xbc   :  { %v1347_v25 = vadd.f32 %v1346_v11, %v1345_v53  ;;  %v1298_v57 = vrot.slane %v1297_v12, 1  ;;  %v1066_v34 = vmax.f32 %v938_v24, 0.0  ;;  %v930_v37 = vadd.f32 %v5345_v14, %v798_v2  ;;  %v261_v53 = vpop.permute.xlu0 %260  ;;  %v126_v24 = vld [vmem:[%s6801_s0 + $0x350] sm:$0xff] }
  0xbd   :  { %v1349_v32 = vadd.f32 %v1348_v3, %v1080_v28  ;;  %v1301_v33 = vadd.f32 %v1300_v23, %v1072_v5  ;;  %v2094_v40 = vpack.c.bf16 %v5543_v42, %v5543_v42  ;;  %v2088_v43 = vpack.c.bf16 %v1960_v35, %v1960_v35  ;;  %v124_v5 = vld [vmem:[%s6801_s0 + $0x340] sm:$0xff] }
  0xbe   :  { %625 = vperm.xlu1 %5018, %v115_v10   ;;  %v1975_v4 = vmul.f32 0.125, %v1347_v25  ;;  %v1299_v44 = vadd.f32 %v1298_v57, %v1297_v12  ;;  %v1264_v48 = vrot.slane %v1066_v34, 4  ;;  %v1058_v49 = vmax.f32 %v930_v37, 0.0  ;;  %v306_v57 = vpop.permute.xlu1 %305 }
  0xbf   :  { %585 = vperm.xlu0 %5017, %v107_v22   ;;  %v1350_v46 = vrot.slane %v1349_v32, 2  ;;  %v1302_v47 = vrot.slane %v1301_v33, 2  ;;  %v5581_v52 = vsel %vm2480_vm0, %v5521_v17, %v5523_v18  ;;  %v5586_v42 = vunpack.c.l.b16 %v2087_v26  ;;  %v125_v17 = vld [vmem:[%s6801_s0 + $0x348] sm:$0xff] }
  0xc0   :  { %v2080_v35 = vpack.c.bf16 %v1952_v1, %v1952_v1  ;;  %v1262_v21 = vrot.slane %v1261_v58, 1  ;;  %v1967_v54 = vmul.f32 0.125, %v1299_v44  ;;  %v1214_v55 = vrot.slane %v1213_v31, 1 }
  0xc1   :  { %v1351_v56 = vadd.f32 %v1350_v46, %v1349_v32  ;;  %v1303_v28 = vadd.f32 %v1302_v47, %v1301_v33  ;;  %v5594_v62 = vunpack.c.l.b16 %v2079_v27  ;;  %v5596_v18 = vunpack.c.l.b16 %v2102_v61  ;;  %v133_v46 = vld [vmem:[%s6801_s0 + $0x388] sm:$0xff] }
  0xc2   :  { %635 = vperm.xlu1 %5018, %v117_v38   ;;  %v5598_v26 = vunpack.c.l.b16 %v2094_v40  ;;  %v5600_v1 = vunpack.c.l.b16 %v2088_v43  ;;  %v2103_v7 = vpack.c.bf16 %v1975_v4, %v1975_v4  ;;  %v1265_v11 = vadd.f32 %v1264_v48, %v1066_v34 }
  0xc3   :  { %630 = vperm.xlu0 %5017, %v116_v45   ;;  %v1352_v10 = vrot.slane %v1351_v56, 1  ;;  %v1216_v12 = vrot.slane %v1058_v49, 4  ;;  %v5605_v15 = vunpack.c.l.b16 %v2080_v35  ;;  %v821_v6 = vmul.f32 %v5341_v13, %v5539_v39 }
  0xc4   :  { %v813_v27 = vmul.f32 %v5341_v13, %v5541_v41  ;;  %v807_v61 = vmul.f32 %v5341_v13, %v226_v29  ;;  %v2095_v16 = vpack.c.bf16 %v1967_v54, %v1967_v54  ;;  %v1263_v22 = vadd.f32 %v1262_v21, %v1261_v58  ;;  %v266_v29 = vpop.permute.xlu0 %265  ;;  %v118_v58 = vld [vmem:[%s6801_s0 + $0x310] sm:$0xff]  ;;  %v132_v21 = vld [vmem:[%s6801_s0 + $0x380] sm:$0xff] }
  0xc5   :  { %v1215_v3 = vadd.f32 %v1214_v55, %v1213_v31  ;;  %v1304_v23 = vrot.slane %v1303_v28, 1  ;;  %v953_v2 = vadd.f32 %v5345_v14, %v821_v6  ;;  %v799_v41 = vmul.f32 %v5341_v13, %v186_v19 }
  0xc6   :  { %675 = vperm.xlu1 %5018, %v125_v17   ;;  %v945_v25 = vadd.f32 %v5345_v14, %v813_v27  ;;  %v939_v39 = vadd.f32 %v5345_v14, %v807_v61  ;;  %v5622_v31 = vunpack.c.l.b16 %v2103_v7  ;;  %v1353_v32 = vadd.f32 %v1352_v10, %v1351_v56 }
  0xc7   :  { %670 = vperm.xlu0 %5017, %v124_v5   ;;  %v1266_v33 = vrot.slane %v1265_v11, 2  ;;  %v1217_v34 = vadd.f32 %v1216_v12, %v1058_v49  ;;  %v1081_v37 = vmax.f32 %v953_v2, 0.0  ;;  %v931_v43 = vadd.f32 %v5345_v14, %v799_v41 }
  0xc8   :  { %v1073_v38 = vmax.f32 %v945_v25, 0.0  ;;  %v1067_v40 = vmax.f32 %v939_v39, 0.0  ;;  %v5625_v4 = vunpack.c.l.b16 %v2095_v16  ;;  %v5627_v19 = vmul.f32 0.125, %v1263_v22  ;;  %v311_v12 = vpop.permute.xlu0 %310 }
  0xc9   :  { %v5629_v44 = vmul.f32 0.125, %v1215_v3  ;;  %v822_v45 = vmul.f32 %v5341_v13, %v301_v36  ;;  %v1305_v47 = vadd.f32 %v1304_v23, %v1303_v28  ;;  %v1354_v48 = vrot.slane %v1081_v37, 4  ;;  %v316_v28 = vpop.permute.xlu1 %315 }
  0xca   :  { %680 = vperm.xlu1 %5018, %v126_v24   ;;  %v1306_v49 = vrot.slane %v1073_v38, 4  ;;  %v1059_v35 = vmax.f32 %v931_v43, 0.0  ;;  %v5638_v54 = vadd.f32 %v1266_v33, %v1265_v11  ;;  %v1218_v55 = vrot.slane %v1217_v34, 2  ;;  %v140_v24 = vld [vmem:[%s6801_s0 + $0x3c0] sm:$0xff] }
  0xcb   :  { %640 = vperm.xlu0 %5017, %v118_v58   ;;  %v954_v56 = vadd.f32 %v5345_v14, %v822_v45  ;;  %v814_v36 = vmul.f32 %v5341_v13, %v261_v53  ;;  %v5642_v17 = vmul.f32 0.125, %v1353_v32  ;;  %v1355_v5 = vadd.f32 %v1354_v48, %v1081_v37  ;;  %v141_v53 = vld [vmem:[%s6801_s0 + $0x3c8] sm:$0xff]  ;;  %v127_v45 = vld [vmem:[%s6801_s0 + $0x358] sm:$0xff] }
  0xcc   :  { %v1307_v7 = vadd.f32 %v1306_v49, %v1073_v38  ;;  %v1270_v10 = vrot.slane %v1067_v40, 4  ;;  %v823_v61 = vmul.f32 %v5341_v13, %v306_v57  ;;  %v815_v11 = vmul.f32 %v5341_v13, %v266_v29 }
  0xcd   :  { %v1082_v6 = vmax.f32 %v954_v56, 0.0  ;;  %v946_v27 = vadd.f32 %v5345_v14, %v814_v36  ;;  %v5650_v16 = vmul.f32 0.125, %v1305_v47  ;;  %v1356_v22 = vrot.slane %v1355_v5, 2 }
  0xce   :  { %715 = vperm.xlu1 %5018, %v133_v46   ;;  %v1308_v3 = vrot.slane %v1307_v7, 2  ;;  %v1222_v23 = vrot.slane %v1059_v35, 4  ;;  %v955_v39 = vadd.f32 %v5345_v14, %v823_v61  ;;  %v947_v41 = vadd.f32 %v5345_v14, %v815_v11 }
  0xcf   :  { %710 = vperm.xlu0 %5017, %v132_v21   ;;  %v1360_v2 = vrot.slane %v1082_v6, 4  ;;  %v1074_v25 = vmax.f32 %v946_v27, 0.0  ;;  %v5657_v57 = vadd.f32 %v1218_v55, %v1217_v34  ;;  %v1357_v29 = vadd.f32 %v1356_v22, %v1355_v5  ;;  %v356_v34 = vpop.permute.xlu1 %355  ;;  %v351_v21 = vpop.permute.xlu0 %350 }
  0xd0   :  { %v1309_v58 = vadd.f32 %v1308_v3, %v1307_v7  ;;  %v1271_v32 = vadd.f32 %v1270_v10, %v1067_v40  ;;  %v1083_v38 = vmax.f32 %v955_v39, 0.0  ;;  %v1075_v43 = vmax.f32 %v947_v41, 0.0  ;;  %v119_v40 = vld [vmem:[%s6801_s0 + $0x318] sm:$0xff] }
  0xd1   :  { %v1361_v33 = vadd.f32 %v1360_v2, %v1082_v6  ;;  %v1312_v37 = vrot.slane %v1074_v25, 4  ;;  %v1358_v46 = vrot.slane %v1357_v29, 1  ;;  %v1223_v48 = vadd.f32 %v1222_v23, %v1059_v35 }
  0xd2   :  { %755 = vperm.xlu1 %5018, %v141_v53   ;;  %v1310_v47 = vrot.slane %v1309_v58, 1  ;;  %v825_v49 = vmul.f32 %v5341_v13, %v316_v28  ;;  %v1366_v36 = vrot.slane %v1083_v38, 4  ;;  %v1318_v5 = vrot.slane %v1075_v43, 4  ;;  %v142_v53 = vld [vmem:[%s6801_s0 + $0x3d0] sm:$0xff] }
  0xd3   :  { %750 = vperm.xlu0 %5017, %v140_v24   ;;  %v1362_v55 = vrot.slane %v1361_v33, 2  ;;  %v1313_v56 = vadd.f32 %v1312_v37, %v1074_v25  ;;  %v1359_v7 = vadd.f32 %v1358_v46, %v1357_v29  ;;  %v824_v27 = vmul.f32 %v5341_v13, %v311_v12  ;;  %v134_v12 = vld [vmem:[%s6801_s0 + $0x390] sm:$0xff]  ;;  %v361_v37 = vpop.permute.xlu1 %360 }
  0xd4   :  { %v1311_v10 = vadd.f32 %v1310_v47, %v1309_v58  ;;  %v957_v6 = vadd.f32 %v5345_v14, %v825_v49  ;;  %v1367_v28 = vadd.f32 %v1366_v36, %v1083_v38  ;;  %v1319_v11 = vadd.f32 %v1318_v5, %v1075_v43  ;;  %v321_v38 = vpop.permute.xlu0 %320  ;;  %v128_v47 = vld [vmem:[%s6801_s0 + $0x360] sm:$0xff] }
  0xd5   :  { %v1363_v35 = vadd.f32 %v1362_v55, %v1361_v33  ;;  %v1314_v61 = vrot.slane %v1313_v56, 2  ;;  %v2104_v22 = vpack.c.bf16 %v5642_v17, %v5642_v17  ;;  %v2096_v3 = vpack.c.bf16 %v5650_v16, %v5650_v16  ;;  %v120_v5 = vld [vmem:[%s6801_s0 + $0x320] sm:$0xff] }
  0xd6   :  { %685 = vperm.xlu1 %5018, %v127_v45   ;;  %v1085_v23 = vmax.f32 %v957_v6, 0.0  ;;  %v956_v24 = vadd.f32 %v5345_v14, %v824_v27  ;;  %v1977_v2 = vmul.f32 0.125, %v1359_v7  ;;  %v1969_v25 = vmul.f32 0.125, %v1311_v10 }
  0xd7   :  { %645 = vperm.xlu0 %5017, %v119_v40   ;;  %v1272_v39 = vrot.slane %v1271_v32, 2  ;;  %v1364_v41 = vrot.slane %v1363_v35, 1  ;;  %v1224_v16 = vrot.slane %v1223_v48, 2  ;;  %v1315_v43 = vadd.f32 %v1314_v61, %v1313_v56 }
  0xd8   :  { %v1378_v33 = vrot.slane %v1085_v23, 4  ;;  %v1084_v17 = vmax.f32 %v956_v24, 0.0  ;;  %v1368_v45 = vrot.slane %v1367_v28, 2  ;;  %v1320_v46 = vrot.slane %v1319_v11, 2 }
  0xd9   :  { %v5684_v49 = vunpack.c.l.b16 %v2104_v22  ;;  %v5686_v40 = vunpack.c.l.b16 %v2096_v3  ;;  %v2105_v7 = vpack.c.bf16 %v1977_v2, %v1977_v2  ;;  %v2097_v10 = vpack.c.bf16 %v1969_v25, %v1969_v25 }
  0xda   :  { %760 = vperm.xlu1 %5018, %v142_v53   ;;  %v1379_v55 = vadd.f32 %v1378_v33, %v1085_v23  ;;  %v1372_v36 = vrot.slane %v1084_v17, 4  ;;  %v5691_v56 = vadd.f32 %v1272_v39, %v1271_v32  ;;  %v1365_v6 = vadd.f32 %v1364_v41, %v1363_v35  ;;  %v143_v32 = vld [vmem:[%s6801_s0 + $0x3d8] sm:$0xff]  ;;  %v391_v39 = vpop.permute.xlu0 %390 }
  0xdb   :  { %720 = vperm.xlu0 %5017, %v134_v12   ;;  %v833_v53 = vmul.f32 %v5341_v13, %v356_v34  ;;  %v832_v22 = vmul.f32 %v5341_v13, %v351_v21  ;;  %v5695_v3 = vadd.f32 %v1224_v16, %v1223_v48  ;;  %v1316_v23 = vrot.slane %v1315_v43, 1  ;;  %v396_v21 = vpop.permute.xlu1 %395  ;;  %v135_v48 = vld [vmem:[%s6801_s0 + $0x398] sm:$0xff] }
  0xdc   :  { %v1380_v27 = vrot.slane %v1379_v55, 2  ;;  %v1373_v61 = vadd.f32 %v1372_v36, %v1084_v17  ;;  %v5697_v24 = vadd.f32 %v1368_v45, %v1367_v28  ;;  %v5699_v12 = vadd.f32 %v1320_v46, %v1319_v11 }
  0xdd   :  { %v965_v25 = vadd.f32 %v5345_v14, %v833_v53  ;;  %v964_v34 = vadd.f32 %v5345_v14, %v832_v22  ;;  %v5709_v28 = vunpack.c.l.b16 %v2105_v7  ;;  %v5711_v11 = vunpack.c.l.b16 %v2097_v10  ;;  %v129_v7 = vld [vmem:[%s6801_s0 + $0x368] sm:$0xff] }
  0xde   :  { %690 = vperm.xlu1 %5018, %v128_v47   ;;  %v1381_v35 = vadd.f32 %v1380_v27, %v1379_v55  ;;  %v1374_v2 = vrot.slane %v1373_v61, 2  ;;  %v5713_v41 = vmul.f32 0.125, %v1365_v6  ;;  %v834_v33 = vmul.f32 %v5341_v13, %v361_v37 }
  0xdf   :  { %650 = vperm.xlu0 %5017, %v120_v5   ;;  %v1093_v45 = vmax.f32 %v965_v25, 0.0  ;;  %v1092_v46 = vmax.f32 %v964_v34, 0.0  ;;  %v826_v55 = vmul.f32 %v5341_v13, %v321_v38  ;;  %v841_v36 = vmul.f32 %v5341_v13, %v396_v21 }
  0xe0   :  { %v1382_v17 = vrot.slane %v1381_v35, 1  ;;  %v1375_v16 = vadd.f32 %v1374_v2, %v1373_v61  ;;  %v966_v47 = vadd.f32 %v5345_v14, %v834_v33  ;;  %v840_v5 = vmul.f32 %v5341_v13, %v391_v39  ;;  %v121_v61 = vld [vmem:[%s6801_s0 + $0x328] sm:$0xff]  ;;  %v144_v33 = vld [vmem:[%s6801_s0 + $0x3e0] sm:$0xff] }
  0xe1   :  { %v1317_v10 = vadd.f32 %v1316_v23, %v1315_v43  ;;  %v1426_v6 = vrot.slane %v1093_v45, 4  ;;  %v1420_v27 = vrot.slane %v1092_v46, 4  ;;  %v958_v38 = vadd.f32 %v5345_v14, %v826_v55 }
  0xe2   :  { %765 = vperm.xlu1 %5018, %v143_v32   ;;  %v1376_v37 = vrot.slane %v1375_v16, 1  ;;  %v1094_v53 = vmax.f32 %v966_v47, 0.0  ;;  %v973_v22 = vadd.f32 %v5345_v14, %v841_v36  ;;  %v972_v32 = vadd.f32 %v5345_v14, %v840_v5 }
  0xe3   :  { %725 = vperm.xlu0 %5017, %v135_v48   ;;  %v1370_v2 = vrot.slane %v5697_v24, 1  ;;  %v1383_v25 = vadd.f32 %v1382_v17, %v1381_v35  ;;  %v1427_v34 = vadd.f32 %v1426_v6, %v1093_v45  ;;  %v1421_v21 = vadd.f32 %v1420_v27, %v1092_v46  ;;  %v136_v35 = vld [vmem:[%s6801_s0 + $0x3a0] sm:$0xff]  ;;  %v436_v6 = vpop.permute.xlu1 %435 }
  0xe4   :  { %v1432_v43 = vrot.slane %v1094_v53, 4  ;;  %v1086_v23 = vmax.f32 %v958_v38, 0.0  ;;  %v1101_v39 = vmax.f32 %v973_v22, 0.0  ;;  %v1100_v48 = vmax.f32 %v972_v32, 0.0 }
  0xe5   :  { %v1322_v47 = vrot.slane %v5699_v12, 1  ;;  %v1377_v55 = vadd.f32 %v1376_v37, %v1375_v16  ;;  %v1428_v36 = vrot.slane %v1427_v34, 2  ;;  %v1422_v5 = vrot.slane %v1421_v21, 2 }
  0xe6   :  { %695 = vperm.xlu1 %5018, %v129_v7   ;;  %v1433_v17 = vadd.f32 %v1432_v43, %v1094_v53  ;;  %v1384_v45 = vrot.slane %v1086_v23, 4  ;;  %v1474_v46 = vrot.slane %v1101_v39, 4  ;;  %v1468_v7 = vrot.slane %v1100_v48, 4  ;;  %v130_v53 = vld [vmem:[%s6801_s0 + $0x370] sm:$0xff] }
  0xe7   :  { %655 = vperm.xlu0 %5017, %v121_v61   ;;  %v1981_v61 = vmul.f32 0.125, %v1383_v25  ;;  %v1429_v38 = vadd.f32 %v1428_v36, %v1427_v34  ;;  %v1423_v22 = vadd.f32 %v1422_v5, %v1421_v21  ;;  %v1980_v43 = vmul.f32 0.125, %v1377_v55  ;;  %v122_v25 = vld [vmem:[%s6801_s0 + $0x330] sm:$0xff] }
  0xe8   :  { %v1434_v32 = vrot.slane %v1433_v17, 2  ;;  %v1385_v16 = vadd.f32 %v1384_v45, %v1086_v23  ;;  %v1475_v37 = vadd.f32 %v1474_v46, %v1101_v39  ;;  %v1469_v0 = vadd.f32 %v1468_v7, %v1100_v48  ;;  %v145_v7 = vld [vmem:[%s6801_s0 + $0x3e8] sm:$0xff] }
  0xe9   :  { %v1430_v63 = vrot.slane %v1429_v38, 1  ;;  %v1424_v29 = vrot.slane %v1423_v22, 1  ;;  %v849_v58 = vmul.f32 %v5341_v13, %v436_v6  ;;  %v5746_v39 = vmul.f32 0.125, %v1317_v10 }
  0xea   :  { %770 = vperm.xlu1 %5018, %v144_v33   ;;  %v1435_v34 = vadd.f32 %v1434_v32, %v1433_v17  ;;  %v1386_v21 = vrot.slane %v1385_v16, 2  ;;  %v1476_v33 = vrot.slane %v1475_v37, 2  ;;  %v1470_v23 = vrot.slane %v1469_v0, 2 }
  0xeb   :  { %730 = vperm.xlu0 %5017, %v136_v35   ;;  %v1431_v48 = vadd.f32 %v1430_v63, %v1429_v38  ;;  %v1425_v36 = vadd.f32 %v1424_v29, %v1423_v22  ;;  %v981_v5 = vadd.f32 %v5345_v14, %v849_v58  ;;  %v2109_v17 = vpack.c.bf16 %v1981_v61, %v1981_v61  ;;  %v137_v63 = vld [vmem:[%s6801_s0 + $0x3a8] sm:$0xff] }
  0xec   :  { %v1436_v55 = vrot.slane %v1435_v34, 1  ;;  %v1387_v35 = vadd.f32 %v1386_v21, %v1385_v16  ;;  %v1477_v45 = vadd.f32 %v1476_v33, %v1475_v37  ;;  %v1471_v46 = vadd.f32 %v1470_v23, %v1469_v0 }
  0xed   :  { %v1989_v6 = vmul.f32 0.125, %v1431_v48  ;;  %v1988_v32 = vmul.f32 0.125, %v1425_v36  ;;  %v1109_v27 = vmax.f32 %v981_v5, 0.0  ;;  %v2108_v29 = vpack.c.bf16 %v1980_v43, %v1980_v43  ;;  %v131_v43 = vld [vmem:[%s6801_s0 + $0x378] sm:$0xff] }
  0xee   :  { %700 = vperm.xlu1 %5018, %v130_v53   ;;  %v1437_v58 = vadd.f32 %v1436_v55, %v1435_v34  ;;  %v1388_v10 = vrot.slane %v1387_v35, 1  ;;  %v1478_v38 = vrot.slane %v1477_v45, 1  ;;  %v1371_v22 = vadd.f32 %v1370_v2, %v5697_v24 }
  0xef   :  { %660 = vperm.xlu0 %5017, %v122_v25   ;;  %v1472_v0 = vrot.slane %v1471_v46, 1  ;;  %v1522_v16 = vrot.slane %v1109_v27, 4  ;;  %v1226_v37 = vrot.slane %v5695_v3, 1  ;;  %v1323_v61 = vadd.f32 %v1322_v47, %v5699_v12  ;;  %v123_v12 = vld [vmem:[%s6801_s0 + $0x338] sm:$0xff] }
  0xf0   :  { %v2117_v53 = vpack.c.bf16 %v1989_v6, %v1989_v6  ;;  %v2116_v25 = vpack.c.bf16 %v1988_v32, %v1988_v32  ;;  %v1990_v21 = vmul.f32 0.125, %v1437_v58  ;;  %v1389_v34 = vadd.f32 %v1388_v10, %v1387_v35  ;;  %v138_v10 = vld [vmem:[%s6801_s0 + $0x3b0] sm:$0xff] }
  0xf1   :  { %v1523_v33 = vadd.f32 %v1522_v16, %v1109_v27  ;;  %v6808_v24 = vrot.slane %v5657_v57, 1  ;;  %v1227_v23 = vadd.f32 %v1226_v37, %v5695_v3  ;;  %v2098_v47 = vpack.c.bf16 %v5746_v39, %v5746_v39  ;;  %v431_v3 = vpop.permute.xlu0 %430 }
  0xf2   :  { %775 = vperm.xlu1 %5018, %v145_v7   ;;  %v2385_v48 = vunpack.c.l.b16 %v2109_v17  ;;  %v2384_v36 = vunpack.c.l.b16 %v2108_v29  ;;  %v1479_v5 = vadd.f32 %v1478_v38, %v1477_v45  ;;  %v1473_v55 = vadd.f32 %v1472_v0, %v1471_v46  ;;  %v146_v45 = vld [vmem:[%s6801_s0 + $0x3f0] sm:$0xff] }
  0xf3   :  { %735 = vperm.xlu0 %5017, %v137_v63   ;;  %v1221_v2 = vadd.f32 %v6808_v24, %v5657_v57  ;;  %v1524_v35 = vrot.slane %v1523_v33, 2  ;;  %v6809_v27 = vrot.slane %v5638_v54, 1  ;;  %v1274_v57 = vrot.slane %v5691_v56, 1 }
  0xf4   :  { %v5774_v6 = vmul.f32 0.125, %v1371_v22  ;;  %v2393_v32 = vunpack.c.l.b16 %v2117_v53  ;;  %v2392_v63 = vunpack.c.l.b16 %v2116_v25  ;;  %v2118_v58 = vpack.c.bf16 %v1990_v21, %v1990_v21  ;;  %v366_v21 = vpop.permute.xlu1 %365 }
  0xf5   :  { %v1269_v7 = vadd.f32 %v6809_v27, %v5638_v54  ;;  %v5779_v46 = vmul.f32 0.125, %v1389_v34  ;;  %v1275_v54 = vadd.f32 %v1274_v57, %v5691_v56  ;;  %v1954_v17 = vmul.f32 0.125, %v1221_v2 }
  0xf6   :  { %705 = vperm.xlu1 %5018, %v131_v43   ;;  %v1955_v29 = vmul.f32 0.125, %v1227_v23  ;;  %v5785_v38 = vmul.f32 0.125, %v1323_v61  ;;  %v5788_v22 = vsel %vm2480_vm0, %v2385_v48, %v2384_v36  ;;  %v5790_v0 = vmul.f32 0.125, %v1479_v5  ;;  %v326_v48 = vpop.permute.xlu0 %325  ;;  %v139_v36 = vld [vmem:[%s6801_s0 + $0x3b8] sm:$0xff] }
  0xf7   :  { %665 = vperm.xlu0 %5017, %v123_v12   ;;  %v1525_v16 = vadd.f32 %v1524_v35, %v1523_v33  ;;  %v5792_v37 = vmul.f32 0.125, %v1473_v55  ;;  %v1962_v53 = vmul.f32 0.125, %v1269_v7  ;;  %v1963_v56 = vmul.f32 0.125, %v1275_v54  ;;  %v147_v33 = vld [vmem:[%s6801_s0 + $0x3f8] sm:$0xff] }
  0xf8   :  { %v2081_v25 = vpack.c.bf16 %v5629_v44, %v5629_v44  ;;  %v5797_v43 = vsel %vm2480_vm0, %v2393_v32, %v2392_v63  ;;  %v5799_v61 = vunpack.c.l.b16 %v2118_v58  ;;  %v2082_v34 = vpack.c.bf16 %v1954_v17, %v1954_v17 }
  0xf9   :  { %v2083_v24 = vpack.c.bf16 %v1955_v29, %v1955_v29  ;;  %v2110_v2 = vpack.c.bf16 %v5779_v46, %v5779_v46  ;;  %v2089_v44 = vpack.c.bf16 %v5627_v19, %v5627_v19  ;;  %v2090_v23 = vpack.c.bf16 %v1962_v53, %v1962_v53 }
  0xfa   :  { %780 = vperm.xlu1 %5018, %v146_v45   ;;  %v2091_v12 = vpack.c.bf16 %v1963_v56, %v1963_v56  ;;  %v2125_v5 = vpack.c.bf16 %v5790_v0, %v5790_v0  ;;  %v1526_v55 = vrot.slane %v1525_v16, 1  ;;  %v2357_v35 = vunpack.c.l.b16 %v2081_v25  ;;  %v401_v25 = vpop.permute.xlu0 %400 }
  0xfb   :  { %740 = vperm.xlu0 %5017, %v138_v10   ;;  %v2358_v27 = vunpack.c.l.b16 %v2082_v34  ;;  %v2359_v7 = vunpack.c.l.b16 %v2083_v24  ;;  %v2365_v57 = vunpack.c.l.b16 %v2089_v44  ;;  %v2366_v32 = vunpack.c.l.b16 %v2090_v23  ;;  %v441_v10 = vpop.permute.xlu1 %440 }
  0xfc   :  { %v2481_v19 = vsel %vm2480_vm0, %v5487_v30, %v5420_v9  ;;  %v2494_v58 = vsel %vm2480_vm0, %v5430_v20, %v5418_v8  ;;  %v848_v45 = vmul.f32 %v5341_v13, %v431_v3  ;;  %v835_v54 = vmul.f32 %v5341_v13, %v366_v21 }
  0xfd   :  { %v2483_v63 = vsel %vm2482_vm1, %v5494_v51, %v2481_v19  ;;  %v2367_v17 = vunpack.c.l.b16 %v2091_v12  ;;  %v2495_v9 = vsel %vm2482_vm1, %v5492_v50, %v2494_v58  ;;  %v827_v30 = vmul.f32 %v5341_v13, %v326_v48 }
  0xfe   :  { %785 = vperm.xlu1 %5018, %v147_v33   ;;  %v2485_v29 = vsel %vm2484_vm2, %v5594_v62, %v2483_v63  ;;  %v2496_v8 = vsel %vm2484_vm2, %v5586_v42, %v2495_v9  ;;  %v980_v20 = vadd.f32 %v5345_v14, %v848_v45  ;;  %v967_v3 = vadd.f32 %v5345_v14, %v835_v54 }
  0xff   :  { %745 = vperm.xlu0 %5017, %v139_v36   ;;  %v2487_v51 = vsel %vm2486_vm3, %v5605_v15, %v2485_v29  ;;  %v1527_v53 = vadd.f32 %v1526_v55, %v1525_v16  ;;  %v2497_v62 = vsel %vm2486_vm3, %v5600_v1, %v2496_v8  ;;  %v959_v50 = vadd.f32 %v5345_v14, %v827_v30  ;;  %v331_v29 = vpop.permute.xlu0 %330 }
 0x100   :  { %v2489_v56 = vsel %vm2488_vm4, %v2357_v35, %v2487_v51  ;;  %v2498_v15 = vsel %vm2488_vm4, %v2365_v57, %v2497_v62  ;;  %v1108_v34 = vmax.f32 %v980_v20, 0.0  ;;  %v1095_v24 = vmax.f32 %v967_v3, 0.0 }
 0x101   :  { %v2491_v21 = vsel %vm2490_vm5, %v2358_v27, %v2489_v56  ;;  %v2499_v33 = vsel %vm2490_vm5, %v2366_v32, %v2498_v15  ;;  %v1087_v44 = vmax.f32 %v959_v50, 0.0  ;;  %v850_v16 = vmul.f32 %v5341_v13, %v441_v10 }
 0x102   :  { %v2493_v42 = vsel %vm2492_vm6, %v2359_v7, %v2491_v21  ;;  %v2500_v23 = vsel %vm2492_vm6, %v2367_v17, %v2499_v33  ;;  %v1516_v12 = vrot.slane %v1108_v34, 4  ;;  %v1438_v1 = vrot.slane %v1095_v24, 4  ;;  %v371_v7 = vpop.permute.xlu1 %370 }
 0x103   :  { %v2099_v48 = vpack.c.bf16 %v5785_v38, %v5785_v38  ;;  %v2599_v36 = vpack.c.b16 %v2500_v23, %v2493_v42  ;;  %v1390_v55 = vrot.slane %v1087_v44, 4  ;;  %v982_v35 = vadd.f32 %v5345_v14, %v850_v16 }
 0x104   :  { %v2107_v27 = vpack.c.bf16 %v5774_v6, %v5774_v6  ;;  %v1517_v57 = vadd.f32 %v1516_v12, %v1108_v34  ;;  %v1439_v32 = vadd.f32 %v1438_v1, %v1095_v24  ;;  %v2374_v19 = vunpack.c.l.b16 %v2098_v47  ;;  %v406_v24 = vpop.permute.xlu0 %405 }
 0x105   :  { %v2375_v63 = vunpack.c.l.b16 %v2099_v48  ;;  %4712 = vmatprep.mubr.bf16.mxu0 %v2599_v36  ;;  %v1391_v58 = vadd.f32 %v1390_v55, %v1087_v44  ;;  %v1110_v45 = vmax.f32 %v982_v35, 0.0  ;;  %v6810_v38 = vpack.c.bf16 %v5713_v41, %v5713_v41 }
 0x106   :  { %v2383_v17 = vunpack.c.l.b16 %v2107_v27  ;;  %v1518_v9 = vrot.slane %v1517_v57, 2  ;;  %v1440_v30 = vrot.slane %v1439_v32, 2  ;;  %v2502_v6 = vsel %vm2482_vm1, %v5598_v26, %v5502_v60 }
 0x107   :  { %v2382_v54 = vunpack.c.l.b16 %v6810_v38  ;;  %v2509_v39 = vsel %vm2482_vm1, %v5596_v18, %v5581_v52  ;;  %v1392_v47 = vrot.slane %v1391_v58, 2  ;;  %v1528_v10 = vrot.slane %v1110_v45, 4 }
 0x108   :  { %v2503_v51 = vsel %vm2484_vm2, %v5625_v4, %v2502_v6  ;;  %v2510_v41 = vsel %vm2484_vm2, %v5622_v31, %v2509_v39  ;;  %v1519_v8 = vadd.f32 %v1518_v9, %v1517_v57  ;;  %v1441_v20 = vadd.f32 %v1440_v30, %v1439_v32  ;;  %v446_v4 = vpop.permute.xlu1 %445 }
 0x109   :  { %v2504_v3 = vsel %vm2486_vm3, %v5686_v40, %v2503_v51  ;;  %v2511_v60 = vsel %vm2486_vm3, %v5684_v49, %v2510_v41  ;;  %v1393_v26 = vadd.f32 %v1392_v47, %v1391_v58  ;;  %v1529_v56 = vadd.f32 %v1528_v10, %v1110_v45 }
 0x10a   :  { %v2505_v52 = vsel %vm2488_vm4, %v5711_v11, %v2504_v3  ;;  %v2512_v18 = vsel %vm2488_vm4, %v5709_v28, %v2511_v60  ;;  %v2124_v31 = vpack.c.bf16 %v5792_v37, %v5792_v37  ;;  %v2005_v62 = vmul.f32 0.125, %v1527_v53 }
 0x10b   :  { %v2506_v50 = vsel %vm2490_vm5, %v2374_v19, %v2505_v52  ;;  %v2513_v40 = vsel %vm2490_vm5, %v2382_v54, %v2512_v18  ;;  %v1520_v21 = vrot.slane %v1519_v8, 1  ;;  %v1530_v15 = vrot.slane %v1529_v56, 2 }
 0x10c   :  { %v2507_v49 = vsel %vm2492_vm6, %v2375_v63, %v2506_v50  ;;  %v2514_v34 = vsel %vm2492_vm6, %v2383_v17, %v2513_v40  ;;  %v5882_v28 = vsel %vm2482_vm1, %v5799_v61, %v5797_v43  ;;  %v1442_v11 = vrot.slane %v1441_v20, 1  ;;  %v376_v55 = vpop.permute.xlu1 %375  ;;  %v336_v63 = vpop.permute.xlu0 %335 }
 0x10d   :  { %v2600_v42 = vpack.c.b16 %v2514_v34, %v2507_v49  ;;  %v842_v37 = vmul.f32 %v5341_v13, %v401_v25  ;;  %v1394_v53 = vrot.slane %v1393_v26, 1  ;;  %v1531_v33 = vadd.f32 %v1530_v15, %v1529_v56 }
 0x10e   :  { %v836_v44 = vmul.f32 %v5341_v13, %v371_v7  ;;  %v828_v16 = vmul.f32 %v5341_v13, %v331_v29  ;;  %v2386_v23 = vunpack.c.l.b16 %v2110_v2  ;;  %v2133_v12 = vpack.c.bf16 %v2005_v62, %v2005_v62 }
 0x10f   :  { %4713 = vmatmul.mubr.bf16.vlgmr.msra.gmra.mxu0 %v2600_v42  ;;  %v974_v1 = vadd.f32 %v5345_v14, %v842_v37  ;;  %v851_v43 = vmul.f32 %v5341_v13, %v446_v4  ;;  %v1521_v61 = vadd.f32 %v1520_v21, %v1519_v8  ;;  %v1532_v48 = vrot.slane %v1531_v33, 1 }
 0x110   :  { %v968_v25 = vadd.f32 %v5345_v14, %v836_v44  ;;  %v960_v36 = vadd.f32 %v5345_v14, %v828_v16  ;;  %v5897_v35 = vunpack.c.l.b16 %v2125_v5  ;;  %v1443_v46 = vadd.f32 %v1442_v11, %v1441_v20  ;;  %v451_v41 = vpop.permute.xlu1 %450  ;;  %v411_v4 = vpop.permute.xlu0 %410 }
 0x111   :  { %v1102_v2 = vmax.f32 %v974_v1, 0.0  ;;  %v983_v27 = vadd.f32 %v5345_v14, %v851_v43  ;;  %v5900_v7 = vunpack.c.l.b16 %v2124_v31  ;;  %v1395_v57 = vadd.f32 %v1394_v53, %v1393_v26 }
 0x112   :  { %v1096_v32 = vmax.f32 %v968_v25, 0.0  ;;  %v1088_v19 = vmax.f32 %v960_v36, 0.0  ;;  %v5904_v58 = vsel %vm2482_vm1, %v2386_v23, %v5788_v22  ;;  %v5906_v45 = vunpack.c.l.b16 %v2133_v12 }
 0x113   :  { %v1480_v38 = vrot.slane %v1102_v2, 4  ;;  %v1111_v0 = vmax.f32 %v983_v27, 0.0  ;;  %v2004_v5 = vmul.f32 0.125, %v1521_v61  ;;  %v1533_v54 = vadd.f32 %v1532_v48, %v1531_v33 }
 0x114   :  { %v1444_v17 = vrot.slane %v1096_v32, 4  ;;  %v1396_v29 = vrot.slane %v1088_v19, 4  ;;  %v1991_v9 = vmul.f32 0.125, %v1443_v46  ;;  %v843_v39 = vmul.f32 %v5341_v13, %v406_v24  ;;  %v381_v23 = vpop.permute.xlu1 %380  ;;  %v341_v46 = vpop.permute.xlu0 %340 }
 0x115   :  { %v1481_v30 = vadd.f32 %v1480_v38, %v1102_v2  ;;  %v1534_v6 = vrot.slane %v1111_v0, 4  ;;  %v5909_v47 = vmul.f32 0.125, %v1395_v57  ;;  %v837_v22 = vmul.f32 %v5341_v13, %v376_v55 }
 0x116   :  { %v1445_v10 = vadd.f32 %v1444_v17, %v1096_v32  ;;  %v1397_v51 = vadd.f32 %v1396_v29, %v1088_v19  ;;  %v975_v3 = vadd.f32 %v5345_v14, %v843_v39  ;;  %v829_v60 = vmul.f32 %v5341_v13, %v336_v63 }
 0x117   :  { %v1482_v8 = vrot.slane %v1481_v30, 2  ;;  %v1535_v20 = vadd.f32 %v1534_v6, %v1111_v0  ;;  %v2006_v26 = vmul.f32 0.125, %v1533_v54  ;;  %v969_v18 = vadd.f32 %v5345_v14, %v837_v22 }
 0x118   :  { %v1446_v56 = vrot.slane %v1445_v10, 2  ;;  %v1398_v52 = vrot.slane %v1397_v51, 2  ;;  %v1103_v50 = vmax.f32 %v975_v3, 0.0  ;;  %v961_v40 = vadd.f32 %v5345_v14, %v829_v60 }
 0x119   :  { %v1483_v31 = vadd.f32 %v1482_v8, %v1481_v30  ;;  %v1536_v62 = vrot.slane %v1535_v20, 2  ;;  %v2132_v21 = vpack.c.bf16 %v2004_v5, %v2004_v5  ;;  %v1097_v34 = vmax.f32 %v969_v18, 0.0 }
 0x11a   :  { %v1447_v15 = vadd.f32 %v1446_v56, %v1445_v10  ;;  %v1399_v49 = vadd.f32 %v1398_v52, %v1397_v51  ;;  %v1486_v42 = vrot.slane %v1103_v50, 4  ;;  %v1089_v37 = vmax.f32 %v961_v40, 0.0 }
 0x11b   :  { %v1484_v24 = vrot.slane %v1483_v31, 1  ;;  %v1537_v11 = vadd.f32 %v1536_v62, %v1535_v20  ;;  %v2134_v53 = vpack.c.bf16 %v2006_v26, %v2006_v26  ;;  %v1450_v44 = vrot.slane %v1097_v34, 4  ;;  %v416_v26 = vpop.permute.xlu0 %415 }
 0x11c   :  { %v1448_v33 = vrot.slane %v1447_v15, 1  ;;  %v852_v16 = vmul.f32 %v5341_v13, %v451_v41  ;;  %v1400_v1 = vrot.slane %v1399_v49, 1  ;;  %v1487_v43 = vadd.f32 %v1486_v42, %v1103_v50 }
 0x11d   :  { %v1485_v12 = vadd.f32 %v1484_v24, %v1483_v31  ;;  %v1402_v61 = vrot.slane %v1089_v37, 4  ;;  %v2119_v48 = vpack.c.bf16 %v1991_v9, %v1991_v9  ;;  %v1538_v25 = vrot.slane %v1537_v11, 1 }
 0x11e   :  { %v1451_v36 = vadd.f32 %v1450_v44, %v1097_v34  ;;  %v984_v55 = vadd.f32 %v5345_v14, %v852_v16  ;;  %v2111_v2 = vpack.c.bf16 %v5909_v47, %v5909_v47  ;;  %v1449_v27 = vadd.f32 %v1448_v33, %v1447_v15  ;;  %v456_v47 = vpop.permute.xlu1 %455 }
 0x11f   :  { %v1488_v57 = vrot.slane %v1487_v43, 2  ;;  %v1403_v32 = vadd.f32 %v1402_v61, %v1089_v37  ;;  %v2408_v19 = vunpack.c.l.b16 %v2132_v21  ;;  %v2410_v63 = vunpack.c.l.b16 %v2134_v53 }
 0x120   :  { %v1452_v38 = vrot.slane %v1451_v36, 2  ;;  %v1112_v0 = vmax.f32 %v984_v55, 0.0  ;;  %v1998_v5 = vmul.f32 0.125, %v1485_v12  ;;  %v1401_v54 = vadd.f32 %v1400_v1, %v1399_v49  ;;  %v346_v1 = vpop.permute.xlu0 %345 }
 0x121   :  { %v1489_v17 = vadd.f32 %v1488_v57, %v1487_v43  ;;  %v1404_v29 = vrot.slane %v1403_v32, 2  ;;  %v5923_v9 = vsel %vm2480_vm0, %v5897_v35, %v5900_v7  ;;  %v1539_v30 = vadd.f32 %v1538_v25, %v1537_v11 }
 0x122   :  { %v1453_v6 = vadd.f32 %v1452_v38, %v1451_v36  ;;  %v1540_v39 = vrot.slane %v1112_v0, 4  ;;  %v5925_v10 = vunpack.c.l.b16 %v2119_v48  ;;  %v1992_v51 = vmul.f32 0.125, %v1449_v27  ;;  %v386_v42 = vpop.permute.xlu1 %385 }
 0x123   :  { %v1490_v22 = vrot.slane %v1489_v17, 1  ;;  %v1405_v41 = vadd.f32 %v1404_v29, %v1403_v32  ;;  %v2536_v8 = vsel %vm2480_vm0, %v5906_v45, %v2408_v19  ;;  %v5929_v20 = vunpack.c.l.b16 %v2111_v2 }
 0x124   :  { %v1454_v3 = vrot.slane %v1453_v6, 1  ;;  %v1541_v60 = vadd.f32 %v1540_v39, %v1112_v0  ;;  %v5932_v35 = vsel %vm2482_vm1, %v2410_v63, %v2536_v8  ;;  %v2126_v7 = vpack.c.bf16 %v1998_v5, %v1998_v5 }
 0x125   :  { %v5934_v56 = vmul.f32 0.125, %v1401_v54  ;;  %v1491_v52 = vadd.f32 %v1490_v22, %v1489_v17  ;;  %v5936_v18 = vmul.f32 0.125, %v1539_v30  ;;  %v844_v62 = vmul.f32 %v5341_v13, %v411_v4 }
 0x126   :  { %v1542_v31 = vrot.slane %v1541_v60, 2  ;;  %v838_v50 = vmul.f32 %v5341_v13, %v381_v23  ;;  %v2120_v45 = vpack.c.bf16 %v1992_v51, %v1992_v51  ;;  %v1406_v40 = vrot.slane %v1405_v41, 1  ;;  %v461_v54 = vpop.permute.xlu1 %460 }
 0x127   :  { %v830_v21 = vmul.f32 %v5341_v13, %v341_v46  ;;  %v853_v15 = vmul.f32 %v5341_v13, %v456_v47  ;;  %v1455_v49 = vadd.f32 %v1454_v3, %v1453_v6  ;;  %v976_v24 = vadd.f32 %v5345_v14, %v844_v62 }
 0x128   :  { %v1543_v34 = vadd.f32 %v1542_v31, %v1541_v60  ;;  %v970_v11 = vadd.f32 %v5345_v14, %v838_v50  ;;  %v2112_v37 = vpack.c.bf16 %v5934_v56, %v5934_v56  ;;  %v5946_v53 = vmul.f32 0.125, %v1491_v52 }
 0x129   :  { %v962_v4 = vadd.f32 %v5345_v14, %v830_v21  ;;  %v985_v33 = vadd.f32 %v5345_v14, %v853_v15  ;;  %v5950_v44 = vunpack.c.l.b16 %v2126_v7  ;;  %v1104_v23 = vmax.f32 %v976_v24, 0.0 }
 0x12a   :  { %v1544_v16 = vrot.slane %v1543_v34, 1  ;;  %v1098_v12 = vmax.f32 %v970_v11, 0.0  ;;  %v5952_v43 = vunpack.c.l.b16 %v2120_v45  ;;  %v2135_v61 = vpack.c.bf16 %v5936_v18, %v5936_v18  ;;  %v466_v11 = vpop.permute.xlu1 %465 }
 0x12b   :  { %v1090_v48 = vmax.f32 %v962_v4, 0.0  ;;  %v1113_v25 = vmax.f32 %v985_v33, 0.0  ;;  %v5956_v36 = vmul.f32 0.125, %v1455_v49  ;;  %v1407_v55 = vadd.f32 %v1406_v40, %v1405_v41  ;;  %v421_v41 = vpop.permute.xlu0 %420 }
 0x12c   :  { %v1492_v46 = vrot.slane %v1104_v23, 4  ;;  %v1456_v2 = vrot.slane %v1098_v12, 4  ;;  %v2127_v27 = vpack.c.bf16 %v5946_v53, %v5946_v53  ;;  %v845_v19 = vmul.f32 %v5341_v13, %v416_v26 }
 0x12d   :  { %v1408_v57 = vrot.slane %v1090_v48, 4  ;;  %v1546_v32 = vrot.slane %v1113_v25, 4  ;;  %v1545_v63 = vadd.f32 %v1544_v16, %v1543_v34  ;;  %v839_v5 = vmul.f32 %v5341_v13, %v386_v42 }
 0x12e   :  { %v1493_v38 = vadd.f32 %v1492_v46, %v1104_v23  ;;  %v1457_v0 = vadd.f32 %v1456_v2, %v1098_v12  ;;  %v977_v30 = vadd.f32 %v5345_v14, %v845_v19  ;;  %v831_v6 = vmul.f32 %v5341_v13, %v346_v1 }
 0x12f   :  { %v1409_v17 = vadd.f32 %v1408_v57, %v1090_v48  ;;  %v1547_v29 = vadd.f32 %v1546_v32, %v1113_v25  ;;  %v1985_v39 = vmul.f32 0.125, %v1407_v55  ;;  %v971_v22 = vadd.f32 %v5345_v14, %v839_v5  ;;  %v426_v48 = vpop.permute.xlu0 %425 }
 0x130   :  { %v1494_v47 = vrot.slane %v1493_v38, 2  ;;  %v1458_v51 = vrot.slane %v1457_v0, 2  ;;  %v1105_v60 = vmax.f32 %v977_v30, 0.0  ;;  %v963_v26 = vadd.f32 %v5345_v14, %v831_v6  ;;  %v476_v6 = vpop.permute.xlu1 %475 }
 0x131   :  { %v1410_v8 = vrot.slane %v1409_v17, 2  ;;  %v1548_v3 = vrot.slane %v1547_v29, 2  ;;  %v2008_v7 = vmul.f32 0.125, %v1545_v63  ;;  %v1099_v62 = vmax.f32 %v971_v22, 0.0 }
 0x132   :  { %v1495_v52 = vadd.f32 %v1494_v47, %v1493_v38  ;;  %v1459_v31 = vadd.f32 %v1458_v51, %v1457_v0  ;;  %v1498_v40 = vrot.slane %v1105_v60, 4  ;;  %v1091_v21 = vmax.f32 %v963_v26, 0.0 }
 0x133   :  { %v1411_v50 = vadd.f32 %v1410_v8, %v1409_v17  ;;  %v1549_v45 = vadd.f32 %v1548_v3, %v1547_v29  ;;  %v1462_v34 = vrot.slane %v1099_v62, 4  ;;  %v854_v24 = vmul.f32 %v5341_v13, %v461_v54  ;;  %v471_v8 = vpop.permute.xlu0 %470 }
 0x134   :  { %v1496_v15 = vrot.slane %v1495_v52, 1  ;;  %v1460_v49 = vrot.slane %v1459_v31, 1  ;;  %v1499_v4 = vadd.f32 %v1498_v40, %v1105_v60  ;;  %v1414_v33 = vrot.slane %v1091_v21, 4 }
 0x135   :  { %v1412_v42 = vrot.slane %v1411_v50, 1  ;;  %v1550_v53 = vrot.slane %v1549_v45, 1  ;;  %v1463_v12 = vadd.f32 %v1462_v34, %v1099_v62  ;;  %v986_v1 = vadd.f32 %v5345_v14, %v854_v24  ;;  %v516_v34 = vpop.permute.xlu1 %515 }
 0x136   :  { %v1497_v16 = vadd.f32 %v1496_v15, %v1495_v52  ;;  %v1461_v23 = vadd.f32 %v1460_v49, %v1459_v31  ;;  %v1500_v46 = vrot.slane %v1499_v4, 2  ;;  %v1415_v2 = vadd.f32 %v1414_v33, %v1091_v21 }
 0x137   :  { %v1413_v25 = vadd.f32 %v1412_v42, %v1411_v50  ;;  %v1551_v55 = vadd.f32 %v1550_v53, %v1549_v45  ;;  %v2121_v57 = vpack.c.bf16 %v5956_v36, %v5956_v36  ;;  %v2113_v32 = vpack.c.bf16 %v1985_v39, %v1985_v39 }
 0x138   :  { %v2000_v19 = vmul.f32 0.125, %v1497_v16  ;;  %v1114_v63 = vmax.f32 %v986_v1, 0.0  ;;  %v2136_v38 = vpack.c.bf16 %v2008_v7, %v2008_v7  ;;  %v1994_v0 = vmul.f32 0.125, %v1461_v23  ;;  %v511_v23 = vpop.permute.xlu0 %510 }
 0x139   :  { %v1986_v5 = vmul.f32 0.125, %v1413_v25  ;;  %v1464_v54 = vrot.slane %v1463_v12, 2  ;;  %v5973_v17 = vsel %vm2482_vm1, %v5950_v44, %v5923_v9  ;;  %v5978_v29 = vunpack.c.l.b16 %v2112_v37 }
 0x13a   :  { %v5980_v30 = vmul.f32 0.125, %v1551_v55  ;;  %v1552_v36 = vrot.slane %v1114_v63, 4  ;;  %v5985_v39 = vunpack.c.l.b16 %v2135_v61  ;;  %v5987_v47 = vunpack.c.l.b16 %v2127_v27 }
 0x13b   :  { %v1501_v51 = vadd.f32 %v1500_v46, %v1499_v4  ;;  %v1416_v22 = vrot.slane %v1415_v2, 2  ;;  %v5989_v9 = vunpack.c.l.b16 %v2121_v57  ;;  %v5991_v44 = vunpack.c.l.b16 %v2113_v32 }
 0x13c   :  { %v2128_v56 = vpack.c.bf16 %v2000_v19, %v2000_v19  ;;  %v1553_v37 = vadd.f32 %v1552_v36, %v1114_v63  ;;  %v5993_v3 = vunpack.c.l.b16 %v2136_v38  ;;  %v2122_v60 = vpack.c.bf16 %v1994_v0, %v1994_v0 }
 0x13d   :  { %v2114_v26 = vpack.c.bf16 %v1986_v5, %v1986_v5  ;;  %v1465_v7 = vadd.f32 %v1464_v54, %v1463_v12  ;;  %v2137_v18 = vpack.c.bf16 %v5980_v30, %v5980_v30  ;;  %v846_v27 = vmul.f32 %v5341_v13, %v421_v41 }
 0x13e   :  { %v1554_v61 = vrot.slane %v1553_v37, 2  ;;  %v855_v52 = vmul.f32 %v5341_v13, %v466_v11  ;;  %v1502_v31 = vrot.slane %v1501_v51, 1  ;;  %v5999_v62 = vadd.f32 %v1416_v22, %v1415_v2 }
 0x13f   :  { %v847_v50 = vmul.f32 %v5341_v13, %v426_v48  ;;  %v857_v45 = vmul.f32 %v5341_v13, %v476_v6  ;;  %v6003_v40 = vunpack.c.l.b16 %v2128_v56  ;;  %v978_v15 = vadd.f32 %v5345_v14, %v846_v27 }
 0x140   :  { %v1555_v21 = vadd.f32 %v1554_v61, %v1553_v37  ;;  %v987_v49 = vadd.f32 %v5345_v14, %v855_v52  ;;  %v6007_v24 = vunpack.c.l.b16 %v2122_v60  ;;  %v1466_v41 = vrot.slane %v1465_v7, 1  ;;  %v521_v61 = vpop.permute.xlu1 %520 }
 0x141   :  { %v979_v11 = vadd.f32 %v5345_v14, %v847_v50  ;;  %v989_v42 = vadd.f32 %v5345_v14, %v857_v45  ;;  %v6011_v53 = vunpack.c.l.b16 %v2114_v26  ;;  %v1106_v4 = vmax.f32 %v978_v15, 0.0 }
 0x142   :  { %v1115_v33 = vmax.f32 %v987_v49, 0.0  ;;  %v856_v16 = vmul.f32 %v5341_v13, %v471_v8  ;;  %v1503_v12 = vadd.f32 %v1502_v31, %v1501_v51  ;;  %v865_v25 = vmul.f32 %v5341_v13, %v516_v34 }
 0x143   :  { %v1107_v1 = vmax.f32 %v979_v11, 0.0  ;;  %v1117_v48 = vmax.f32 %v989_v42, 0.0  ;;  %v1556_v55 = vrot.slane %v1555_v21, 1  ;;  %v1504_v46 = vrot.slane %v1106_v4, 4 }
 0x144   :  { %v1558_v2 = vrot.slane %v1115_v33, 4  ;;  %v988_v57 = vadd.f32 %v5345_v14, %v856_v16  ;;  %v997_v63 = vadd.f32 %v5345_v14, %v865_v25  ;;  %v864_v38 = vmul.f32 %v5341_v13, %v511_v23 }
 0x145   :  { %v1510_v32 = vrot.slane %v1107_v1, 4  ;;  %v1570_v19 = vrot.slane %v1117_v48, 4  ;;  %v1418_v0 = vrot.slane %v5999_v62, 1  ;;  %v1505_v5 = vadd.f32 %v1504_v46, %v1106_v4 }
 0x146   :  { %v1559_v54 = vadd.f32 %v1558_v2, %v1115_v33  ;;  %v1116_v36 = vmax.f32 %v988_v57, 0.0  ;;  %v1125_v22 = vmax.f32 %v997_v63, 0.0  ;;  %v996_v56 = vadd.f32 %v5345_v14, %v864_v38 }
 0x147   :  { %v1511_v6 = vadd.f32 %v1510_v32, %v1107_v1  ;;  %v1571_v51 = vadd.f32 %v1570_v19, %v1117_v48  ;;  %v1557_v37 = vadd.f32 %v1556_v55, %v1555_v21  ;;  %v1506_v8 = vrot.slane %v1505_v5, 2  ;;  %v556_v32 = vpop.permute.xlu1 %555 }
 0x148   :  { %v1560_v60 = vrot.slane %v1559_v54, 2  ;;  %v1564_v26 = vrot.slane %v1116_v36, 4  ;;  %v1618_v31 = vrot.slane %v1125_v22, 4  ;;  %v1124_v50 = vmax.f32 %v996_v56, 0.0 }
 0x149   :  { %v1512_v27 = vrot.slane %v1511_v6, 2  ;;  %v1572_v52 = vrot.slane %v1571_v51, 2  ;;  %v2001_v45 = vmul.f32 0.125, %v1503_v12  ;;  %v1467_v15 = vadd.f32 %v1466_v41, %v1465_v7  ;;  %v481_v7 = vpop.permute.xlu0 %480 }
 0x14a   :  { %v1507_v49 = vadd.f32 %v1506_v8, %v1505_v5  ;;  %v1565_v34 = vadd.f32 %v1564_v26, %v1116_v36  ;;  %v1561_v11 = vadd.f32 %v1560_v60, %v1559_v54  ;;  %v1619_v4 = vadd.f32 %v1618_v31, %v1125_v22 }
 0x14b   :  { %v1513_v42 = vadd.f32 %v1512_v27, %v1511_v6  ;;  %v1612_v33 = vrot.slane %v1124_v50, 4  ;;  %v2010_v16 = vmul.f32 0.125, %v1557_v37  ;;  %v1573_v23 = vadd.f32 %v1572_v52, %v1571_v51 }
 0x14c   :  { %v1566_v1 = vrot.slane %v1565_v34, 2  ;;  %v866_v21 = vmul.f32 %v5341_v13, %v521_v61  ;;  %v6024_v48 = vunpack.c.l.b16 %v2137_v18  ;;  %v1508_v25 = vrot.slane %v1507_v49, 1 }
 0x14d   :  { %v1620_v55 = vrot.slane %v1619_v4, 2  ;;  %v1613_v12 = vadd.f32 %v1612_v33, %v1124_v50  ;;  %v2129_v41 = vpack.c.bf16 %v2001_v45, %v2001_v45  ;;  %v1419_v46 = vadd.f32 %v1418_v0, %v5999_v62  ;;  %v551_v52 = vpop.permute.xlu0 %550 }
 0x14e   :  { %v1567_v2 = vadd.f32 %v1566_v1, %v1565_v34  ;;  %v998_v57 = vadd.f32 %v5345_v14, %v866_v21  ;;  %v1562_v19 = vrot.slane %v1561_v11, 1  ;;  %v1514_v63 = vrot.slane %v1513_v42, 1 }
 0x14f   :  { %v1621_v38 = vadd.f32 %v1620_v55, %v1619_v4  ;;  %v1614_v5 = vrot.slane %v1613_v12, 2  ;;  %v6028_v54 = vmul.f32 0.125, %v1467_v15  ;;  %v2138_v30 = vpack.c.bf16 %v2010_v16, %v2010_v16 }
 0x150   :  { %v1574_v18 = vrot.slane %v1573_v23, 1  ;;  %v1126_v36 = vmax.f32 %v998_v57, 0.0  ;;  %v1509_v6 = vadd.f32 %v1508_v25, %v1507_v49  ;;  %v1568_v51 = vrot.slane %v1567_v2, 1  ;;  %v596_v49 = vpop.permute.xlu1 %595 }
 0x151   :  { %v1622_v22 = vrot.slane %v1621_v38, 1  ;;  %v1615_v56 = vadd.f32 %v1614_v5, %v1613_v12  ;;  %v6030_v37 = vunpack.c.l.b16 %v2129_v41  ;;  %v1987_v62 = vmul.f32 0.125, %v1419_v46 }
 0x152   :  { %v1624_v0 = vrot.slane %v1126_v36, 4  ;;  %v858_v8 = vmul.f32 %v5341_v13, %v481_v7  ;;  %v1563_v60 = vadd.f32 %v1562_v19, %v1561_v11  ;;  %v1515_v26 = vadd.f32 %v1514_v63, %v1513_v42 }
 0x153   :  { %v1616_v61 = vrot.slane %v1615_v56, 1  ;;  %v873_v27 = vmul.f32 %v5341_v13, %v556_v32  ;;  %v6034_v31 = vunpack.c.l.b16 %v2138_v30  ;;  %v1575_v50 = vadd.f32 %v1574_v18, %v1573_v23 }
 0x154   :  { %v1625_v45 = vadd.f32 %v1624_v0, %v1126_v36  ;;  %v990_v15 = vadd.f32 %v5345_v14, %v858_v8  ;;  %v6037_v34 = vmul.f32 0.125, %v1509_v6  ;;  %v1569_v4 = vadd.f32 %v1568_v51, %v1567_v2 }
 0x155   :  { %v1623_v33 = vadd.f32 %v1622_v22, %v1621_v38  ;;  %v1005_v16 = vadd.f32 %v5345_v14, %v873_v27  ;;  %v1617_v1 = vadd.f32 %v1616_v61, %v1615_v56  ;;  %v872_v21 = vmul.f32 %v5341_v13, %v551_v52 }
 0x156   :  { %v1626_v11 = vrot.slane %v1625_v45, 2  ;;  %v1118_v42 = vmax.f32 %v990_v15, 0.0  ;;  %v6041_v25 = vmul.f32 0.125, %v1563_v60  ;;  %v6043_v55 = vmul.f32 0.125, %v1515_v26 }
 0x157   :  { %v1133_v23 = vmax.f32 %v1005_v16, 0.0  ;;  %v881_v12 = vmul.f32 %v5341_v13, %v596_v49  ;;  %v2013_v7 = vmul.f32 0.125, %v1575_v50  ;;  %v1004_v2 = vadd.f32 %v5345_v14, %v872_v21  ;;  %v591_v50 = vpop.permute.xlu0 %590 }
 0x158   :  { %v1627_v41 = vadd.f32 %v1626_v11, %v1625_v45  ;;  %v1576_v46 = vrot.slane %v1118_v42, 4  ;;  %v2012_v57 = vmul.f32 0.125, %v1569_v4  ;;  %v2021_v32 = vmul.f32 0.125, %v1623_v33 }
 0x159   :  { %v1666_v19 = vrot.slane %v1133_v23, 4  ;;  %v1013_v63 = vadd.f32 %v5345_v14, %v881_v12  ;;  %v2020_v38 = vmul.f32 0.125, %v1617_v1  ;;  %v1132_v18 = vmax.f32 %v1004_v2, 0.0  ;;  %v526_v1 = vpop.permute.xlu1 %525 }
 0x15a   :  { %v1628_v5 = vrot.slane %v1627_v41, 1  ;;  %v1577_v30 = vadd.f32 %v1576_v46, %v1118_v42  ;;  %v2130_v36 = vpack.c.bf16 %v6037_v34, %v6037_v34  ;;  %v2115_v22 = vpack.c.bf16 %v1987_v62, %v1987_v62 }
 0x15b   :  { %v1667_v6 = vadd.f32 %v1666_v19, %v1133_v23  ;;  %v1141_v51 = vmax.f32 %v1013_v63, 0.0  ;;  %v2141_v56 = vpack.c.bf16 %v2013_v7, %v2013_v7  ;;  %v1660_v8 = vrot.slane %v1132_v18, 4 }
 0x15c   :  { %v1578_v0 = vrot.slane %v1577_v30, 2  ;;  %v2123_v60 = vpack.c.bf16 %v6028_v54, %v6028_v54  ;;  %v2140_v26 = vpack.c.bf16 %v2012_v57, %v2012_v57  ;;  %v2149_v61 = vpack.c.bf16 %v2021_v32, %v2021_v32 }
 0x15d   :  { %v1668_v27 = vrot.slane %v1667_v6, 2  ;;  %v1714_v52 = vrot.slane %v1141_v51, 4  ;;  %v2148_v45 = vpack.c.bf16 %v2020_v38, %v2020_v38  ;;  %v1629_v15 = vadd.f32 %v1628_v5, %v1627_v41 }
 0x15e   :  { %v1579_v49 = vadd.f32 %v1578_v0, %v1577_v30  ;;  %v1661_v4 = vadd.f32 %v1660_v8, %v1132_v18  ;;  %v2391_v16 = vunpack.c.l.b16 %v2115_v22  ;;  %v2517_v62 = vsel %vm2484_vm2, %v5929_v20, %v5904_v58  ;;  %v601_v18 = vpop.permute.xlu1 %600 }
 0x15f   :  { %v1669_v33 = vadd.f32 %v1668_v27, %v1667_v6  ;;  %v1715_v34 = vadd.f32 %v1714_v52, %v1141_v51  ;;  %v2399_v54 = vunpack.c.l.b16 %v2123_v60  ;;  %v2518_v21 = vsel %vm2486_vm3, %v5978_v29, %v2517_v62 }
 0x160   :  { %v1580_v11 = vrot.slane %v1579_v49, 1  ;;  %v1662_v42 = vrot.slane %v1661_v4, 2  ;;  %v2519_v7 = vsel %vm2488_vm4, %v5991_v44, %v2518_v21  ;;  %v2524_v41 = vsel %vm2484_vm2, %v5925_v10, %v5882_v28  ;;  %v486_v44 = vpop.permute.xlu0 %485 }
 0x161   :  { %v1670_v23 = vrot.slane %v1669_v33, 1  ;;  %v1716_v12 = vrot.slane %v1715_v34, 2  ;;  %v2022_v46 = vmul.f32 0.125, %v1629_v15  ;;  %v2520_v58 = vsel %vm2490_vm5, %v6011_v53, %v2519_v7 }
 0x162   :  { %v1663_v2 = vadd.f32 %v1662_v42, %v1661_v4  ;;  %v2525_v20 = vsel %vm2486_vm3, %v5952_v43, %v2524_v41  ;;  %v2417_v57 = vunpack.c.l.b16 %v2141_v56  ;;  %v1581_v32 = vadd.f32 %v1580_v11, %v1579_v49 }
 0x163   :  { %v2521_v29 = vsel %vm2492_vm6, %v2391_v16, %v2520_v58  ;;  %v2526_v19 = vsel %vm2488_vm4, %v5989_v9, %v2525_v20  ;;  %v2416_v63 = vunpack.c.l.b16 %v2140_v26  ;;  %v2425_v38 = vunpack.c.l.b16 %v2149_v61 }
 0x164   :  { %v1671_v5 = vadd.f32 %v1670_v23, %v1669_v33  ;;  %v2527_v28 = vsel %vm2490_vm5, %v6007_v24, %v2526_v19  ;;  %v1664_v10 = vrot.slane %v1663_v2, 1  ;;  %v1717_v30 = vadd.f32 %v1716_v12, %v1715_v34  ;;  %v561_v15 = vpop.permute.xlu0 %560  ;;  %v531_v12 = vpop.permute.xlu1 %530 }
 0x165   :  { %v2528_v53 = vsel %vm2492_vm6, %v2399_v54, %v2527_v28  ;;  %v880_v43 = vmul.f32 %v5341_v13, %v591_v50  ;;  %v2424_v6 = vunpack.c.l.b16 %v2148_v45  ;;  %v2150_v51 = vpack.c.bf16 %v2022_v46, %v2022_v46 }
 0x166   :  { %v2601_v22 = vpack.c.b16 %v2528_v53, %v2521_v29  ;;  %v867_v56 = vmul.f32 %v5341_v13, %v526_v1  ;;  %v2406_v9 = vunpack.c.l.b16 %v2130_v36  ;;  %v6074_v0 = vmul.f32 0.125, %v1581_v32 }
 0x167   :  { %v1012_v8 = vadd.f32 %v5345_v14, %v880_v43  ;;  %v859_v60 = vmul.f32 %v5341_v13, %v486_v44  ;;  %v6079_v24 = vsel %vm2480_vm0, %v2417_v57, %v2416_v63  ;;  %v6081_v26 = vmul.f32 0.125, %v1671_v5 }
 0x168   :  { %4716 = vmatprep.mubr.bf16.mxu0 %v2601_v22  ;;  %v999_v61 = vadd.f32 %v5345_v14, %v867_v56  ;;  %v882_v27 = vmul.f32 %v5341_v13, %v601_v18  ;;  %v1665_v52 = vadd.f32 %v1664_v10, %v1663_v2  ;;  %v1718_v50 = vrot.slane %v1717_v30, 1  ;;  %v606_v18 = vpop.permute.xlu1 %605 }
 0x169   :  { %v1140_v45 = vmax.f32 %v1012_v8, 0.0  ;;  %v991_v36 = vadd.f32 %v5345_v14, %v859_v60  ;;  %v6087_v49 = vsel %vm2480_vm0, %v2425_v38, %v2424_v6  ;;  %v6089_v4 = vunpack.c.l.b16 %v2150_v51 }
 0x16a   :  { %v1127_v33 = vmax.f32 %v999_v61, 0.0  ;;  %v1014_v34 = vadd.f32 %v5345_v14, %v882_v27  ;;  %v2142_v16 = vpack.c.bf16 %v6074_v0, %v6074_v0  ;;  %v2131_v11 = vpack.c.bf16 %v6043_v55, %v6043_v55 }
 0x16b   :  { %v1708_v62 = vrot.slane %v1140_v45, 4  ;;  %v1119_v1 = vmax.f32 %v991_v36, 0.0  ;;  %v2157_v42 = vpack.c.bf16 %v6081_v26, %v6081_v26  ;;  %v2139_v23 = vpack.c.bf16 %v6041_v25, %v6041_v25  ;;  %v491_v25 = vpop.permute.xlu0 %490 }
 0x16c   :  { %v1630_v54 = vrot.slane %v1127_v33, 4  ;;  %v1142_v21 = vmax.f32 %v1014_v34, 0.0  ;;  %v2028_v7 = vmul.f32 0.125, %v1665_v52  ;;  %v1719_v41 = vadd.f32 %v1718_v50, %v1717_v30 }
 0x16d   :  { %v1709_v46 = vadd.f32 %v1708_v62, %v1140_v45  ;;  %v1582_v2 = vrot.slane %v1119_v1, 4  ;;  %v2407_v57 = vunpack.c.l.b16 %v2131_v11  ;;  %v2415_v32 = vunpack.c.l.b16 %v2139_v23  ;;  %v536_v11 = vpop.permute.xlu1 %535 }
 0x16e   :  { %v1631_v58 = vadd.f32 %v1630_v54, %v1127_v33  ;;  %v1720_v20 = vrot.slane %v1142_v21, 4  ;;  %v2531_v55 = vsel %vm2484_vm2, %v5987_v47, %v5973_v17  ;;  %v2538_v44 = vsel %vm2484_vm2, %v5985_v39, %v5932_v35 }
 0x16f   :  { %v1710_v29 = vrot.slane %v1709_v46, 2  ;;  %v1583_v19 = vadd.f32 %v1582_v2, %v1119_v1  ;;  %v2532_v5 = vsel %vm2486_vm3, %v6003_v40, %v2531_v55  ;;  %v2539_v28 = vsel %vm2486_vm3, %v5993_v3, %v2538_v44  ;;  %v566_v26 = vpop.permute.xlu0 %565 }
 0x170   :  { %v1632_v63 = vrot.slane %v1631_v58, 2  ;;  %v1721_v38 = vadd.f32 %v1720_v20, %v1142_v21  ;;  %v2533_v53 = vsel %vm2488_vm4, %v6030_v37, %v2532_v5  ;;  %v2540_v17 = vsel %vm2488_vm4, %v6024_v48, %v2539_v28 }
 0x171   :  { %v1711_v10 = vadd.f32 %v1710_v29, %v1709_v46  ;;  %v1584_v30 = vrot.slane %v1583_v19, 2  ;;  %v2534_v35 = vsel %vm2490_vm5, %v2406_v9, %v2533_v53  ;;  %v2541_v39 = vsel %vm2490_vm5, %v6034_v31, %v2540_v17  ;;  %v611_v28 = vpop.permute.xlu1 %610 }
 0x172   :  { %v1633_v47 = vadd.f32 %v1632_v63, %v1631_v58  ;;  %v1722_v43 = vrot.slane %v1721_v38, 2  ;;  %v2156_v40 = vpack.c.bf16 %v2028_v7, %v2028_v7  ;;  %v2037_v6 = vmul.f32 0.125, %v1719_v41 }
 0x173   :  { %v2535_v3 = vsel %vm2492_vm6, %v2407_v57, %v2534_v35  ;;  %v2542_v51 = vsel %vm2492_vm6, %v2415_v32, %v2541_v39  ;;  %v1712_v22 = vrot.slane %v1711_v10, 1  ;;  %v874_v0 = vmul.f32 %v5341_v13, %v561_v15  ;;  %v496_v57 = vpop.permute.xlu0 %495 }
 0x174   :  { %v1723_v56 = vadd.f32 %v1722_v43, %v1721_v38  ;;  %v2602_v37 = vpack.c.b16 %v2542_v51, %v2535_v3  ;;  %v1634_v48 = vrot.slane %v1633_v47, 1  ;;  %v1585_v8 = vadd.f32 %v1584_v30, %v1583_v19 }
 0x175   :  { %v868_v60 = vmul.f32 %v5341_v13, %v531_v12  ;;  %v860_v9 = vmul.f32 %v5341_v13, %v491_v25  ;;  %v2418_v31 = vunpack.c.l.b16 %v2142_v16  ;;  %v1006_v27 = vadd.f32 %v5345_v14, %v874_v0 }
 0x176   :  { %v1724_v61 = vrot.slane %v1723_v56, 1  ;;  %4717 = vmatmul.mubr.bf16.gmra.mxu0 %v2602_v37  ;;  %v883_v52 = vmul.f32 %v5341_v13, %v606_v18  ;;  %v2433_v50 = vunpack.c.l.b16 %v2157_v42  ;;  %v2165_v45 = vpack.c.bf16 %v2037_v6, %v2037_v6 }
 0x177   :  { %v1000_v36 = vadd.f32 %v5345_v14, %v868_v60  ;;  %v992_v15 = vadd.f32 %v5345_v14, %v860_v9  ;;  %v2432_v33 = vunpack.c.l.b16 %v2156_v40  ;;  %v1713_v34 = vadd.f32 %v1712_v22, %v1711_v10  ;;  %v571_v51 = vpop.permute.xlu0 %570 }
 0x178   :  { %v1134_v62 = vmax.f32 %v1006_v27, 0.0  ;;  %v1015_v1 = vadd.f32 %v5345_v14, %v883_v52  ;;  %v1635_v54 = vadd.f32 %v1634_v48, %v1633_v47  ;;  %v1586_v16 = vrot.slane %v1585_v8, 1  ;;  %v541_v52 = vpop.permute.xlu1 %540 }
 0x179   :  { %v1128_v21 = vmax.f32 %v1000_v36, 0.0  ;;  %v1120_v23 = vmax.f32 %v992_v15, 0.0  ;;  %v6130_v12 = vsel %vm2482_vm1, %v6089_v4, %v6087_v49  ;;  %v1725_v42 = vadd.f32 %v1724_v61, %v1723_v56 }
 0x17a   :  { %v1672_v7 = vrot.slane %v1134_v62, 4  ;;  %v1143_v41 = vmax.f32 %v1015_v1, 0.0  ;;  %v6134_v46 = vsel %vm2482_vm1, %v2418_v31, %v6079_v24  ;;  %v2441_v2 = vunpack.c.l.b16 %v2165_v45 }
 0x17b   :  { %v1636_v58 = vrot.slane %v1128_v21, 4  ;;  %v1588_v20 = vrot.slane %v1120_v23, 4  ;;  %v6137_v32 = vsel %vm2480_vm0, %v2433_v50, %v2432_v33  ;;  %v2036_v29 = vmul.f32 0.125, %v1713_v34 }
 0x17c   :  { %v1673_v19 = vadd.f32 %v1672_v7, %v1134_v62  ;;  %v1726_v55 = vrot.slane %v1143_v41, 4  ;;  %v2023_v44 = vmul.f32 0.125, %v1635_v54  ;;  %v1587_v49 = vadd.f32 %v1586_v16, %v1585_v8 }
 0x17d   :  { %v1637_v4 = vadd.f32 %v1636_v58, %v1128_v21  ;;  %v1589_v25 = vadd.f32 %v1588_v20, %v1120_v23  ;;  %v2038_v63 = vmul.f32 0.125, %v1725_v42  ;;  %v875_v24 = vmul.f32 %v5341_v13, %v566_v26  ;;  %v501_v23 = vpop.permute.xlu0 %500 }
 0x17e   :  { %v1674_v38 = vrot.slane %v1673_v19, 2  ;;  %v1727_v5 = vadd.f32 %v1726_v55, %v1143_v41  ;;  %v869_v53 = vmul.f32 %v5341_v13, %v536_v11  ;;  %v861_v17 = vmul.f32 %v5341_v13, %v496_v57 }
 0x17f   :  { %v1638_v10 = vrot.slane %v1637_v4, 2  ;;  %v1590_v30 = vrot.slane %v1589_v25, 2  ;;  %v2164_v47 = vpack.c.bf16 %v2036_v29, %v2036_v29  ;;  %v1007_v39 = vadd.f32 %v5345_v14, %v875_v24 }
 0x180   :  { %v1675_v43 = vadd.f32 %v1674_v38, %v1673_v19  ;;  %v1728_v35 = vrot.slane %v1727_v5, 2  ;;  %v1001_v6 = vadd.f32 %v5345_v14, %v869_v53  ;;  %v993_v3 = vadd.f32 %v5345_v14, %v861_v17 }
 0x181   :  { %v1639_v18 = vadd.f32 %v1638_v10, %v1637_v4  ;;  %v1591_v40 = vadd.f32 %v1590_v30, %v1589_v25  ;;  %v2015_v22 = vmul.f32 0.125, %v1587_v49  ;;  %v2166_v56 = vpack.c.bf16 %v2038_v63, %v2038_v63  ;;  %v616_v25 = vpop.permute.xlu1 %615 }
 0x182   :  { %v1135_v37 = vmax.f32 %v1007_v39, 0.0  ;;  %v884_v0 = vmul.f32 %v5341_v13, %v611_v28  ;;  %v1676_v48 = vrot.slane %v1675_v43, 1  ;;  %v1729_v8 = vadd.f32 %v1728_v35, %v1727_v5  ;;  %v576_v35 = vpop.permute.xlu0 %575 }
 0x183   :  { %v1129_v60 = vmax.f32 %v1001_v6, 0.0  ;;  %v1121_v9 = vmax.f32 %v993_v3, 0.0  ;;  %v1640_v26 = vrot.slane %v1639_v18, 1  ;;  %v1592_v31 = vrot.slane %v1591_v40, 1 }
 0x184   :  { %v1678_v61 = vrot.slane %v1135_v37, 4  ;;  %v1016_v27 = vadd.f32 %v5345_v14, %v884_v0  ;;  %v2440_v50 = vunpack.c.l.b16 %v2164_v47  ;;  %v2151_v45 = vpack.c.bf16 %v2023_v44, %v2023_v44 }
 0x185   :  { %v1642_v36 = vrot.slane %v1129_v60, 4  ;;  %v1594_v15 = vrot.slane %v1121_v9, 4  ;;  %v2143_v33 = vpack.c.bf16 %v2015_v22, %v2015_v22  ;;  %v2442_v34 = vunpack.c.l.b16 %v2166_v56 }
 0x186   :  { %v1679_v62 = vadd.f32 %v1678_v61, %v1135_v37  ;;  %v1144_v1 = vmax.f32 %v1016_v27, 0.0  ;;  %v1677_v11 = vadd.f32 %v1676_v48, %v1675_v43  ;;  %v1730_v54 = vrot.slane %v1729_v8, 1 }
 0x187   :  { %v1643_v16 = vadd.f32 %v1642_v36, %v1129_v60  ;;  %v1595_v21 = vadd.f32 %v1594_v15, %v1121_v9  ;;  %v1641_v42 = vadd.f32 %v1640_v26, %v1639_v18  ;;  %v1593_v7 = vadd.f32 %v1592_v31, %v1591_v40  ;;  %v546_v60 = vpop.permute.xlu1 %545 }
 0x188   :  { %v1680_v41 = vrot.slane %v1679_v62, 2  ;;  %v1732_v58 = vrot.slane %v1144_v1, 4  ;;  %v2564_v20 = vsel %vm2480_vm0, %v2441_v2, %v2440_v50  ;;  %v6148_v57 = vunpack.c.l.b16 %v2151_v45 }
 0x189   :  { %v1644_v29 = vrot.slane %v1643_v16, 2  ;;  %v1596_v19 = vrot.slane %v1595_v21, 2  ;;  %v6150_v55 = vunpack.c.l.b16 %v2143_v33  ;;  %v6153_v44 = vsel %vm2482_vm1, %v2442_v34, %v2564_v20 }
 0x18a   :  { %v1681_v49 = vadd.f32 %v1680_v41, %v1679_v62  ;;  %v1733_v4 = vadd.f32 %v1732_v58, %v1144_v1  ;;  %v2030_v63 = vmul.f32 0.125, %v1677_v11  ;;  %v1731_v38 = vadd.f32 %v1730_v54, %v1729_v8  ;;  %v506_v62 = vpop.permute.xlu0 %505 }
 0x18b   :  { %v1645_v5 = vadd.f32 %v1644_v29, %v1643_v16  ;;  %v1597_v24 = vadd.f32 %v1596_v19, %v1595_v21  ;;  %v2024_v28 = vmul.f32 0.125, %v1641_v42  ;;  %v6155_v10 = vmul.f32 0.125, %v1593_v7  ;;  %v621_v19 = vpop.permute.xlu1 %620 }
 0x18c   :  { %v1682_v2 = vrot.slane %v1681_v49, 1  ;;  %v1734_v30 = vrot.slane %v1733_v4, 2  ;;  %v876_v47 = vmul.f32 %v5341_v13, %v571_v51  ;;  %v870_v43 = vmul.f32 %v5341_v13, %v541_v52 }
 0x18d   :  { %v1646_v53 = vrot.slane %v1645_v5, 1  ;;  %v1598_v17 = vrot.slane %v1597_v24, 1  ;;  %v862_v40 = vmul.f32 %v5341_v13, %v501_v23  ;;  %v885_v6 = vmul.f32 %v5341_v13, %v616_v25 }
 0x18e   :  { %v1683_v39 = vadd.f32 %v1682_v2, %v1681_v49  ;;  %v1735_v18 = vadd.f32 %v1734_v30, %v1733_v4  ;;  %v2158_v3 = vpack.c.bf16 %v2030_v63, %v2030_v63  ;;  %v6161_v22 = vmul.f32 0.125, %v1731_v38 }
 0x18f   :  { %v1008_v56 = vadd.f32 %v5345_v14, %v876_v47  ;;  %v1002_v37 = vadd.f32 %v5345_v14, %v870_v43  ;;  %v2152_v0 = vpack.c.bf16 %v2024_v28, %v2024_v28  ;;  %v994_v51 = vadd.f32 %v5345_v14, %v862_v40  ;;  %v581_v47 = vpop.permute.xlu0 %580 }
 0x190   :  { %v1736_v48 = vrot.slane %v1735_v18, 1  ;;  %v1017_v8 = vadd.f32 %v5345_v14, %v885_v6  ;;  %v1647_v9 = vadd.f32 %v1646_v53, %v1645_v5  ;;  %v1599_v26 = vadd.f32 %v1598_v17, %v1597_v24 }
 0x191   :  { %v1136_v31 = vmax.f32 %v1008_v56, 0.0  ;;  %v1130_v61 = vmax.f32 %v1002_v37, 0.0  ;;  %v2144_v27 = vpack.c.bf16 %v6155_v10, %v6155_v10  ;;  %v6169_v52 = vmul.f32 0.125, %v1683_v39 }
 0x192   :  { %v1122_v50 = vmax.f32 %v994_v51, 0.0  ;;  %v1145_v45 = vmax.f32 %v1017_v8, 0.0  ;;  %v6171_v36 = vunpack.c.l.b16 %v2158_v3  ;;  %v2167_v15 = vpack.c.bf16 %v6161_v22, %v6161_v22  ;;  %v626_v8 = vpop.permute.xlu1 %625  ;;  %v5029_v22 = vld [vmem:[%s6802_s2 + $0x68] sm:$0xff]  }
 0x193   :  { %v1684_v33 = vrot.slane %v1136_v31, 4  ;;  %v1648_v34 = vrot.slane %v1130_v61, 4  ;;  %v6175_v1 = vunpack.c.l.b16 %v2152_v0  ;;  %v1737_v11 = vadd.f32 %v1736_v48, %v1735_v18 }
 0x194   :  { %v1600_v54 = vrot.slane %v1122_v50, 4  ;;  %v1738_v16 = vrot.slane %v1145_v45, 4  ;;  %v6177_v21 = vmul.f32 0.125, %v1647_v9  ;;  %v6179_v23 = vmul.f32 0.125, %v1599_v26 }
 0x195   :  { %v1685_v42 = vadd.f32 %v1684_v33, %v1136_v31  ;;  %v1649_v7 = vadd.f32 %v1648_v34, %v1130_v61  ;;  %v2159_v41 = vpack.c.bf16 %v6169_v52, %v6169_v52  ;;  %v877_v29 = vmul.f32 %v5341_v13, %v576_v35 }
 0x196   :  { %v1601_v58 = vadd.f32 %v1600_v54, %v1122_v50  ;;  %v1739_v20 = vadd.f32 %v1738_v16, %v1145_v45  ;;  %v871_v25 = vmul.f32 %v5341_v13, %v546_v60  ;;  %v863_v63 = vmul.f32 %v5341_v13, %v506_v62  ;;  %v586_v54 = vpop.permute.xlu0 %585  ;;  %v5027_v16 = vld [vmem:[%s6802_s2 + $0x78] sm:$0xff]  }
 0x197   :  { %v1686_v49 = vrot.slane %v1685_v42, 2  ;;  %v1650_v4 = vrot.slane %v1649_v7, 2  ;;  %v2040_v38 = vmul.f32 0.125, %v1737_v11  ;;  %v1009_v28 = vadd.f32 %v5345_v14, %v877_v29  ;;  %4728 = vmatprep.subr.bf16.mxu1 %v5027_v16 }
 0x198   :  { %v1602_v5 = vrot.slane %v1601_v58, 2  ;;  %v1740_v24 = vrot.slane %v1739_v20, 2  ;;  %v1003_v53 = vadd.f32 %v5345_v14, %v871_v25  ;;  %v995_v17 = vadd.f32 %v5345_v14, %v863_v63  ;;  %4729 = vmatpush3.bf16.msra.mxu1 %v5027_v16 }
 0x199   :  { %v1687_v2 = vadd.f32 %v1686_v49, %v1685_v42  ;;  %v1651_v30 = vadd.f32 %v1650_v4, %v1649_v7  ;;  %v1137_v39 = vmax.f32 %v1009_v28, 0.0  ;;  %v886_v18 = vmul.f32 %v5341_v13, %v621_v19 }
 0x19a   :  { %v1603_v43 = vadd.f32 %v1602_v5, %v1601_v58  ;;  %v1741_v35 = vadd.f32 %v1740_v24, %v1739_v20  ;;  %v1131_v3 = vmax.f32 %v1003_v53, 0.0  ;;  %v1123_v56 = vmax.f32 %v995_v17, 0.0 }
 0x19b   :  { %v1688_v40 = vrot.slane %v1687_v2, 1  ;;  %v1652_v6 = vrot.slane %v1651_v30, 1  ;;  %v1690_v48 = vrot.slane %v1137_v39, 4  ;;  %v1018_v51 = vadd.f32 %v5345_v14, %v886_v18 }
 0x19c   :  { %v1604_v37 = vrot.slane %v1603_v43, 1  ;;  %v1742_v0 = vrot.slane %v1741_v35, 1  ;;  %v1654_v26 = vrot.slane %v1131_v3, 4  ;;  %v1606_v31 = vrot.slane %v1123_v56, 4 }
 0x19d   :  { %v1689_v60 = vadd.f32 %v1688_v40, %v1687_v2  ;;  %v1653_v9 = vadd.f32 %v1652_v6, %v1651_v30  ;;  %v1691_v50 = vadd.f32 %v1690_v48, %v1137_v39  ;;  %v1146_v45 = vmax.f32 %v1018_v51, 0.0 }
 0x19e   :  { %v1605_v61 = vadd.f32 %v1604_v37, %v1603_v43  ;;  %v1743_v52 = vadd.f32 %v1742_v0, %v1741_v35  ;;  %v2153_v33 = vpack.c.bf16 %v6177_v21, %v6177_v21  ;;  %v2145_v34 = vpack.c.bf16 %v6179_v23, %v6179_v23  ;;  %v631_v43 = vpop.permute.xlu0 %630 }
 0x19f   :  { %v2032_v62 = vmul.f32 0.125, %v1689_v60  ;;  %v2026_v11 = vmul.f32 0.125, %v1653_v9  ;;  %v2168_v42 = vpack.c.bf16 %v2040_v38, %v2040_v38  ;;  %v1692_v7 = vrot.slane %v1691_v50, 2  ;;  %v636_v38 = vpop.permute.xlu1 %635 }
 0x1a0   :  { %v1655_v58 = vadd.f32 %v1654_v26, %v1131_v3  ;;  %v1744_v20 = vrot.slane %v1146_v45, 4  ;;  %v6201_v29 = vsel %vm2482_vm1, %v6171_v36, %v6137_v32  ;;  %v6206_v21 = vunpack.c.l.b16 %v2144_v27  ;;  %v5028_v32 = vld [vmem:[%s6802_s2 + $0x70] sm:$0xff]  }
 0x1a1   :  { %v2018_v23 = vmul.f32 0.125, %v1605_v61  ;;  %v1607_v19 = vadd.f32 %v1606_v31, %v1123_v56  ;;  %v6211_v49 = vunpack.c.l.b16 %v2167_v15  ;;  %v6213_v4 = vunpack.c.l.b16 %v2159_v41  ;;  %4730 = vmatprep.subr.bf16.mxu1 %v5028_v32 }
 0x1a2   :  { %v2041_v25 = vmul.f32 0.125, %v1743_v52  ;;  %v1745_v63 = vadd.f32 %v1744_v20, %v1146_v45  ;;  %v6218_v10 = vunpack.c.l.b16 %v2153_v33  ;;  %v6220_v27 = vunpack.c.l.b16 %v2145_v34  ;;  %4731 = vmatpush3.bf16.msra.mxu1 %v5028_v32  ;;  %v671_v16 = vpop.permute.xlu0 %670 }
 0x1a3   :  { %v2160_v36 = vpack.c.bf16 %v2032_v62, %v2032_v62  ;;  %v2154_v5 = vpack.c.bf16 %v2026_v11, %v2026_v11  ;;  %v6225_v15 = vunpack.c.l.b16 %v2168_v42  ;;  %v1693_v41 = vadd.f32 %v1692_v7, %v1691_v50  ;;  %4732 = vmatprep.subr.bf16.mxu1 %v5029_v22  ;;  %v676_v60 = vpop.permute.xlu1 %675  ;;  %v5031_v42 = vld [vmem:[%s6802_s2 + $0x58] sm:$0xff]  }
 0x1a4   :  { %v1656_v24 = vrot.slane %v1655_v58, 2  ;;  %v1746_v28 = vrot.slane %v1745_v63, 2  ;;  %v2146_v2 = vpack.c.bf16 %v2018_v23, %v2018_v23  ;;  %v1608_v30 = vrot.slane %v1607_v19, 2 }
 0x1a5   :  { %v878_v53 = vmul.f32 %v5341_v13, %v581_v47  ;;  %v887_v17 = vmul.f32 %v5341_v13, %v626_v8  ;;  %v2169_v35 = vpack.c.bf16 %v2041_v25, %v2041_v25  ;;  %v879_v18 = vmul.f32 %v5341_v13, %v586_v54  ;;  %v5030_v47 = vld [vmem:[%s6802_s2 + $0x60] sm:$0xff]  }
 0x1a6   :  { %v1747_v39 = vadd.f32 %v1746_v28, %v1745_v63  ;;  %v889_v40 = vmul.f32 %v5341_v13, %v636_v38  ;;  %v6231_v6 = vunpack.c.l.b16 %v2160_v36  ;;  %v6233_v3 = vunpack.c.l.b16 %v2154_v5  ;;  %4733 = vmatpush3.bf16.msra.mxu1 %v5029_v22 }
 0x1a7   :  { %v1010_v56 = vadd.f32 %v5345_v14, %v878_v53  ;;  %v1019_v37 = vadd.f32 %v5345_v14, %v887_v17  ;;  %v1694_v0 = vrot.slane %v1693_v41, 1  ;;  %v1657_v48 = vadd.f32 %v1656_v24, %v1655_v58  ;;  %4734 = vmatprep.subr.bf16.mxu1 %v5030_v47  ;;  %v5032_v53 = vld [vmem:[%s6802_s2 + $0x50] sm:$0xff]  }
 0x1a8   :  { %v1011_v51 = vadd.f32 %v5345_v14, %v879_v18  ;;  %v1021_v8 = vadd.f32 %v5345_v14, %v889_v40  ;;  %v6242_v9 = vunpack.c.l.b16 %v2146_v2  ;;  %v1609_v26 = vadd.f32 %v1608_v30, %v1607_v19 }
 0x1a9   :  { %v1138_v31 = vmax.f32 %v1010_v56, 0.0  ;;  %v1147_v61 = vmax.f32 %v1019_v37, 0.0  ;;  %v6244_v52 = vunpack.c.l.b16 %v2169_v35  ;;  %v1748_v50 = vrot.slane %v1747_v39, 1 }
 0x1aa   :  { %v1139_v45 = vmax.f32 %v1011_v51, 0.0  ;;  %v1149_v33 = vmax.f32 %v1021_v8, 0.0  ;;  %v888_v11 = vmul.f32 %v5341_v13, %v631_v43  ;;  %v897_v54 = vmul.f32 %v5341_v13, %v676_v60  ;;  %4735 = vmatpush3.bf16.msra.mxu1 %v5030_v47 }
 0x1ab   :  { %v1696_v34 = vrot.slane %v1138_v31, 4  ;;  %v1750_v62 = vrot.slane %v1147_v61, 4  ;;  %v1695_v7 = vadd.f32 %v1694_v0, %v1693_v41  ;;  %v1658_v58 = vrot.slane %v1657_v48, 1  ;;  %v681_v41 = vpop.permute.xlu1 %680  ;;  %4736 = vmatprep.subr.bf16.mxu1 %v5031_v42 }
 0x1ac   :  { %v1702_v20 = vrot.slane %v1139_v45, 4  ;;  %v1762_v23 = vrot.slane %v1149_v33, 4  ;;  %v1020_v63 = vadd.f32 %v5345_v14, %v888_v11  ;;  %v1029_v38 = vadd.f32 %v5345_v14, %v897_v54 }
 0x1ad   :  { %v1697_v19 = vadd.f32 %v1696_v34, %v1138_v31  ;;  %v1751_v25 = vadd.f32 %v1750_v62, %v1147_v61  ;;  %v1749_v32 = vadd.f32 %v1748_v50, %v1747_v39  ;;  %v896_v22 = vmul.f32 %v5341_v13, %v671_v16 }
 0x1ae   :  { %v1703_v36 = vadd.f32 %v1702_v20, %v1139_v45  ;;  %v1763_v5 = vadd.f32 %v1762_v23, %v1149_v33  ;;  %v1148_v2 = vmax.f32 %v1020_v63, 0.0  ;;  %v1157_v30 = vmax.f32 %v1029_v38, 0.0  ;;  %4737 = vmatpush3.bf16.msra.mxu1 %v5031_v42  ;;  %v5033_v45 = vld [vmem:[%s6802_s2 + $0x48] sm:$0xff]  }
 0x1af   :  { %v1698_v24 = vrot.slane %v1697_v19, 2  ;;  %v1752_v28 = vrot.slane %v1751_v25, 2  ;;  %v2033_v17 = vmul.f32 0.125, %v1695_v7  ;;  %v1610_v43 = vrot.slane %v1609_v26, 1  ;;  %4738 = vmatprep.subr.bf16.mxu1 %v5032_v53  ;;  %v716_v42 = vpop.permute.xlu1 %715 }
 0x1b0   :  { %v1764_v35 = vrot.slane %v1763_v5, 2  ;;  %v1028_v39 = vadd.f32 %v5345_v14, %v896_v22  ;;  %v1704_v40 = vrot.slane %v1703_v36, 2  ;;  %v1756_v56 = vrot.slane %v1148_v2, 4 }
 0x1b1   :  { %v1699_v18 = vadd.f32 %v1698_v24, %v1697_v19  ;;  %v1810_v37 = vrot.slane %v1157_v30, 4  ;;  %v1659_v47 = vadd.f32 %v1658_v58, %v1657_v48  ;;  %v2042_v0 = vmul.f32 0.125, %v1749_v32  ;;  %v641_v48 = vpop.permute.xlu0 %640 }
 0x1b2   :  { %v1156_v51 = vmax.f32 %v1028_v39, 0.0  ;;  %v898_v8 = vmul.f32 %v5341_v13, %v681_v41  ;;  %v1753_v60 = vadd.f32 %v1752_v28, %v1751_v25  ;;  %v1765_v31 = vadd.f32 %v1764_v35, %v1763_v5  ;;  %4739 = vmatpush3.bf16.msra.mxu1 %v5032_v53 }
 0x1b3   :  { %v1757_v61 = vadd.f32 %v1756_v56, %v1148_v2  ;;  %v1811_v50 = vadd.f32 %v1810_v37, %v1157_v30  ;;  %v2161_v33 = vpack.c.bf16 %v2033_v17, %v2033_v17  ;;  %v1611_v34 = vadd.f32 %v1610_v43, %v1609_v26  ;;  %4740 = vmatprep.subr.bf16.mxu1 %v5033_v45  ;;  %v5034_v26 = vld [vmem:[%s6802_s2 + $0x40] sm:$0xff]  }
 0x1b4   :  { %v1804_v62 = vrot.slane %v1156_v51, 4  ;;  %v1030_v11 = vadd.f32 %v5345_v14, %v898_v8  ;;  %v1700_v54 = vrot.slane %v1699_v18, 1  ;;  %v1705_v16 = vadd.f32 %v1704_v40, %v1703_v36 }
 0x1b5   :  { %v1758_v7 = vrot.slane %v1757_v61, 2  ;;  %v1812_v58 = vrot.slane %v1811_v50, 2  ;;  %v6263_v20 = vmul.f32 0.125, %v1659_v47  ;;  %v2170_v23 = vpack.c.bf16 %v2042_v0, %v2042_v0  ;;  %v711_v40 = vpop.permute.xlu0 %710 }
 0x1b6   :  { %v1805_v19 = vadd.f32 %v1804_v62, %v1156_v51  ;;  %v1158_v25 = vmax.f32 %v1030_v11, 0.0  ;;  %v1754_v63 = vrot.slane %v1753_v60, 1  ;;  %v1766_v38 = vrot.slane %v1765_v31, 1  ;;  %4741 = vmatpush3.bf16.msra.mxu1 %v5033_v45  ;;  %v756_v51 = vpop.permute.xlu1 %755 }
 0x1b7   :  { %v1759_v32 = vadd.f32 %v1758_v7, %v1757_v61  ;;  %v1813_v5 = vadd.f32 %v1812_v58, %v1811_v50  ;;  %v6268_v22 = vunpack.c.l.b16 %v2161_v33  ;;  %v6270_v36 = vmul.f32 0.125, %v1611_v34  ;;  %4742 = vmatprep.subr.bf16.mxu1 %v5034_v26 }
 0x1b8   :  { %v1806_v24 = vrot.slane %v1805_v19, 2  ;;  %v1816_v28 = vrot.slane %v1158_v25, 4  ;;  %v1701_v2 = vadd.f32 %v1700_v54, %v1699_v18  ;;  %v1706_v30 = vrot.slane %v1705_v16, 1 }
 0x1b9   :  { %v1814_v41 = vrot.slane %v1813_v5, 1  ;;  %v890_v53 = vmul.f32 %v5341_v13, %v641_v48  ;;  %v6273_v17 = vunpack.c.l.b16 %v2170_v23  ;;  %v905_v39 = vmul.f32 %v5341_v13, %v716_v42 }
 0x1ba   :  { %v1807_v43 = vadd.f32 %v1806_v24, %v1805_v19  ;;  %v1817_v35 = vadd.f32 %v1816_v28, %v1158_v25  ;;  %v1755_v56 = vadd.f32 %v1754_v63, %v1753_v60  ;;  %v1767_v37 = vadd.f32 %v1766_v38, %v1765_v31  ;;  %4743 = vmatpush3.bf16.msra.mxu1 %v5034_v26 }
 0x1bb   :  { %v1760_v47 = vrot.slane %v1759_v32, 1  ;;  %v1022_v0 = vadd.f32 %v5345_v14, %v890_v53  ;;  %v1815_v18 = vadd.f32 %v1814_v41, %v1813_v5  ;;  %v1037_v50 = vadd.f32 %v5345_v14, %v905_v39 }
 0x1bc   :  { %v1808_v8 = vrot.slane %v1807_v43, 1  ;;  %v1818_v61 = vrot.slane %v1817_v35, 2  ;;  %v6278_v33 = vmul.f32 0.125, %v1701_v2  ;;  %v1707_v34 = vadd.f32 %v1706_v30, %v1705_v16 }
 0x1bd   :  { %v1150_v62 = vmax.f32 %v1022_v0, 0.0  ;;  %v904_v11 = vmul.f32 %v5341_v13, %v711_v40  ;;  %v1165_v60 = vmax.f32 %v1037_v50, 0.0  ;;  %v913_v31 = vmul.f32 %v5341_v13, %v756_v51 }
 0x1be   :  { %v1809_v48 = vadd.f32 %v1808_v8, %v1807_v43  ;;  %v1819_v45 = vadd.f32 %v1818_v61, %v1817_v35  ;;  %v2045_v54 = vmul.f32 0.125, %v1767_v37  ;;  %v1761_v7 = vadd.f32 %v1760_v47, %v1759_v32 }
 0x1bf   :  { %v1768_v58 = vrot.slane %v1150_v62, 4  ;;  %v1036_v42 = vadd.f32 %v5345_v14, %v904_v11  ;;  %v2053_v23 = vmul.f32 0.125, %v1815_v18  ;;  %v1858_v25 = vrot.slane %v1165_v60, 4 }
 0x1c0   :  { %v1820_v19 = vrot.slane %v1819_v45, 1  ;;  %v1045_v63 = vadd.f32 %v5345_v14, %v913_v31  ;;  %v6284_v16 = vmul.f32 0.125, %v1755_v56  ;;  %v2052_v38 = vmul.f32 0.125, %v1809_v48 }
 0x1c1   :  { %v1769_v5 = vadd.f32 %v1768_v58, %v1150_v62  ;;  %v1164_v24 = vmax.f32 %v1036_v42, 0.0  ;;  %v6286_v28 = vmul.f32 0.125, %v1707_v34  ;;  %v1859_v30 = vadd.f32 %v1858_v25, %v1165_v60 }
 0x1c2   :  { %v1821_v2 = vadd.f32 %v1820_v19, %v1819_v45  ;;  %v1173_v26 = vmax.f32 %v1045_v63, 0.0  ;;  %v2173_v41 = vpack.c.bf16 %v2045_v54, %v2045_v54  ;;  %v2044_v32 = vmul.f32 0.125, %v1761_v7  ;;  %v751_v45 = vpop.permute.xlu0 %750  ;;  %v686_v7 = vpop.permute.xlu1 %685 }
 0x1c3   :  { %v1770_v53 = vrot.slane %v1769_v5, 2  ;;  %v1852_v43 = vrot.slane %v1164_v24, 4  ;;  %v2181_v35 = vpack.c.bf16 %v2053_v23, %v2053_v23  ;;  %v1860_v39 = vrot.slane %v1859_v30, 2 }
 0x1c4   :  { %v1906_v40 = vrot.slane %v1173_v26, 4  ;;  %v2147_v37 = vpack.c.bf16 %v6270_v36, %v6270_v36  ;;  %v2180_v56 = vpack.c.bf16 %v2052_v38, %v2052_v38  ;;  %v2054_v47 = vmul.f32 0.125, %v1821_v2 }
 0x1c5   :  { %v1771_v0 = vadd.f32 %v1770_v53, %v1769_v5  ;;  %v1853_v51 = vadd.f32 %v1852_v43, %v1164_v24  ;;  %v2162_v18 = vpack.c.bf16 %v6278_v33, %v6278_v33  ;;  %v1861_v8 = vadd.f32 %v1860_v39, %v1859_v30 }
 0x1c6   :  { %v1907_v61 = vadd.f32 %v1906_v40, %v1173_v26  ;;  %v2155_v50 = vpack.c.bf16 %v6263_v20, %v6263_v20  ;;  %v2449_v34 = vunpack.c.l.b16 %v2173_v41  ;;  %v2172_v62 = vpack.c.bf16 %v2044_v32, %v2044_v32  ;;  %v646_v41 = vpop.permute.xlu0 %645  ;;  %v761_v43 = vpop.permute.xlu1 %760 }
 0x1c7   :  { %v1772_v11 = vrot.slane %v1771_v0, 1  ;;  %v1854_v48 = vrot.slane %v1853_v51, 2  ;;  %v1862_v60 = vrot.slane %v1861_v8, 1  ;;  %v2423_v36 = vunpack.c.l.b16 %v2147_v37 }
 0x1c8   :  { %v1908_v31 = vrot.slane %v1907_v61, 2  ;;  %v2545_v54 = vsel %vm2484_vm2, %v6150_v55, %v6134_v46  ;;  %v2457_v58 = vunpack.c.l.b16 %v2181_v35  ;;  %v2456_v33 = vunpack.c.l.b16 %v2180_v56 }
 0x1c9   :  { %v2182_v42 = vpack.c.bf16 %v2054_v47, %v2054_v47  ;;  %v2546_v23 = vsel %vm2486_vm3, %v6206_v21, %v2545_v54  ;;  %v1773_v20 = vadd.f32 %v1772_v11, %v1771_v0  ;;  %v2431_v19 = vunpack.c.l.b16 %v2155_v50 }
 0x1ca   :  { %v2547_v25 = vsel %vm2488_vm4, %v6220_v27, %v2546_v23  ;;  %v2552_v63 = vsel %vm2484_vm2, %v6148_v57, %v6130_v12  ;;  %v1863_v38 = vadd.f32 %v1862_v60, %v1861_v8  ;;  %v1855_v5 = vadd.f32 %v1854_v48, %v1853_v51 }
 0x1cb   :  { %v2548_v46 = vsel %vm2490_vm5, %v6242_v9, %v2547_v25  ;;  %v2553_v55 = vsel %vm2486_vm3, %v6175_v1, %v2552_v63  ;;  %v1909_v24 = vadd.f32 %v1908_v31, %v1907_v61  ;;  %v912_v27 = vmul.f32 %v5341_v13, %v751_v45  ;;  %v721_v31 = vpop.permute.xlu0 %720 }
 0x1cc   :  { %v2549_v21 = vsel %vm2492_vm6, %v2423_v36, %v2548_v46  ;;  %v2554_v2 = vsel %vm2488_vm4, %v6218_v10, %v2553_v55  ;;  %v2448_v30 = vunpack.c.l.b16 %v2172_v62  ;;  %v2458_v26 = vunpack.c.l.b16 %v2182_v42 }
 0x1cd   :  { %v2555_v12 = vsel %vm2490_vm5, %v6233_v3, %v2554_v2  ;;  %v899_v57 = vmul.f32 %v5341_v13, %v686_v7  ;;  %v2438_v9 = vunpack.c.l.b16 %v2162_v18  ;;  %v6315_v32 = vmul.f32 0.125, %v1773_v20 }
 0x1ce   :  { %v2556_v1 = vsel %vm2492_vm6, %v2431_v19, %v2555_v12  ;;  %v1044_v53 = vadd.f32 %v5345_v14, %v912_v27  ;;  %v2578_v10 = vsel %vm2480_vm0, %v2457_v58, %v2456_v33  ;;  %v1856_v35 = vrot.slane %v1855_v5, 1  ;;  %v691_v33 = vpop.permute.xlu1 %690 }
 0x1cf   :  { %v2603_v39 = vpack.c.b16 %v2556_v1, %v2549_v21  ;;  %v1031_v40 = vadd.f32 %v5345_v14, %v899_v57  ;;  %v6321_v37 = vmul.f32 0.125, %v1863_v38  ;;  %v1910_v3 = vrot.slane %v1909_v24, 1 }
 0x1d0   :  { %v1172_v56 = vmax.f32 %v1044_v53, 0.0  ;;  %v891_v47 = vmul.f32 %v5341_v13, %v646_v41  ;;  %v6325_v0 = vsel %vm2480_vm0, %v2449_v34, %v2448_v30  ;;  %v6328_v51 = vsel %vm2482_vm1, %v2458_v26, %v2578_v10  ;;  %v651_v30 = vpop.permute.xlu0 %650 }
 0x1d1   :  { %4720 = vmatprep.mubr.bf16.mxu0 %v2603_v39  ;;  %v1159_v18 = vmax.f32 %v1031_v40, 0.0  ;;  %v914_v8 = vmul.f32 %v5341_v13, %v761_v43  ;;  %v2174_v61 = vpack.c.bf16 %v6315_v32, %v6315_v32  ;;  %v2163_v11 = vpack.c.bf16 %v6286_v28, %v6286_v28 }
 0x1d2   :  { %v1900_v50 = vrot.slane %v1172_v56, 4  ;;  %v1023_v62 = vadd.f32 %v5345_v14, %v891_v47  ;;  %v1857_v48 = vadd.f32 %v1856_v35, %v1855_v5  ;;  %v2171_v60 = vpack.c.bf16 %v6284_v16, %v6284_v16  ;;  %v766_v57 = vpop.permute.xlu1 %765 }
 0x1d3   :  { %v1822_v45 = vrot.slane %v1159_v18, 4  ;;  %v1046_v34 = vadd.f32 %v5345_v14, %v914_v8  ;;  %v2189_v36 = vpack.c.bf16 %v6321_v37, %v6321_v37  ;;  %v1911_v54 = vadd.f32 %v1910_v3, %v1909_v24 }
 0x1d4   :  { %v1901_v7 = vadd.f32 %v1900_v50, %v1172_v56  ;;  %v1151_v58 = vmax.f32 %v1023_v62, 0.0  ;;  %v2439_v20 = vunpack.c.l.b16 %v2163_v11  ;;  %v2447_v19 = vunpack.c.l.b16 %v2171_v60  ;;  %v726_v62 = vpop.permute.xlu0 %725 }
 0x1d5   :  { %v1823_v42 = vadd.f32 %v1822_v45, %v1159_v18  ;;  %v1174_v23 = vmax.f32 %v1046_v34, 0.0  ;;  %v2559_v63 = vsel %vm2484_vm2, %v6213_v4, %v6201_v29  ;;  %v2566_v16 = vsel %vm2484_vm2, %v6211_v49, %v6153_v44 }
 0x1d6   :  { %v1902_v28 = vrot.slane %v1901_v7, 2  ;;  %v1774_v25 = vrot.slane %v1151_v58, 4  ;;  %v2560_v46 = vsel %vm2486_vm3, %v6231_v6, %v2559_v63  ;;  %v2567_v55 = vsel %vm2486_vm3, %v6225_v15, %v2566_v16  ;;  %v696_v60 = vpop.permute.xlu1 %695 }
 0x1d7   :  { %v1824_v38 = vrot.slane %v1823_v42, 2  ;;  %v1912_v5 = vrot.slane %v1174_v23, 4  ;;  %v2561_v2 = vsel %vm2488_vm4, %v6268_v22, %v2560_v46  ;;  %v2568_v29 = vsel %vm2488_vm4, %v6244_v52, %v2567_v55 }
 0x1d8   :  { %v1903_v24 = vadd.f32 %v1902_v28, %v1901_v7  ;;  %v1775_v21 = vadd.f32 %v1774_v25, %v1151_v58  ;;  %v2562_v44 = vsel %vm2490_vm5, %v2438_v9, %v2561_v2  ;;  %v2569_v49 = vsel %vm2490_vm5, %v6273_v17, %v2568_v29 }
 0x1d9   :  { %v1825_v4 = vadd.f32 %v1824_v38, %v1823_v42  ;;  %v1913_v27 = vadd.f32 %v1912_v5, %v1174_v23  ;;  %v2060_v6 = vmul.f32 0.125, %v1857_v48  ;;  %v2563_v15 = vsel %vm2492_vm6, %v2439_v20, %v2562_v44 }
 0x1da   :  { %v1776_v26 = vrot.slane %v1775_v21, 2  ;;  %v2570_v12 = vsel %vm2492_vm6, %v2447_v19, %v2569_v49  ;;  %v1904_v41 = vrot.slane %v1903_v24, 1  ;;  %v906_v52 = vmul.f32 %v5341_v13, %v721_v31 }
 0x1db   :  { %v1914_v22 = vrot.slane %v1913_v27, 2  ;;  %v2604_v32 = vpack.c.b16 %v2570_v12, %v2563_v15  ;;  %v2069_v1 = vmul.f32 0.125, %v1911_v54  ;;  %v1826_v53 = vrot.slane %v1825_v4, 1 }
 0x1dc   :  { %v900_v9 = vmul.f32 %v5341_v13, %v691_v33  ;;  %v892_v43 = vmul.f32 %v5341_v13, %v651_v30  ;;  %v1777_v17 = vadd.f32 %v1776_v26, %v1775_v21  ;;  %v1038_v35 = vadd.f32 %v5345_v14, %v906_v52  ;;  %v656_v21 = vpop.permute.xlu0 %655 }
 0x1dd   :  { %v1915_v10 = vadd.f32 %v1914_v22, %v1913_v27  ;;  %4721 = vmatmul.mubr.bf16.gmra.mxu0 %v2604_v32  ;;  %v915_v39 = vmul.f32 %v5341_v13, %v766_v57  ;;  %v2450_v40 = vunpack.c.l.b16 %v2174_v61  ;;  %v2188_v37 = vpack.c.bf16 %v2060_v6, %v2060_v6  ;;  %v771_v27 = vpop.permute.xlu1 %770 }
 0x1de   :  { %v1032_v3 = vadd.f32 %v5345_v14, %v900_v9  ;;  %v1024_v56 = vadd.f32 %v5345_v14, %v892_v43  ;;  %v1905_v47 = vadd.f32 %v1904_v41, %v1903_v24  ;;  %v1166_v8 = vmax.f32 %v1038_v35, 0.0 }
 0x1df   :  { %v1916_v18 = vrot.slane %v1915_v10, 1  ;;  %v1047_v50 = vadd.f32 %v5345_v14, %v915_v39  ;;  %v2197_v11 = vpack.c.bf16 %v2069_v1, %v2069_v1  ;;  %v1827_v48 = vadd.f32 %v1826_v53, %v1825_v4 }
 0x1e0   :  { %v1160_v45 = vmax.f32 %v1032_v3, 0.0  ;;  %v1152_v34 = vmax.f32 %v1024_v56, 0.0  ;;  %v6368_v31 = vunpack.c.l.b16 %v2189_v36  ;;  %v1778_v54 = vrot.slane %v1777_v17, 1 }
 0x1e1   :  { %v1864_v61 = vrot.slane %v1166_v8, 4  ;;  %v1175_v7 = vmax.f32 %v1047_v50, 0.0  ;;  %v6372_v58 = vsel %vm2482_vm1, %v2450_v40, %v6325_v0  ;;  %v1917_v33 = vadd.f32 %v1916_v18, %v1915_v10  ;;  %v731_v40 = vpop.permute.xlu0 %730  ;;  %v701_v18 = vpop.permute.xlu1 %700 }
 0x1e2   :  { %v1828_v42 = vrot.slane %v1160_v45, 4  ;;  %v1780_v23 = vrot.slane %v1152_v34, 4  ;;  %v2464_v20 = vunpack.c.l.b16 %v2188_v37  ;;  %v2068_v19 = vmul.f32 0.125, %v1905_v47 }
 0x1e3   :  { %v1865_v28 = vadd.f32 %v1864_v61, %v1166_v8  ;;  %v1918_v25 = vrot.slane %v1175_v7, 4  ;;  %v2473_v63 = vunpack.c.l.b16 %v2197_v11  ;;  %v2055_v16 = vmul.f32 0.125, %v1827_v48 }
 0x1e4   :  { %v1829_v38 = vadd.f32 %v1828_v42, %v1160_v45  ;;  %v1781_v5 = vadd.f32 %v1780_v23, %v1152_v34  ;;  %v1779_v36 = vadd.f32 %v1778_v54, %v1777_v17  ;;  %v907_v24 = vmul.f32 %v5341_v13, %v726_v62 }
 0x1e5   :  { %v1866_v46 = vrot.slane %v1865_v28, 2  ;;  %v1919_v55 = vadd.f32 %v1918_v25, %v1175_v7  ;;  %v2070_v2 = vmul.f32 0.125, %v1917_v33  ;;  %v901_v4 = vmul.f32 %v5341_v13, %v696_v60 }
 0x1e6   :  { %v1830_v0 = vrot.slane %v1829_v38, 2  ;;  %v1782_v29 = vrot.slane %v1781_v5, 2  ;;  %v2196_v44 = vpack.c.bf16 %v2068_v19, %v2068_v19  ;;  %v1039_v6 = vadd.f32 %v5345_v14, %v907_v24 }
 0x1e7   :  { %v1867_v49 = vadd.f32 %v1866_v46, %v1865_v28  ;;  %v1920_v30 = vrot.slane %v1919_v55, 2  ;;  %v1033_v12 = vadd.f32 %v5345_v14, %v901_v4  ;;  %v893_v57 = vmul.f32 %v5341_v13, %v656_v21 }
 0x1e8   :  { %v1831_v26 = vadd.f32 %v1830_v0, %v1829_v38  ;;  %v1783_v15 = vadd.f32 %v1782_v29, %v1781_v5  ;;  %v2047_v41 = vmul.f32 0.125, %v1779_v36  ;;  %v1167_v52 = vmax.f32 %v1039_v6, 0.0  ;;  %v661_v36 = vpop.permute.xlu0 %660 }
 0x1e9   :  { %v1868_v22 = vrot.slane %v1867_v49, 1  ;;  %v1921_v32 = vadd.f32 %v1920_v30, %v1919_v55  ;;  %v2198_v1 = vpack.c.bf16 %v2070_v2, %v2070_v2  ;;  %v1161_v9 = vmax.f32 %v1033_v12, 0.0  ;;  %v776_v2 = vpop.permute.xlu1 %775 }
 0x1ea   :  { %v1832_v53 = vrot.slane %v1831_v26, 1  ;;  %v1025_v43 = vadd.f32 %v5345_v14, %v893_v57  ;;  %v1784_v10 = vrot.slane %v1783_v15, 1  ;;  %v1870_v35 = vrot.slane %v1167_v52, 4 }
 0x1eb   :  { %v1869_v17 = vadd.f32 %v1868_v22, %v1867_v49  ;;  %v916_v39 = vmul.f32 %v5341_v13, %v771_v27  ;;  %v2472_v37 = vunpack.c.l.b16 %v2196_v44  ;;  %v2183_v3 = vpack.c.bf16 %v2055_v16, %v2055_v16 }
 0x1ec   :  { %v1834_v56 = vrot.slane %v1161_v9, 4  ;;  %v1153_v47 = vmax.f32 %v1025_v43, 0.0  ;;  %v2175_v8 = vpack.c.bf16 %v2047_v41, %v2047_v41  ;;  %v1922_v50 = vrot.slane %v1921_v32, 1 }
 0x1ed   :  { %v1871_v62 = vadd.f32 %v1870_v35, %v1167_v52  ;;  %v1048_v11 = vadd.f32 %v5345_v14, %v916_v39  ;;  %v2474_v48 = vunpack.c.l.b16 %v2198_v1  ;;  %v1833_v45 = vadd.f32 %v1832_v53, %v1831_v26  ;;  %v736_v53 = vpop.permute.xlu0 %735 }
 0x1ee   :  { %v1835_v34 = vadd.f32 %v1834_v56, %v1161_v9  ;;  %v1786_v60 = vrot.slane %v1153_v47, 4  ;;  %v2062_v54 = vmul.f32 0.125, %v1869_v17  ;;  %v1785_v61 = vadd.f32 %v1784_v10, %v1783_v15 }
 0x1ef   :  { %v1872_v7 = vrot.slane %v1871_v62, 2  ;;  %v1176_v33 = vmax.f32 %v1048_v11, 0.0  ;;  %v2585_v42 = vsel %vm2480_vm0, %v6368_v31, %v2464_v20  ;;  %v6384_v23 = vunpack.c.l.b16 %v2183_v3 }
 0x1f0   :  { %v1836_v19 = vrot.slane %v1835_v34, 2  ;;  %v1787_v28 = vadd.f32 %v1786_v60, %v1153_v47  ;;  %v2592_v25 = vsel %vm2480_vm0, %v2473_v63, %v2472_v37  ;;  %v1923_v16 = vadd.f32 %v1922_v50, %v1921_v32 }
 0x1f1   :  { %v1873_v38 = vadd.f32 %v1872_v7, %v1871_v62  ;;  %v1924_v5 = vrot.slane %v1176_v33, 4  ;;  %v6387_v46 = vunpack.c.l.b16 %v2175_v8  ;;  %v2056_v55 = vmul.f32 0.125, %v1833_v45  ;;  %v706_v8 = vpop.permute.xlu1 %705 }
 0x1f2   :  { %v1837_v24 = vadd.f32 %v1836_v19, %v1835_v34  ;;  %v1788_v21 = vrot.slane %v1787_v28, 2  ;;  %v6390_v0 = vsel %vm2482_vm1, %v2474_v48, %v2592_v25  ;;  %v2190_v31 = vpack.c.bf16 %v2062_v54, %v2062_v54 }
 0x1f3   :  { %v2048_v20 = vmul.f32 0.125, %v1785_v61  ;;  %v1925_v29 = vadd.f32 %v1924_v5, %v1176_v33  ;;  %v1874_v4 = vrot.slane %v1873_v38, 1  ;;  %v908_v63 = vmul.f32 %v5341_v13, %v731_v40 }
 0x1f4   :  { %v1789_v27 = vadd.f32 %v1788_v21, %v1787_v28  ;;  %v902_v44 = vmul.f32 %v5341_v13, %v701_v18  ;;  %v6394_v49 = vmul.f32 0.125, %v1923_v16  ;;  %v894_v6 = vmul.f32 %v5341_v13, %v661_v36  ;;  %v666_v28 = vpop.permute.xlu0 %665 }
 0x1f5   :  { %v1926_v30 = vrot.slane %v1925_v29, 2  ;;  %v917_v26 = vmul.f32 %v5341_v13, %v776_v2  ;;  %v2184_v15 = vpack.c.bf16 %v2056_v55, %v2056_v55  ;;  %v1838_v12 = vrot.slane %v1837_v24, 1 }
 0x1f6   :  { %v1040_v57 = vadd.f32 %v5345_v14, %v908_v63  ;;  %v1034_v41 = vadd.f32 %v5345_v14, %v902_v44  ;;  %v2176_v22 = vpack.c.bf16 %v2048_v20, %v2048_v20  ;;  %v1790_v32 = vrot.slane %v1789_v27, 1 }
 0x1f7   :  { %v1026_v52 = vadd.f32 %v5345_v14, %v894_v6  ;;  %v1049_v1 = vadd.f32 %v5345_v14, %v917_v26  ;;  %v2466_v9 = vunpack.c.l.b16 %v2190_v31  ;;  %v1875_v43 = vadd.f32 %v1874_v4, %v1873_v38 }
 0x1f8   :  { %v1168_v17 = vmax.f32 %v1040_v57, 0.0  ;;  %v1162_v10 = vmax.f32 %v1034_v41, 0.0  ;;  %v2199_v35 = vpack.c.bf16 %v6394_v49, %v6394_v49  ;;  %v1927_v39 = vadd.f32 %v1926_v30, %v1925_v29  ;;  %v781_v29 = vpop.permute.xlu1 %780 }
 0x1f9   :  { %v1154_v40 = vmax.f32 %v1026_v52, 0.0  ;;  %v1177_v37 = vmax.f32 %v1049_v1, 0.0  ;;  %v6404_v3 = vunpack.c.l.b16 %v2184_v15  ;;  %v1839_v56 = vadd.f32 %v1838_v12, %v1837_v24 }
 0x1fa   :  { %v1876_v47 = vrot.slane %v1168_v17, 4  ;;  %v1840_v18 = vrot.slane %v1162_v10, 4  ;;  %v6406_v50 = vunpack.c.l.b16 %v2176_v22  ;;  %v1791_v62 = vadd.f32 %v1790_v32, %v1789_v27 }
 0x1fb   :  { %v1792_v11 = vrot.slane %v1154_v40, 4  ;;  %v1930_v48 = vrot.slane %v1177_v37, 4  ;;  %v6409_v45 = vsel %vm2482_vm1, %v2466_v9, %v2585_v42  ;;  %v6411_v34 = vmul.f32 0.125, %v1875_v43  ;;  %v741_v9 = vpop.permute.xlu0 %740 }
 0x1fc   :  { %v1877_v60 = vadd.f32 %v1876_v47, %v1168_v17  ;;  %v1841_v54 = vadd.f32 %v1840_v18, %v1162_v10  ;;  %v1928_v61 = vrot.slane %v1927_v39, 1  ;;  %v909_v19 = vmul.f32 %v5341_v13, %v736_v53 }
 0x1fd   :  { %v1793_v7 = vadd.f32 %v1792_v11, %v1154_v40  ;;  %v1931_v33 = vadd.f32 %v1930_v48, %v1177_v37  ;;  %v2057_v25 = vmul.f32 0.125, %v1839_v56  ;;  %v903_v5 = vmul.f32 %v5341_v13, %v706_v8 }
 0x1fe   :  { %v1878_v16 = vrot.slane %v1877_v60, 2  ;;  %v1842_v38 = vrot.slane %v1841_v54, 2  ;;  %v2049_v36 = vmul.f32 0.125, %v1791_v62  ;;  %v1041_v42 = vadd.f32 %v5345_v14, %v909_v19 }
 0x1ff   :  { %v1794_v55 = vrot.slane %v1793_v7, 2  ;;  %v1932_v24 = vrot.slane %v1931_v33, 2  ;;  %v1035_v31 = vadd.f32 %v5345_v14, %v903_v5  ;;  %v895_v20 = vmul.f32 %v5341_v13, %v666_v28 }
 0x200   :  { %v1879_v21 = vadd.f32 %v1878_v16, %v1877_v60  ;;  %v1843_v2 = vadd.f32 %v1842_v38, %v1841_v54  ;;  %v1929_v4 = vadd.f32 %v1928_v61, %v1927_v39  ;;  %v1169_v44 = vmax.f32 %v1041_v42, 0.0 }
 0x201   :  { %v1795_v27 = vadd.f32 %v1794_v55, %v1793_v7  ;;  %v1933_v63 = vadd.f32 %v1932_v24, %v1931_v33  ;;  %v1163_v26 = vmax.f32 %v1035_v31, 0.0  ;;  %v1027_v15 = vadd.f32 %v5345_v14, %v895_v20  ;;  %v746_v55 = vpop.permute.xlu0 %745 }
 0x202   :  { %v1880_v30 = vrot.slane %v1879_v21, 1  ;;  %v1844_v6 = vrot.slane %v1843_v2, 1  ;;  %v1882_v41 = vrot.slane %v1169_v44, 4  ;;  %v918_v22 = vmul.f32 %v5341_v13, %v781_v29 }
 0x203   :  { %v1796_v12 = vrot.slane %v1795_v27, 1  ;;  %v1934_v57 = vrot.slane %v1933_v63, 1  ;;  %v2185_v32 = vpack.c.bf16 %v2057_v25, %v2057_v25  ;;  %v1846_v1 = vrot.slane %v1163_v26, 4  ;;  %v786_v25 = vpop.permute.xlu1 %785 }
 0x204   :  { %v1845_v52 = vadd.f32 %v1844_v6, %v1843_v2  ;;  %v1155_v53 = vmax.f32 %v1027_v15, 0.0  ;;  %v1881_v43 = vadd.f32 %v1880_v30, %v1879_v21  ;;  %v1883_v10 = vadd.f32 %v1882_v41, %v1169_v44 }
 0x205   :  { %v1797_v17 = vadd.f32 %v1796_v12, %v1795_v27  ;;  %v1050_v39 = vadd.f32 %v5345_v14, %v918_v22  ;;  %v2177_v40 = vpack.c.bf16 %v2049_v36, %v2049_v36  ;;  %v6421_v37 = vmul.f32 0.125, %v1929_v4 }
 0x206   :  { %v1847_v56 = vadd.f32 %v1846_v1, %v1163_v26  ;;  %v1798_v47 = vrot.slane %v1155_v53, 4  ;;  %v2058_v18 = vmul.f32 0.125, %v1845_v52  ;;  %v1935_v8 = vadd.f32 %v1934_v57, %v1933_v63  ;;  %v6440_v57 = vpop.f32.mrf.mxu0 }
 0x207   :  { %v1884_v62 = vrot.slane %v1883_v10, 2  ;;  %v1178_v11 = vmax.f32 %v1050_v39, 0.0  ;;  %v2191_v48 = vpack.c.bf16 %v6411_v34, %v6411_v34  ;;  %v6425_v60 = vunpack.c.l.b16 %v2185_v32 }
 0x208   :  { %v1848_v54 = vrot.slane %v1847_v56, 2  ;;  %v1799_v61 = vadd.f32 %v1798_v47, %v1155_v53  ;;  %v6427_v7 = vmul.f32 0.125, %v1881_v43  ;;  %v2050_v33 = vmul.f32 0.125, %v1797_v17 }
 0x209   :  { %v1885_v19 = vadd.f32 %v1884_v62, %v1883_v10  ;;  %v1936_v28 = vrot.slane %v1178_v11, 4  ;;  %v2453_v16 = vunpack.c.l.b16 %v2177_v40  ;;  %v2200_v38 = vpack.c.bf16 %v6421_v37, %v6421_v37 }
 0x20a   :  { %v1849_v5 = vadd.f32 %v1848_v54, %v1847_v56  ;;  %v1800_v36 = vrot.slane %v1799_v61, 2  ;;  %v2186_v24 = vpack.c.bf16 %v2058_v18, %v2058_v18  ;;  %v6431_v42 = vmul.f32 0.125, %v1935_v8  ;;  %v2697_v8 = vpop.f32.mrf.mxu0 }
 0x20b   :  { %v1886_v21 = vrot.slane %v1885_v19, 1  ;;  %v1937_v2 = vadd.f32 %v1936_v28, %v1178_v11  ;;  %v910_v29 = vmul.f32 %v5341_v13, %v741_v9  ;;  %v919_v4 = vmul.f32 %v5341_v13, %v786_v25 }
 0x20c   :  { %v1850_v31 = vrot.slane %v1849_v5, 1  ;;  %v1801_v20 = vadd.f32 %v1800_v36, %v1799_v61  ;;  %v2192_v27 = vpack.c.bf16 %v6427_v7, %v6427_v7  ;;  %v2178_v63 = vpack.c.bf16 %v2050_v33, %v2050_v33 }
 0x20d   :  { %v1938_v44 = vrot.slane %v1937_v2, 2  ;;  %v911_v30 = vmul.f32 %v5341_v13, %v746_v55  ;;  %v1042_v15 = vadd.f32 %v5345_v14, %v910_v29  ;;  %v1051_v12 = vadd.f32 %v5345_v14, %v919_v4 }
 0x20e   :  { %v1851_v6 = vadd.f32 %v1850_v31, %v1849_v5  ;;  %v1802_v26 = vrot.slane %v1801_v20, 1  ;;  %v2462_v41 = vunpack.c.l.b16 %v2186_v24  ;;  %v1887_v22 = vadd.f32 %v1886_v21, %v1885_v19 }
 0x20f   :  { %v1939_v32 = vadd.f32 %v1938_v44, %v1937_v2  ;;  %v1043_v52 = vadd.f32 %v5345_v14, %v911_v30  ;;  %v1170_v9 = vmax.f32 %v1042_v15, 0.0  ;;  %v1179_v43 = vmax.f32 %v1051_v12, 0.0 }
 0x210   :  { %v2059_v1 = vmul.f32 0.125, %v1851_v6  ;;  %v1803_v53 = vadd.f32 %v1802_v26, %v1801_v20  ;;  %v2454_v17 = vunpack.c.l.b16 %v2178_v63  ;;  %v2573_v39 = vsel %vm2484_vm2, %v6387_v46, %v6372_v58 }
 0x211   :  { %v1940_v10 = vrot.slane %v1939_v32, 1  ;;  %v1171_v13 = vmax.f32 %v1043_v52, 0.0  ;;  %v1888_v56 = vrot.slane %v1170_v9, 4  ;;  %v1942_v47 = vrot.slane %v1179_v43, 4 }
 0x212   :  { %v2051_v40 = vmul.f32 0.125, %v1803_v53  ;;  %v2187_v18 = vpack.c.bf16 %v2059_v1, %v2059_v1  ;;  %v2065_v62 = vmul.f32 0.125, %v1887_v22  ;;  %v2574_v14 = vsel %vm2486_vm3, %v6406_v50, %v2573_v39  ;;  %v4715_v50 = vpop.f32.mrf.mxu0 }
 0x213   :  { %v1941_v11 = vadd.f32 %v1940_v10, %v1939_v32  ;;  %v1894_v54 = vrot.slane %v1171_v13, 4  ;;  %v1889_v61 = vadd.f32 %v1888_v56, %v1170_v9  ;;  %v1943_v33 = vadd.f32 %v1942_v47, %v1179_v43 }
 0x214   :  { %v2179_v19 = vpack.c.bf16 %v2051_v40, %v2051_v40  ;;  %v2575_v28 = vsel %vm2488_vm4, %v2453_v16, %v2574_v14  ;;  %v2463_v5 = vunpack.c.l.b16 %v2187_v18  ;;  %v2580_v58 = vsel %vm2484_vm2, %v6384_v23, %v6328_v51 }
 0x215   :  { %v1895_v25 = vadd.f32 %v1894_v54, %v1171_v13  ;;  %v2222_v46 = vsub.s32 2, %v5290_v59  ;;  %v1890_v36 = vrot.slane %v1889_v61, 2  ;;  %v1944_v55 = vrot.slane %v1943_v33, 2 }
 0x216   :  { %v2455_v24 = vunpack.c.l.b16 %v2179_v19  ;;  %v2581_v21 = vsel %vm2486_vm3, %v6404_v3, %v2580_v58  ;;  %v2074_v2 = vmul.f32 0.125, %v1941_v11  ;;  %v2576_v20 = vsel %vm2490_vm5, %v2454_v17, %v2575_v28  ;;  %v5035_v58 = vld [vmem:[%s6802_s2 + $0xb8] sm:$0xff]  }
 0x217   :  { %v1896_v31 = vrot.slane %v1895_v25, 2  ;;  %v2582_v16 = vsel %vm2488_vm4, %v6425_v60, %v2581_v21  ;;  %v1891_v29 = vadd.f32 %v1890_v36, %v1889_v61  ;;  %v1945_v4 = vadd.f32 %v1944_v55, %v1943_v33  ;;  %v6469_v60 = vld [vmem:[%s6803_s3] sm:$0xff]  ;;  %4760 = vmatprep.subr.bf16.mxu0 %v5035_v58 }
 0x218   :  { %v2577_v51 = vsel %vm2492_vm6, %v2455_v24, %v2576_v20  ;;  %v2583_v23 = vsel %vm2490_vm5, %v2462_v41, %v2582_v16  ;;  %v2475_v63 = vunpack.c.l.b16 %v2199_v35  ;;  %v2201_v3 = vpack.c.bf16 %v6431_v42, %v6431_v42  ;;  %v2700_v41 = vpop.f32.mrf.mxu0  ;;  %4761 = vmatpush3.bf16.msra.mxu0 %v5035_v58 }
 0x219   :  { %v1897_v44 = vadd.f32 %v1896_v31, %v1895_v25  ;;  %v2584_v30 = vsel %vm2492_vm6, %v2463_v5, %v2583_v23  ;;  %v1892_v6 = vrot.slane %v1891_v29, 1  ;;  %v1946_v26 = vrot.slane %v1945_v4, 1  ;;  %v5039_v23 = vld [vmem:[%s6802_s2 + $0x98] sm:$0xff]  }
 0x21a   :  { %v2605_v15 = vpack.c.b16 %v2584_v30, %v2577_v51  ;;  %v6472_v12 = vrot.slane %v6469_v60, %v2222_v46  ;;  %v2467_v49 = vunpack.c.l.b16 %v2191_v48  ;;  %v2193_v35 = vpack.c.bf16 %v2065_v62, %v2065_v62  ;;  %v5036_v46 = vld [vmem:[%s6802_s2 + $0xb0] sm:$0xff]   ;;  %v5038_v51 = vld [vmem:[%s6802_s2 + $0xa0] sm:$0xff]  }
 0x21b   :  { %v2202_v42 = vpack.c.bf16 %v2074_v2, %v2074_v2  ;;  %v1898_v22 = vrot.slane %v1897_v44, 1  ;;  %v2476_v32 = vunpack.c.l.b16 %v2200_v38  ;;  %v2468_v52 = vunpack.c.l.b16 %v2192_v27  ;;  %4762 = vmatprep.subr.bf16.mxu0 %v5036_v46 }
 0x21c   :  { %v1893_v1 = vadd.f32 %v1892_v6, %v1891_v29  ;;  %v1947_v53 = vadd.f32 %v1946_v26, %v1945_v4  ;;  %4724 = vmatprep.mubr.bf16.mxu0 %v2605_v15  ;;  %v2698_v43 = vadd.f32 %v2697_v8, %v6472_v12  ;;  %v2709_v34 = vadd.f32 %v4715_v50, %v6472_v12  ;;  %v5037_v4 = vld [vmem:[%s6802_s2 + $0xa8] sm:$0xff]  }
 0x21d   :  { %v1899_v9 = vadd.f32 %v1898_v22, %v1897_v44  ;;  %v2701_v48 = vadd.f32 %v2700_v41, %v6472_v12  ;;  %v2477_v17 = vunpack.c.l.b16 %v2201_v3  ;;  %v2706_v37 = vadd.f32 %v6440_v57, %v6472_v12  ;;  %4763 = vmatpush3.bf16.msra.mxu0 %v5036_v46  ;;  %v5041_v3 = vld [vmem:[%s6802_s2 + $0x88] sm:$0xff]   ;;  %v5042_v44 = vld [vmem:[%s6802_s2 + $0x80] sm:$0xff]  }
 0x21e   :  { %v2066_v10 = vmul.f32 0.125, %v1893_v1  ;;  %v2075_v13 = vmul.f32 0.125, %v1947_v53  ;;  %v2469_v38 = vunpack.c.l.b16 %v2193_v35  ;;  %v2478_v39 = vunpack.c.l.b16 %v2202_v42  ;;  %4764 = vmatprep.subr.bf16.mxu0 %v5037_v4 }
 0x21f   :  { %v2067_v7 = vmul.f32 0.125, %v1899_v9  ;;  %v2760_v27 = vpack.c.bf16 %v2701_v48, %v2698_v43  ;;  %v2594_v47 = vsel %vm2484_vm2, %v2475_v63, %v6390_v0  ;;  %v2761_v18 = vpack.c.bf16 %v2709_v34, %v2706_v37  ;;  %v5040_v63 = vld [vmem:[%s6802_s2 + $0x90] sm:$0xff]  }
 0x220   :  { %v2194_v40 = vpack.c.bf16 %v2066_v10, %v2066_v10  ;;  %v2203_v56 = vpack.c.bf16 %v2075_v13, %v2075_v13  ;;  %v2587_v62 = vsel %vm2484_vm2, %v2467_v49, %v6409_v45  ;;  %v2595_v11 = vsel %vm2486_vm3, %v2476_v32, %v2594_v47 }
 0x221   :  { %v2195_v8 = vpack.c.bf16 %v2067_v7, %v2067_v7  ;;  %4744 = vmatprep.mubr.bf16.mxu1 %v2760_v27  ;;  %v2588_v57 = vsel %vm2486_vm3, %v2468_v52, %v2587_v62  ;;  %v2596_v61 = vsel %vm2488_vm4, %v2477_v17, %v2595_v11  ;;  %4765 = vmatpush3.bf16.msra.mxu0 %v5037_v4  ;;  %v2787_v52 = vsub.s32 3, %v5290_v59 }
 0x222   :  { %v2470_v54 = vunpack.c.l.b16 %v2194_v40  ;;  %v2479_v14 = vunpack.c.l.b16 %v2203_v56  ;;  %4745 = vmatmul.mubr.bf16.vlgmr.msra.gmra.mxu1 %v2761_v18  ;;  %v2589_v19 = vsel %vm2488_vm4, %v2469_v38, %v2588_v57  ;;  %v2597_v0 = vsel %vm2490_vm5, %v2478_v39, %v2596_v61  ;;  %4766 = vmatprep.subr.bf16.mxu0 %v5038_v51 }
 0x223   :  { %v2471_v33 = vunpack.c.l.b16 %v2195_v8  ;;  %v6534_v53 = vrot.slane %v6469_v60, %v2787_v52 }
 0x224   :  { %v2590_v28 = vsel %vm2490_vm5, %v2470_v54, %v2589_v19  ;;  %v2598_v25 = vsel %vm2492_vm6, %v2479_v14, %v2597_v0 }
 0x225   :  { %v2591_v45 = vsel %vm2492_vm6, %v2471_v33, %v2590_v28  ;;  %4767 = vmatpush3.bf16.msra.mxu0 %v5038_v51 }
 0x226   :  { %v2606_v5 = vpack.c.b16 %v2598_v25, %v2591_v45  ;;  %4768 = vmatprep.subr.bf16.mxu0 %v5039_v23 }
 0x228   :  { %4725 = vmatmul.mubr.bf16.gmra.mxu0 %v2606_v5 }
 0x229   :  { %4769 = vmatpush3.bf16.msra.mxu0 %v5039_v23 }
 0x22a   :  { %4770 = vmatprep.subr.bf16.mxu0 %v5040_v63 }
 0x22d   :  { %4771 = vmatpush3.bf16.msra.mxu0 %v5040_v63 }
 0x22e   :  { %4772 = vmatprep.subr.bf16.mxu0 %v5041_v3 }
 0x231   :  { %4773 = vmatpush3.bf16.msra.mxu0 %v5041_v3 }
 0x232   :  { %4774 = vmatprep.subr.bf16.mxu0 %v5042_v44 }
 0x235   :  { %4775 = vmatpush3.bf16.msra.mxu0 %v5042_v44 }
 0x236   :  { %v4718_v36 = vpop.f32.mrf.mxu0 }
 0x237   :  { %v2722_v20 = vadd.f32 %v4718_v36, %v6472_v12 }
 0x238   :  { %v2713_v55 = vpop.f32.mrf.mxu0 }
 0x239   :  { %v2714_v2 = vadd.f32 %v2713_v55, %v6472_v12 }
 0x23a   :  { %v4719_v24 = vpop.f32.mrf.mxu0 }
 0x23b   :  { %v2725_v21 = vadd.f32 %v4719_v24, %v6472_v12 }
 0x23c   :  { %v2716_v50 = vpop.f32.mrf.mxu0 }
 0x23d   :  { %v2717_v31 = vadd.f32 %v2716_v50, %v6472_v12  ;;  %v2763_v29 = vpack.c.bf16 %v2725_v21, %v2722_v20 }
 0x23f   :  { %v2762_v16 = vpack.c.bf16 %v2717_v31, %v2714_v2 }
 0x241   :  { %4748 = vmatprep.mubr.bf16.mxu1 %v2762_v16 }
 0x242   :  { %4749 = vmatmul.mubr.bf16.gmra.mxu1 %v2763_v29 }
 0x29d   :  { %v4722_v30 = vpop.f32.mrf.mxu0 }
 0x29e   :  { %v2738_v42 = vadd.f32 %v4722_v30, %v6472_v12 }
 0x29f   :  { %v2729_v6 = vpop.f32.mrf.mxu0 }
 0x2a0   :  { %v2730_v49 = vadd.f32 %v2729_v6, %v6472_v12 }
 0x2a1   :  { %v4723_v26 = vpop.f32.mrf.mxu0 }
 0x2a2   :  { %v2741_v15 = vadd.f32 %v4723_v26, %v6472_v12 }
 0x2a3   :  { %v2732_v41 = vpop.f32.mrf.mxu0 }
 0x2a4   :  { %v2733_v35 = vadd.f32 %v2732_v41, %v6472_v12  ;;  %v2765_v32 = vpack.c.bf16 %v2741_v15, %v2738_v42 }
 0x2a6   :  { %v2764_v22 = vpack.c.bf16 %v2733_v35, %v2730_v49 }
 0x2a8   :  { %4752 = vmatprep.mubr.bf16.mxu1 %v2764_v22 }
 0x2a9   :  { %4753 = vmatmul.mubr.bf16.gmra.mxu1 %v2765_v32 }
 0x2e2   :  { %v4746_v1 = vpop.f32.mrf.mxu1 }
 0x2e3   :  { %v2880_v10 = vadd.f32 %v4746_v1, %v6534_v53 }
 0x2e4   :  { %v2871_v9 = vpop.f32.mrf.mxu1 }
 0x2e5   :  { %v2872_v34 = vadd.f32 %v2871_v9, %v6534_v53  ;;  %v2936_v56 = vmax.f32 %v2880_v10, 0.0  ;;  %v5051_v10 = vld [vmem:[%s6802_s2 + $0xf8] sm:$0xff]  }
 0x2e6   :  { %v4747_v43 = vpop.f32.mrf.mxu1  ;;  %4824 = vmatprep.subr.bf16.mxu0 %v5051_v10 }
 0x2e7   :  { %v2883_v48 = vadd.f32 %v4747_v43, %v6534_v53  ;;  %v2934_v7 = vmax.f32 %v2872_v34, 0.0 }
 0x2e8   :  { %v4726_v17 = vpop.f32.mrf.mxu0  ;;  %v2874_v13 = vpop.f32.mrf.mxu1 }
 0x2e9   :  { %v2875_v37 = vadd.f32 %v2874_v13, %v6534_v53  ;;  %v2937_v39 = vmax.f32 %v2883_v48, 0.0  ;;  %v2754_v14 = vadd.f32 %v4726_v17, %v6472_v12  ;;  %v6559_v17 = vld [vmem:[%s6804_s1] sm:$0xff]   ;;  %v5053_v13 = vld [vmem:[%s6802_s2 + $0xe8] sm:$0xff]  }
 0x2ea   :  { %v2745_v38 = vpop.f32.mrf.mxu0 }
 0x2eb   :  { %v2935_v27 = vmax.f32 %v2875_v37, 0.0  ;;  %v2951_v62 = vpack.c.bf16 %v2937_v39, %v2936_v56  ;;  %v2746_v11 = vadd.f32 %v2745_v38, %v6472_v12  ;;  %v5054_v37 = vld [vmem:[%s6802_s2 + $0xe0] sm:$0xff]   ;;  %v5055_v38 = vld [vmem:[%s6802_s2 + $0xd8] sm:$0xff]   ;;  %v5056_v39 = vld [vmem:[%s6802_s2 + $0xd0] sm:$0xff]  }
 0x2ec   :  { %v4727_v40 = vpop.f32.mrf.mxu0 }
 0x2ed   :  { %v2950_v47 = vpack.c.bf16 %v2935_v27, %v2934_v7  ;;  %v2757_v18 = vadd.f32 %v4727_v40, %v6472_v12 }
 0x2ee   :  { %v2748_v8 = vpop.f32.mrf.mxu0 }
 0x2ef   :  { %v2749_v54 = vadd.f32 %v2748_v8, %v6472_v12  ;;  %4776 = vmatprep.mubr.bf16.mxu0 %v2950_v47  ;;  %v2767_v61 = vpack.c.bf16 %v2757_v18, %v2754_v14 }
 0x2f0   :  { %4777 = vmatmul.mubr.bf16.vlgmr.msra.gmra.mxu0 %v2951_v62 }
 0x2f1   :  { %v2766_v57 = vpack.c.bf16 %v2749_v54, %v2746_v11  ;;  %4825 = vmatpush3.bf16.msra.mxu0 %v5051_v10  ;;  %v5063_v10 = vld [vmem:[%s6802_s2 + $0x118] sm:$0xff]  }
 0x2f3   :  { %4756 = vmatprep.mubr.bf16.mxu1 %v2766_v57 }
 0x2f4   :  { %4757 = vmatmul.mubr.bf16.gmra.mxu1 %v2767_v61  ;;  %v2977_v61 = vsub.s32 4, %v5290_v59 }
 0x2f5   :  { %4808 = vmatprep.mubr.bf16.mxu1 %v6559_v17 }
 0x302   :  { %v4750_v33 = vpop.f32.mrf.mxu1 }
 0x303   :  { %v2896_v45 = vadd.f32 %v4750_v33, %v6534_v53 }
 0x304   :  { %v2887_v19 = vpop.f32.mrf.mxu1 }
 0x305   :  { %v2888_v28 = vadd.f32 %v2887_v19, %v6534_v53  ;;  %v2940_v55 = vmax.f32 %v2896_v45, 0.0 }
 0x306   :  { %v4751_v0 = vpop.f32.mrf.mxu1 }
 0x307   :  { %v2899_v25 = vadd.f32 %v4751_v0, %v6534_v53  ;;  %v2938_v36 = vmax.f32 %v2888_v28, 0.0  ;;  %v2978_v0 = vrot.slane %v6469_v60, %v2977_v61 }
 0x308   :  { %v2890_v5 = vpop.f32.mrf.mxu1 }
 0x309   :  { %v2891_v58 = vadd.f32 %v2890_v5, %v6534_v53  ;;  %v2941_v46 = vmax.f32 %v2899_v25, 0.0 }
 0x30b   :  { %v2939_v12 = vmax.f32 %v2891_v58, 0.0  ;;  %v2953_v21 = vpack.c.bf16 %v2941_v46, %v2940_v55 }
 0x30d   :  { %v2952_v24 = vpack.c.bf16 %v2939_v12, %v2938_v36 }
 0x30f   :  { %4780 = vmatprep.mubr.bf16.mxu0 %v2952_v24 }
 0x310   :  { %4781 = vmatmul.mubr.bf16.gmra.mxu0 %v2953_v21 }
 0x369   :  { %v4754_v50 = vpop.f32.mrf.mxu1 }
 0x36a   :  { %v2912_v29 = vadd.f32 %v4754_v50, %v6534_v53 }
 0x36b   :  { %v2903_v2 = vpop.f32.mrf.mxu1 }
 0x36c   :  { %v2904_v20 = vadd.f32 %v2903_v2, %v6534_v53  ;;  %v2944_v44 = vmax.f32 %v2912_v29, 0.0 }
 0x36d   :  { %v4755_v31 = vpop.f32.mrf.mxu1 }
 0x36e   :  { %v2915_v16 = vadd.f32 %v4755_v31, %v6534_v53  ;;  %v2942_v63 = vmax.f32 %v2904_v20, 0.0 }
 0x36f   :  { %v2906_v4 = vpop.f32.mrf.mxu1 }
 0x370   :  { %v2907_v51 = vadd.f32 %v2906_v4, %v6534_v53  ;;  %v2945_v23 = vmax.f32 %v2915_v16, 0.0 }
 0x372   :  { %v2943_v3 = vmax.f32 %v2907_v51, 0.0  ;;  %v2955_v6 = vpack.c.bf16 %v2945_v23, %v2944_v44 }
 0x374   :  { %v2954_v30 = vpack.c.bf16 %v2943_v3, %v2942_v63 }
 0x376   :  { %4784 = vmatprep.mubr.bf16.mxu0 %v2954_v30 }
 0x377   :  { %4785 = vmatmul.mubr.bf16.gmra.mxu0 %v2955_v6 }
 0x3b0   :  { %v4778_v7 = vpop.f32.mrf.mxu0 }
 0x3b1   :  { %v3070_v3 = vadd.f32 %v4778_v7, %v2978_v0 }
 0x3b2   :  { %v3061_v27 = vpop.f32.mrf.mxu0 }
 0x3b3   :  { %v3062_v6 = vadd.f32 %v3061_v27, %v2978_v0 }
 0x3b4   :  { %v4758_v26 = vpop.f32.mrf.mxu1  ;;  %v4779_v40 = vpop.f32.mrf.mxu0 }
 0x3b5   :  { %v2928_v42 = vadd.f32 %v4758_v26, %v6534_v53  ;;  %v3073_v23 = vadd.f32 %v4779_v40, %v2978_v0 }
 0x3b6   :  { %v2919_v15 = vpop.f32.mrf.mxu1  ;;  %v3064_v56 = vpop.f32.mrf.mxu0 }
 0x3b7   :  { %v2920_v49 = vadd.f32 %v2919_v15, %v6534_v53  ;;  %v2948_v43 = vmax.f32 %v2928_v42, 0.0  ;;  %v3141_v44 = vpack.c.bf16 %v3073_v23, %v3070_v3  ;;  %v3065_v30 = vadd.f32 %v3064_v56, %v2978_v0  ;;  %v6585_v15 = vld [vmem:[%s6804_s1 + $0x8] sm:$0xff]  }
 0x3b8   :  { %v4759_v41 = vpop.f32.mrf.mxu1  ;;  %v6609_v42 = vld [vmem:[%s6804_s1 + $0x28] sm:$0xff]  }
 0x3b9   :  { %v2931_v35 = vadd.f32 %v4759_v41, %v6534_v53  ;;  %v2946_v1 = vmax.f32 %v2920_v49, 0.0  ;;  %v3140_v26 = vpack.c.bf16 %v3065_v30, %v3062_v6  ;;  %v6590_v41 = vld [vmem:[%s6804_s1 + $0x10] sm:$0xff]   ;;  %v6597_v49 = vld [vmem:[%s6804_s1 + $0x18] sm:$0xff]  }
 0x3ba   :  { %v2922_v22 = vpop.f32.mrf.mxu1 }
 0x3bb   :  { %v2923_v32 = vadd.f32 %v2922_v22, %v6534_v53  ;;  %v2949_v52 = vmax.f32 %v2931_v35, 0.0  ;;  %v5052_v53 = vld [vmem:[%s6802_s2 + $0xf0] sm:$0xff]   ;;  %v6602_v35 = vld [vmem:[%s6804_s1 + $0x20] sm:$0xff]  }
 0x3bc   :  { %4826 = vmatprep.subr.bf16.mxu0 %v5052_v53  ;;  %v6614_v22 = vld [vmem:[%s6804_s1 + $0x30] sm:$0xff]  }
 0x3bd   :  { %v2947_v9 = vmax.f32 %v2923_v32, 0.0  ;;  %v2957_v48 = vpack.c.bf16 %v2949_v52, %v2948_v43  ;;  %4827 = vmatpush3.bf16.msra.mxu0 %v5052_v53  ;;  %v6621_v32 = vld [vmem:[%s6804_s1 + $0x38] sm:$0xff]   ;;  %v5057_v52 = vld [vmem:[%s6802_s2 + $0xc8] sm:$0xff]   ;;  %v5060_v43 = vld [vmem:[%s6802_s2 + $0x130] sm:$0xff]  }
 0x3be   :  { %4828 = vmatprep.subr.bf16.mxu0 %v5053_v13 }
 0x3bf   :  { %v2956_v34 = vpack.c.bf16 %v2947_v9, %v2946_v1  ;;  %v5058_v1 = vld [vmem:[%s6802_s2 + $0xc0] sm:$0xff]   ;;  %v5059_v9 = vld [vmem:[%s6802_s2 + $0x138] sm:$0xff]  }
 0x3c1   :  { %4788 = vmatprep.mubr.bf16.mxu0 %v2956_v34  ;;  %4829 = vmatpush3.bf16.msra.mxu0 %v5053_v13  ;;  %v5061_v34 = vld [vmem:[%s6802_s2 + $0x128] sm:$0xff]  }
 0x3c2   :  { %4789 = vmatmul.mubr.bf16.gmra.mxu0 %v2957_v48  ;;  %4830 = vmatprep.subr.bf16.mxu0 %v5054_v37  ;;  %v5062_v48 = vld [vmem:[%s6802_s2 + $0x120] sm:$0xff]  }
 0x3c5   :  { %4831 = vmatpush3.bf16.msra.mxu0 %v5054_v37 }
 0x3c6   :  { %4832 = vmatprep.subr.bf16.mxu0 %v5055_v38 }
 0x3c9   :  { %4833 = vmatpush3.bf16.msra.mxu0 %v5055_v38 }
 0x3ca   :  { %4834 = vmatprep.subr.bf16.mxu0 %v5056_v39 }
 0x3cd   :  { %4835 = vmatpush3.bf16.msra.mxu0 %v5056_v39 }
 0x3ce   :  { %4836 = vmatprep.subr.bf16.mxu0 %v5057_v52 }
 0x3d0   :  { %v4782_v47 = vpop.f32.mrf.mxu0 }
 0x3d1   :  { %v3086_v16 = vadd.f32 %v4782_v47, %v2978_v0  ;;  %4837 = vmatpush3.bf16.msra.mxu0 %v5057_v52 }
 0x3d2   :  { %v3077_v18 = vpop.f32.mrf.mxu0  ;;  %4838 = vmatprep.subr.bf16.mxu0 %v5058_v1 }
 0x3d3   :  { %v3078_v51 = vadd.f32 %v3077_v18, %v2978_v0 }
 0x3d4   :  { %v4783_v8 = vpop.f32.mrf.mxu0 }
 0x3d5   :  { %v3089_v31 = vadd.f32 %v4783_v8, %v2978_v0  ;;  %4839 = vmatpush3.bf16.msra.mxu0 %v5058_v1 }
 0x3d6   :  { %v3080_v62 = vpop.f32.mrf.mxu0 }
 0x3d7   :  { %v3143_v29 = vpack.c.bf16 %v3089_v31, %v3086_v16  ;;  %v3081_v4 = vadd.f32 %v3080_v62, %v2978_v0 }
 0x3d9   :  { %v3142_v63 = vpack.c.bf16 %v3081_v4, %v3078_v51 }
 0x437   :  { %v4786_v11 = vpop.f32.mrf.mxu0 }
 0x438   :  { %v3102_v24 = vadd.f32 %v4786_v11, %v2978_v0 }
 0x439   :  { %v3093_v54 = vpop.f32.mrf.mxu0 }
 0x43a   :  { %v3094_v2 = vadd.f32 %v3093_v54, %v2978_v0 }
 0x43b   :  { %v4787_v14 = vpop.f32.mrf.mxu0 }
 0x43c   :  { %v3105_v12 = vadd.f32 %v4787_v14, %v2978_v0 }
 0x43d   :  { %v3096_v57 = vpop.f32.mrf.mxu0 }
 0x43e   :  { %v3145_v21 = vpack.c.bf16 %v3105_v12, %v3102_v24  ;;  %v3097_v50 = vadd.f32 %v3096_v57, %v2978_v0 }
 0x440   :  { %v3144_v20 = vpack.c.bf16 %v3097_v50, %v3094_v2 }
 0x482   :  { %v4790_v33 = vpop.f32.mrf.mxu0 }
 0x483   :  { %v3118_v25 = vadd.f32 %v4790_v33, %v2978_v0 }
 0x484   :  { %v3109_v19 = vpop.f32.mrf.mxu0 }
 0x485   :  { %v3110_v58 = vadd.f32 %v3109_v19, %v2978_v0 }
 0x486   :  { %v4791_v28 = vpop.f32.mrf.mxu0 }
 0x487   :  { %v3121_v45 = vadd.f32 %v4791_v28, %v2978_v0 }
 0x488   :  { %v3112_v5 = vpop.f32.mrf.mxu0 }
 0x489   :  { %v3147_v46 = vpack.c.bf16 %v3121_v45, %v3118_v25  ;;  %v3113_v36 = vadd.f32 %v3112_v5, %v2978_v0  ;;  %v5064_v5 = vld [vmem:[%s6802_s2 + $0x110] sm:$0xff]  }
 0x48b   :  { %v3146_v55 = vpack.c.bf16 %v3113_v36, %v3110_v58  ;;  %4792 = vmatprep.subr.bf16.mxu1 %v3147_v46  ;;  %v5065_v58 = vld [vmem:[%s6802_s2 + $0x108] sm:$0xff]  }
 0x48c   :  { %4793 = vmatpush3.bf16.msra.mxu1 %v3147_v46  ;;  %v5066_v46 = vld [vmem:[%s6802_s2 + $0x100] sm:$0xff]  }
 0x48d   :  { %4794 = vmatprep.subr.bf16.mxu1 %v3146_v55 }
 0x490   :  { %4795 = vmatpush3.bf16.msra.mxu1 %v3146_v55 }
 0x491   :  { %4796 = vmatprep.subr.bf16.mxu1 %v3145_v21 }
 0x494   :  { %4797 = vmatpush3.bf16.msra.mxu1 %v3145_v21 }
 0x495   :  { %4798 = vmatprep.subr.bf16.mxu1 %v3144_v20 }
 0x498   :  { %4799 = vmatpush3.bf16.msra.mxu1 %v3144_v20 }
 0x499   :  { %4800 = vmatprep.subr.bf16.mxu1 %v3143_v29 }
 0x49c   :  { %4801 = vmatpush3.bf16.msra.mxu1 %v3143_v29 }
 0x49d   :  { %4802 = vmatprep.subr.bf16.mxu1 %v3142_v63 }
 0x4a0   :  { %4803 = vmatpush3.bf16.msra.mxu1 %v3142_v63 }
 0x4a1   :  { %4804 = vmatprep.subr.bf16.mxu1 %v3141_v44 }
 0x4a4   :  { %4805 = vmatpush3.bf16.msra.mxu1 %v3141_v44 }
 0x4a5   :  { %4806 = vmatprep.subr.bf16.mxu1 %v3140_v26 }
 0x4a8   :  { %4807 = vmatpush3.bf16.msra.mxu1 %v3140_v26 }
 0x4a9   :  { %4856 = vmatprep.subr.bf16.mxu1 %v5059_v9 }
 0x4ab   :  { %4809 = vmatmul.mubr.bf16.vlgmr.msra.gmra.mxu1 %v6585_v15 }
 0x4ac   :  { %4812 = vmatprep.mubr.bf16.mxu1 %v6590_v41  ;;  %4857 = vmatpush3.bf16.msra.mxu1 %v5059_v9 }
 0x4ad   :  { %4858 = vmatprep.subr.bf16.mxu1 %v5060_v43 }
 0x4b0   :  { %4859 = vmatpush3.bf16.msra.mxu1 %v5060_v43 }
 0x4b1   :  { %4860 = vmatprep.subr.bf16.mxu1 %v5061_v34 }
 0x4b3   :  { %4813 = vmatmul.mubr.bf16.gmra.mxu1 %v6597_v49 }
 0x4b4   :  { %4816 = vmatprep.mubr.bf16.mxu1 %v6602_v35  ;;  %4861 = vmatpush3.bf16.msra.mxu1 %v5061_v34 }
 0x4b5   :  { %4862 = vmatprep.subr.bf16.mxu1 %v5062_v48 }
 0x4b8   :  { %4863 = vmatpush3.bf16.msra.mxu1 %v5062_v48 }
 0x4b9   :  { %4864 = vmatprep.subr.bf16.mxu1 %v5063_v10 }
 0x4bb   :  { %4817 = vmatmul.mubr.bf16.gmra.mxu1 %v6609_v42 }
 0x4bc   :  { %4820 = vmatprep.mubr.bf16.mxu1 %v6614_v22  ;;  %4865 = vmatpush3.bf16.msra.mxu1 %v5063_v10 }
 0x4bd   :  { %4866 = vmatprep.subr.bf16.mxu1 %v5064_v5 }
 0x4c0   :  { %4867 = vmatpush3.bf16.msra.mxu1 %v5064_v5 }
 0x4c1   :  { %4868 = vmatprep.subr.bf16.mxu1 %v5065_v58 }
 0x4c3   :  { %4821 = vmatmul.mubr.bf16.gmra.mxu1 %v6621_v32 }
 0x4c4   :  { %4869 = vmatpush3.bf16.msra.mxu1 %v5065_v58 }
 0x4c5   :  { %4870 = vmatprep.subr.bf16.mxu1 %v5066_v46 }
 0x4c8   :  { %4871 = vmatpush3.bf16.msra.mxu1 %v5066_v46 }
 0x56b   :  { %v4810_v53 = vpop.f32.mrf.mxu1 }
 0x56d   :  { %v3230_v13 = vpop.f32.mrf.mxu1 }
 0x56f   :  { %v4811_v37 = vpop.f32.mrf.mxu1 }
 0x570   :  { %v3294_v7 = vpack.c.bf16 %v4811_v37, %v4810_v53 }
 0x571   :  { %v3233_v38 = vpop.f32.mrf.mxu1 }
 0x572   :  { %v3293_v39 = vpack.c.bf16 %v3233_v38, %v3230_v13 }
 0x573   :  { %v4814_v27 = vpop.f32.mrf.mxu1 }
 0x574   :  { %4840 = vmatprep.mubr.bf16.mxu0 %v3293_v39 }
 0x575   :  { %v3246_v40 = vpop.f32.mrf.mxu1  ;;  %4841 = vmatmul.mubr.bf16.vlgmr.msra.gmra.mxu0 %v3294_v7 }
 0x577   :  { %v4815_v56 = vpop.f32.mrf.mxu1 }
 0x578   :  { %v3296_v8 = vpack.c.bf16 %v4815_v56, %v4814_v27 }
 0x579   :  { %v3249_v47 = vpop.f32.mrf.mxu1 }
 0x57a   :  { %v3295_v18 = vpack.c.bf16 %v3249_v47, %v3246_v40 }
 0x57b   :  { %v4818_v62 = vpop.f32.mrf.mxu1 }
 0x57c   :  { %4844 = vmatprep.mubr.bf16.mxu0 %v3295_v18 }
 0x57d   :  { %v3262_v11 = vpop.f32.mrf.mxu1  ;;  %4845 = vmatmul.mubr.bf16.gmra.mxu0 %v3296_v8 }
 0x57f   :  { %v4819_v54 = vpop.f32.mrf.mxu1 }
 0x580   :  { %v3298_v61 = vpack.c.bf16 %v4819_v54, %v4818_v62 }
 0x581   :  { %v3265_v14 = vpop.f32.mrf.mxu1 }
 0x582   :  { %v3297_v57 = vpack.c.bf16 %v3265_v14, %v3262_v11 }
 0x583   :  { %v4822_v33 = vpop.f32.mrf.mxu1 }
 0x584   :  { %4848 = vmatprep.mubr.bf16.mxu0 %v3297_v57 }
 0x585   :  { %v3278_v19 = vpop.f32.mrf.mxu1  ;;  %4849 = vmatmul.mubr.bf16.gmra.mxu0 %v3298_v61 }
 0x587   :  { %v4823_v0 = vpop.f32.mrf.mxu1 }
 0x588   :  { %v3300_v45 = vpack.c.bf16 %v4823_v0, %v4822_v33 }
 0x589   :  { %v3281_v28 = vpop.f32.mrf.mxu1 }
 0x58a   :  { %v3299_v25 = vpack.c.bf16 %v3281_v28, %v3278_v19 }
 0x58c   :  { %4852 = vmatprep.mubr.bf16.mxu0 %v3299_v25 }
 0x58d   :  { %4853 = vmatmul.mubr.bf16.gmra.mxu0 %v3300_v45 }
 0x58e   :  { %4904 = vmatprep.mubr.bf16.mxu0 %v6559_v17  ;;  %v3320_v17 = vsub.s32 5, %v5290_v59 }
 0x590   :  { %v3321_v12 = vrot.slane %v6469_v60, %v3320_v17 }
 0x635   :  { %v4842_v36 = vpop.f32.mrf.mxu0 }
 0x636   :  { %v3413_v2 = vadd.f32 %v4842_v36, %v3321_v12 }
 0x637   :  { %v3404_v55 = vpop.f32.mrf.mxu0 }
 0x638   :  { %v3405_v21 = vadd.f32 %v3404_v55, %v3321_v12  ;;  %v3469_v23 = vmax.f32 %v3413_v2, 0.0  ;;  %v5071_v2 = vld [vmem:[%s6802_s2 + $0x158] sm:$0xff]  }
 0x639   :  { %v4843_v24 = vpop.f32.mrf.mxu0 }
 0x63a   :  { %v3416_v50 = vadd.f32 %v4843_v24, %v3321_v12  ;;  %v3467_v4 = vmax.f32 %v3405_v21, 0.0  ;;  %v5067_v24 = vld [vmem:[%s6802_s2 + $0x178] sm:$0xff]   ;;  %v5068_v21 = vld [vmem:[%s6802_s2 + $0x170] sm:$0xff]  }
 0x63b   :  { %v3407_v31 = vpop.f32.mrf.mxu0  ;;  %4920 = vmatprep.subr.bf16.mxu1 %v5067_v24 }
 0x63c   :  { %v3408_v20 = vadd.f32 %v3407_v31, %v3321_v12  ;;  %v3470_v16 = vmax.f32 %v3416_v50, 0.0  ;;  %v5070_v50 = vld [vmem:[%s6802_s2 + $0x160] sm:$0xff]   ;;  %v5072_v31 = vld [vmem:[%s6802_s2 + $0x150] sm:$0xff]  }
 0x63d   :  { %v4846_v29 = vpop.f32.mrf.mxu0 }
 0x63e   :  { %v3468_v51 = vmax.f32 %v3408_v20, 0.0  ;;  %v3484_v44 = vpack.c.bf16 %v3470_v16, %v3469_v23  ;;  %v3429_v52 = vadd.f32 %v4846_v29, %v3321_v12 }
 0x63f   :  { %v3420_v63 = vpop.f32.mrf.mxu0 }
 0x640   :  { %v3483_v3 = vpack.c.bf16 %v3468_v51, %v3467_v4  ;;  %v3421_v6 = vadd.f32 %v3420_v63, %v3321_v12  ;;  %v3473_v53 = vmax.f32 %v3429_v52, 0.0 }
 0x641   :  { %v4847_v30 = vpop.f32.mrf.mxu0 }
 0x642   :  { %v3432_v26 = vadd.f32 %v4847_v30, %v3321_v12  ;;  %4872 = vmatprep.mubr.bf16.mxu1 %v3483_v3  ;;  %v3471_v48 = vmax.f32 %v3421_v6, 0.0 }
 0x643   :  { %v3423_v1 = vpop.f32.mrf.mxu0  ;;  %4873 = vmatmul.mubr.bf16.vlgmr.msra.gmra.mxu1 %v3484_v44 }
 0x644   :  { %v3424_v9 = vadd.f32 %v3423_v1, %v3321_v12  ;;  %v3474_v43 = vmax.f32 %v3432_v26, 0.0  ;;  %4921 = vmatpush3.bf16.msra.mxu1 %v5067_v24  ;;  %v3510_v26 = vsub.s32 6, %v5290_v59 }
 0x645   :  { %v4850_v34 = vpop.f32.mrf.mxu0  ;;  %4922 = vmatprep.subr.bf16.mxu1 %v5068_v21 }
 0x646   :  { %v3472_v10 = vmax.f32 %v3424_v9, 0.0  ;;  %v3486_v38 = vpack.c.bf16 %v3474_v43, %v3473_v53  ;;  %v3445_v40 = vadd.f32 %v4850_v34, %v3321_v12  ;;  %v3511_v9 = vrot.slane %v6469_v60, %v3510_v26 }
 0x647   :  { %v3436_v13 = vpop.f32.mrf.mxu0 }
 0x648   :  { %v3485_v37 = vpack.c.bf16 %v3472_v10, %v3471_v48  ;;  %v3437_v7 = vadd.f32 %v3436_v13, %v3321_v12  ;;  %v3477_v54 = vmax.f32 %v3445_v40, 0.0  ;;  %4923 = vmatpush3.bf16.msra.mxu1 %v5068_v21 }
 0x649   :  { %v4851_v39 = vpop.f32.mrf.mxu0 }
 0x64a   :  { %v3448_v27 = vadd.f32 %v4851_v39, %v3321_v12  ;;  %4876 = vmatprep.mubr.bf16.mxu1 %v3485_v37  ;;  %v3475_v62 = vmax.f32 %v3437_v7, 0.0 }
 0x64b   :  { %v3439_v56 = vpop.f32.mrf.mxu0  ;;  %4877 = vmatmul.mubr.bf16.gmra.mxu1 %v3486_v38 }
 0x64c   :  { %v3440_v47 = vadd.f32 %v3439_v56, %v3321_v12  ;;  %v3478_v18 = vmax.f32 %v3448_v27, 0.0 }
 0x64d   :  { %v4854_v8 = vpop.f32.mrf.mxu0 }
 0x64e   :  { %v3476_v11 = vmax.f32 %v3440_v47, 0.0  ;;  %v3488_v61 = vpack.c.bf16 %v3478_v18, %v3477_v54  ;;  %v3461_v28 = vadd.f32 %v4854_v8, %v3321_v12 }
 0x64f   :  { %v3452_v14 = vpop.f32.mrf.mxu0 }
 0x650   :  { %v3487_v57 = vpack.c.bf16 %v3476_v11, %v3475_v62  ;;  %v3453_v19 = vadd.f32 %v3452_v14, %v3321_v12  ;;  %v3481_v17 = vmax.f32 %v3461_v28, 0.0 }
 0x651   :  { %v4855_v33 = vpop.f32.mrf.mxu0 }
 0x652   :  { %v3464_v0 = vadd.f32 %v4855_v33, %v3321_v12  ;;  %4880 = vmatprep.mubr.bf16.mxu1 %v3487_v57  ;;  %v3479_v58 = vmax.f32 %v3453_v19, 0.0 }
 0x653   :  { %v3455_v25 = vpop.f32.mrf.mxu0  ;;  %4881 = vmatmul.mubr.bf16.gmra.mxu1 %v3488_v61 }
 0x654   :  { %v3456_v45 = vadd.f32 %v3455_v25, %v3321_v12  ;;  %v3482_v5 = vmax.f32 %v3464_v0, 0.0  ;;  %v5069_v12 = vld [vmem:[%s6802_s2 + $0x168] sm:$0xff]  }
 0x655   :  { %4924 = vmatprep.subr.bf16.mxu1 %v5069_v12 }
 0x656   :  { %v3480_v46 = vmax.f32 %v3456_v45, 0.0  ;;  %v3490_v55 = vpack.c.bf16 %v3482_v5, %v3481_v17  ;;  %4925 = vmatpush3.bf16.msra.mxu1 %v5069_v12 }
 0x657   :  { %4926 = vmatprep.subr.bf16.mxu1 %v5070_v50 }
 0x658   :  { %v3489_v36 = vpack.c.bf16 %v3480_v46, %v3479_v58 }
 0x65a   :  { %4884 = vmatprep.mubr.bf16.mxu1 %v3489_v36  ;;  %4927 = vmatpush3.bf16.msra.mxu1 %v5070_v50 }
 0x65b   :  { %4885 = vmatmul.mubr.bf16.gmra.mxu1 %v3490_v55  ;;  %4928 = vmatprep.subr.bf16.mxu1 %v5071_v2 }
 0x65e   :  { %4929 = vmatpush3.bf16.msra.mxu1 %v5071_v2 }
 0x65f   :  { %4930 = vmatprep.subr.bf16.mxu1 %v5072_v31 }
 0x662   :  { %4931 = vmatpush3.bf16.msra.mxu1 %v5072_v31 }
 0x703   :  { %v4874_v20 = vpop.f32.mrf.mxu1 }
 0x704   :  { %v3603_v17 = vadd.f32 %v4874_v20, %v3511_v9  ;;  %v5073_v20 = vld [vmem:[%s6802_s2 + $0x148] sm:$0xff]  }
 0x705   :  { %v3594_v16 = vpop.f32.mrf.mxu1  ;;  %4932 = vmatprep.subr.bf16.mxu1 %v5073_v20 }
 0x706   :  { %v3659_v12 = vmax.f32 %v3603_v17, 0.0  ;;  %v3595_v50 = vadd.f32 %v3594_v16, %v3511_v9  ;;  %4933 = vmatpush3.bf16.msra.mxu1 %v5073_v20 }
 0x707   :  { %v4875_v29 = vpop.f32.mrf.mxu1 }
 0x708   :  { %v3606_v5 = vadd.f32 %v4875_v29, %v3511_v9 }
 0x709   :  { %v3597_v4 = vpop.f32.mrf.mxu1 }
 0x70a   :  { %v3660_v55 = vmax.f32 %v3606_v5, 0.0  ;;  %v3598_v24 = vadd.f32 %v3597_v4, %v3511_v9 }
 0x70b   :  { %v4878_v51 = vpop.f32.mrf.mxu1 }
 0x70c   :  { %v3619_v61 = vadd.f32 %v4878_v51, %v3511_v9  ;;  %v3674_v2 = vpack.c.bf16 %v3660_v55, %v3659_v12  ;;  %v3658_v31 = vmax.f32 %v3598_v24, 0.0  ;;  %v3657_v51 = vmax.f32 %v3595_v50, 0.0 }
 0x70d   :  { %v3610_v23 = vpop.f32.mrf.mxu1 }
 0x70e   :  { %v3663_v25 = vmax.f32 %v3619_v61, 0.0  ;;  %v3611_v45 = vadd.f32 %v3610_v23, %v3511_v9  ;;  %v3673_v23 = vpack.c.bf16 %v3658_v31, %v3657_v51 }
 0x70f   :  { %v4879_v63 = vpop.f32.mrf.mxu1 }
 0x710   :  { %v3622_v54 = vadd.f32 %v4879_v63, %v3511_v9  ;;  %v3661_v36 = vmax.f32 %v3611_v45, 0.0 }
 0x711   :  { %v3613_v3 = vpop.f32.mrf.mxu1 }
 0x712   :  { %v3664_v19 = vmax.f32 %v3622_v54, 0.0  ;;  %v3614_v0 = vadd.f32 %v3613_v3, %v3511_v9  ;;  %v3805_v54 = vsub.s32 7, %v5290_v59 }
 0x713   :  { %v4882_v44 = vpop.f32.mrf.mxu1 }
 0x714   :  { %v3635_v27 = vadd.f32 %v4882_v44, %v3511_v9  ;;  %v3676_v58 = vpack.c.bf16 %v3664_v19, %v3663_v25  ;;  %v3662_v46 = vmax.f32 %v3614_v0, 0.0 }
 0x715   :  { %v3626_v30 = vpop.f32.mrf.mxu1 }
 0x716   :  { %v3667_v60 = vmax.f32 %v3635_v27, 0.0  ;;  %v3627_v11 = vadd.f32 %v3626_v30, %v3511_v9  ;;  %v3675_v21 = vpack.c.bf16 %v3662_v46, %v3661_v36 }
 0x717   :  { %v4883_v6 = vpop.f32.mrf.mxu1 }
 0x718   :  { %v3638_v37 = vadd.f32 %v4883_v6, %v3511_v9  ;;  %v3665_v33 = vmax.f32 %v3627_v11, 0.0  ;;  %v5087_v11 = vld [vmem:[%s6802_s2 + $0x1d8] sm:$0xff]  }
 0x719   :  { %v3629_v52 = vpop.f32.mrf.mxu1 }
 0x71a   :  { %v3668_v18 = vmax.f32 %v3638_v37, 0.0  ;;  %v3630_v8 = vadd.f32 %v3629_v52, %v3511_v9 }
 0x71b   :  { %v4886_v1 = vpop.f32.mrf.mxu1 }
 0x71c   :  { %v3651_v34 = vadd.f32 %v4886_v1, %v3511_v9  ;;  %v3678_v14 = vpack.c.bf16 %v3668_v18, %v3667_v60  ;;  %v3666_v57 = vmax.f32 %v3630_v8, 0.0  ;;  %v5083_v18 = vld [vmem:[%s6802_s2 + $0x1f8] sm:$0xff]   ;;  %v5084_v8 = vld [vmem:[%s6802_s2 + $0x1f0] sm:$0xff]   ;;  %v5086_v60 = vld [vmem:[%s6802_s2 + $0x1e0] sm:$0xff]  }
 0x71d   :  { %v3642_v43 = vpop.f32.mrf.mxu1 }
 0x71e   :  { %v3643_v10 = vadd.f32 %v3642_v43, %v3511_v9  ;;  %v3671_v38 = vmax.f32 %v3651_v34, 0.0  ;;  %v3677_v28 = vpack.c.bf16 %v3666_v57, %v3665_v33  ;;  %v5092_v57 = vld [vmem:[%s6803_s3] sm:$0xff] }
 0x71f   :  { %v4887_v48 = vpop.f32.mrf.mxu1  ;;  %v3806_v61 = vrot.slane %v5092_v57, %v3805_v54 }
 0x720   :  { %v3654_v53 = vadd.f32 %v4887_v48, %v3511_v9  ;;  %v3669_v40 = vmax.f32 %v3643_v10, 0.0 }
 0x721   :  { %v3645_v13 = vpop.f32.mrf.mxu1 }
 0x722   :  { %v3672_v39 = vmax.f32 %v3654_v53, 0.0  ;;  %v3646_v7 = vadd.f32 %v3645_v13, %v3511_v9 }
 0x724   :  { %v3680_v56 = vpack.c.bf16 %v3672_v39, %v3671_v38  ;;  %v3670_v47 = vmax.f32 %v3646_v7, 0.0 }
 0x726   :  { %v3679_v62 = vpack.c.bf16 %v3670_v47, %v3669_v40  ;;  %4888 = vmatprep.subr.bf16.mxu0 %v3680_v56  ;;  %v5080_v40 = vld [vmem:[%s6802_s2 + $0x190] sm:$0xff]   ;;  %v5082_v47 = vld [vmem:[%s6802_s2 + $0x180] sm:$0xff]  }
 0x727   :  { %4889 = vmatpush3.bf16.msra.mxu0 %v3680_v56  ;;  %v5081_v56 = vld [vmem:[%s6802_s2 + $0x188] sm:$0xff]  }
 0x728   :  { %4890 = vmatprep.subr.bf16.mxu0 %v3679_v62 }
 0x72b   :  { %4891 = vmatpush3.bf16.msra.mxu0 %v3679_v62  ;;  %v5085_v62 = vld [vmem:[%s6802_s2 + $0x1e8] sm:$0xff]  }
 0x72c   :  { %4892 = vmatprep.subr.bf16.mxu0 %v3678_v14 }
 0x72f   :  { %4893 = vmatpush3.bf16.msra.mxu0 %v3678_v14 }
 0x730   :  { %4894 = vmatprep.subr.bf16.mxu0 %v3677_v28 }
 0x733   :  { %4895 = vmatpush3.bf16.msra.mxu0 %v3677_v28 }
 0x734   :  { %4896 = vmatprep.subr.bf16.mxu0 %v3676_v58 }
 0x737   :  { %4897 = vmatpush3.bf16.msra.mxu0 %v3676_v58 }
 0x738   :  { %4898 = vmatprep.subr.bf16.mxu0 %v3675_v21 }
 0x73b   :  { %4899 = vmatpush3.bf16.msra.mxu0 %v3675_v21 }
 0x73c   :  { %4900 = vmatprep.subr.bf16.mxu0 %v3674_v2 }
 0x73f   :  { %4901 = vmatpush3.bf16.msra.mxu0 %v3674_v2 }
 0x740   :  { %4902 = vmatprep.subr.bf16.mxu0 %v3673_v23 }
 0x743   :  { %4903 = vmatpush3.bf16.msra.mxu0 %v3673_v23 }
 0x746   :  { %4905 = vmatmul.mubr.bf16.vlgmr.msra.gmra.mxu0 %v6585_v15  ;;  %v5074_v15 = vld [vmem:[%s6802_s2 + $0x140] sm:$0xff]  }
 0x747   :  { %4908 = vmatprep.mubr.bf16.mxu0 %v6590_v41  ;;  %4934 = vmatprep.subr.bf16.mxu1 %v5074_v15  ;;  %v5075_v41 = vld [vmem:[%s6802_s2 + $0x1b8] sm:$0xff]  }
 0x748   :  { %4935 = vmatpush3.bf16.msra.mxu1 %v5074_v15  ;;  %4952 = vmatprep.subr.bf16.mxu0 %v5075_v41 }
 0x749   :  { %4953 = vmatpush3.bf16.msra.mxu0 %v5075_v41  ;;  %4984 = vmatprep.subr.bf16.mxu1 %v5083_v18 }
 0x74e   :  { %4909 = vmatmul.mubr.bf16.gmra.mxu0 %v6597_v49  ;;  %v5076_v49 = vld [vmem:[%s6802_s2 + $0x1b0] sm:$0xff]  }
 0x74f   :  { %4912 = vmatprep.mubr.bf16.mxu0 %v6602_v35  ;;  %4954 = vmatprep.subr.bf16.mxu0 %v5076_v49  ;;  %v5077_v35 = vld [vmem:[%s6802_s2 + $0x1a8] sm:$0xff]  }
 0x750   :  { %4955 = vmatpush3.bf16.msra.mxu0 %v5076_v49 }
 0x751   :  { %4956 = vmatprep.subr.bf16.mxu0 %v5077_v35 }
 0x754   :  { %4957 = vmatpush3.bf16.msra.mxu0 %v5077_v35 }
 0x756   :  { %4913 = vmatmul.mubr.bf16.gmra.mxu0 %v6609_v42  ;;  %v5078_v42 = vld [vmem:[%s6802_s2 + $0x1a0] sm:$0xff]  }
 0x757   :  { %4916 = vmatprep.mubr.bf16.mxu0 %v6614_v22  ;;  %4958 = vmatprep.subr.bf16.mxu0 %v5078_v42  ;;  %v5079_v22 = vld [vmem:[%s6802_s2 + $0x198] sm:$0xff]  }
 0x758   :  { %4959 = vmatpush3.bf16.msra.mxu0 %v5078_v42 }
 0x759   :  { %4960 = vmatprep.subr.bf16.mxu0 %v5079_v22 }
 0x75c   :  { %4961 = vmatpush3.bf16.msra.mxu0 %v5079_v22 }
 0x75d   :  { %4962 = vmatprep.subr.bf16.mxu0 %v5080_v40 }
 0x75e   :  { %4917 = vmatmul.mubr.bf16.gmra.mxu0 %v6621_v32 }
 0x760   :  { %4963 = vmatpush3.bf16.msra.mxu0 %v5080_v40 }
 0x761   :  { %4964 = vmatprep.subr.bf16.mxu0 %v5081_v56 }
 0x764   :  { %4965 = vmatpush3.bf16.msra.mxu0 %v5081_v56 }
 0x765   :  { %4966 = vmatprep.subr.bf16.mxu0 %v5082_v47 }
 0x768   :  { %4967 = vmatpush3.bf16.msra.mxu0 %v5082_v47 }
 0x806   :  { %v4906_v32 = vpop.f32.mrf.mxu0 }
 0x808   :  { %v3715_v16 = vpop.f32.mrf.mxu0 }
 0x80a   :  { %v4907_v29 = vpop.f32.mrf.mxu0 }
 0x80b   :  { %v3779_v3 = vpack.c.bf16 %v4907_v29, %v4906_v32 }
 0x80c   :  { %v3718_v4 = vpop.f32.mrf.mxu0 }
 0x80d   :  { %v3778_v63 = vpack.c.bf16 %v3718_v4, %v3715_v16 }
 0x80e   :  { %v4910_v44 = vpop.f32.mrf.mxu0 }
 0x80f   :  { %4936 = vmatprep.mubr.bf16.mxu1 %v3778_v63 }
 0x810   :  { %v3731_v30 = vpop.f32.mrf.mxu0  ;;  %4937 = vmatmul.mubr.bf16.vlgmr.msra.gmra.mxu1 %v3779_v3 }
 0x811   :  { %4985 = vmatpush3.bf16.msra.mxu1 %v5083_v18 }
 0x812   :  { %v4911_v6 = vpop.f32.mrf.mxu0  ;;  %4986 = vmatprep.subr.bf16.mxu1 %v5084_v8 }
 0x813   :  { %v3781_v1 = vpack.c.bf16 %v4911_v6, %v4910_v44 }
 0x814   :  { %v3734_v26 = vpop.f32.mrf.mxu0 }
 0x815   :  { %v3780_v52 = vpack.c.bf16 %v3734_v26, %v3731_v30  ;;  %4987 = vmatpush3.bf16.msra.mxu1 %v5084_v8  ;;  %v5088_v8 = vld [vmem:[%s6802_s2 + $0x1d0] sm:$0xff]  }
 0x816   :  { %v4914_v9 = vpop.f32.mrf.mxu0  ;;  %4988 = vmatprep.subr.bf16.mxu1 %v5085_v62 }
 0x817   :  { %4940 = vmatprep.mubr.bf16.mxu1 %v3780_v52 }
 0x818   :  { %v3747_v43 = vpop.f32.mrf.mxu0  ;;  %4941 = vmatmul.mubr.bf16.gmra.mxu1 %v3781_v1 }
 0x819   :  { %4989 = vmatpush3.bf16.msra.mxu1 %v5085_v62  ;;  %v5089_v62 = vld [vmem:[%s6802_s2 + $0x1c8] sm:$0xff]  }
 0x81a   :  { %v4915_v34 = vpop.f32.mrf.mxu0  ;;  %4990 = vmatprep.subr.bf16.mxu1 %v5086_v60 }
 0x81b   :  { %v3783_v53 = vpack.c.bf16 %v4915_v34, %v4914_v9 }
 0x81c   :  { %v3750_v48 = vpop.f32.mrf.mxu0 }
 0x81d   :  { %v3782_v10 = vpack.c.bf16 %v3750_v48, %v3747_v43  ;;  %4991 = vmatpush3.bf16.msra.mxu1 %v5086_v60  ;;  %v5090_v60 = vld [vmem:[%s6802_s2 + $0x1c0] sm:$0xff]  }
 0x81e   :  { %v4918_v13 = vpop.f32.mrf.mxu0  ;;  %4992 = vmatprep.subr.bf16.mxu1 %v5087_v11 }
 0x81f   :  { %4944 = vmatprep.mubr.bf16.mxu1 %v3782_v10 }
 0x820   :  { %v3763_v37 = vpop.f32.mrf.mxu0  ;;  %4945 = vmatmul.mubr.bf16.gmra.mxu1 %v3783_v53 }
 0x821   :  { %4993 = vmatpush3.bf16.msra.mxu1 %v5087_v11  ;;  %v6745_v11 = vld [vmem:[%s6803_s3 + $0x8] sm:$0x3] }
 0x822   :  { %v4919_v38 = vpop.f32.mrf.mxu0  ;;  %4994 = vmatprep.subr.bf16.mxu1 %v5088_v8 }
 0x823   :  { %v3785_v27 = vpack.c.bf16 %v4919_v38, %v4918_v13 }
 0x824   :  { %v3766_v39 = vpop.f32.mrf.mxu0 }
 0x825   :  { %v3784_v7 = vpack.c.bf16 %v3766_v39, %v3763_v37  ;;  %4995 = vmatpush3.bf16.msra.mxu1 %v5088_v8 }
 0x826   :  { %4996 = vmatprep.subr.bf16.mxu1 %v5089_v62 }
 0x827   :  { %4948 = vmatprep.mubr.bf16.mxu1 %v3784_v7 }
 0x828   :  { %4949 = vmatmul.mubr.bf16.gmra.mxu1 %v3785_v27 }
 0x829   :  { %4997 = vmatpush3.bf16.msra.mxu1 %v5089_v62 }
 0x82a   :  { %4998 = vmatprep.subr.bf16.mxu1 %v5090_v60 }
 0x82d   :  { %4999 = vmatpush3.bf16.msra.mxu1 %v5090_v60 }
 0x8d0   :  { %v4938_v14 = vpop.f32.mrf.mxu1 }
 0x8d1   :  { %v3898_v25 = vadd.f32 %v4938_v14, %v3806_v61  ;;  %v6811_v14 = vsub.s32 0, %v5290_v59 }
 0x8d2   :  { %v3889_v33 = vpop.f32.mrf.mxu1 }
 0x8d3   :  { %v3890_v0 = vadd.f32 %v3889_v33, %v3806_v61  ;;  %v3954_v55 = vmax.f32 %v3898_v25, 0.0  ;;  %v3996_v57 = vrot.slane %v6745_v11, %v6811_v14 }
 0x8d4   :  { %v4939_v19 = vpop.f32.mrf.mxu1 }
 0x8d5   :  { %v3901_v28 = vadd.f32 %v4939_v19, %v3806_v61  ;;  %v3952_v17 = vmax.f32 %v3890_v0, 0.0 }
 0x8d6   :  { %v3892_v45 = vpop.f32.mrf.mxu1 }
 0x8d7   :  { %v3893_v5 = vadd.f32 %v3892_v45, %v3806_v61  ;;  %v3955_v58 = vmax.f32 %v3901_v28, 0.0 }
 0x8d8   :  { %v4942_v46 = vpop.f32.mrf.mxu1 }
 0x8d9   :  { %v3953_v36 = vmax.f32 %v3893_v5, 0.0  ;;  %v3969_v12 = vpack.c.bf16 %v3955_v58, %v3954_v55  ;;  %v3914_v51 = vadd.f32 %v4942_v46, %v3806_v61 }
 0x8da   :  { %v3905_v24 = vpop.f32.mrf.mxu1 }
 0x8db   :  { %v3968_v21 = vpack.c.bf16 %v3953_v36, %v3952_v17  ;;  %v3906_v2 = vadd.f32 %v3905_v24, %v3806_v61  ;;  %v3958_v42 = vmax.f32 %v3914_v51, 0.0 }
 0x8dc   :  { %v4943_v50 = vpop.f32.mrf.mxu1 }
 0x8dd   :  { %v3917_v31 = vadd.f32 %v4943_v50, %v3806_v61  ;;  %4968 = vmatprep.mubr.bf16.mxu0 %v3968_v21  ;;  %v3956_v49 = vmax.f32 %v3906_v2, 0.0 }
 0x8de   :  { %v3908_v23 = vpop.f32.mrf.mxu1  ;;  %4969 = vmatmul.mubr.bf16.vlgmr.msra.gmra.mxu0 %v3969_v12 }
 0x8df   :  { %v3909_v20 = vadd.f32 %v3908_v23, %v3806_v61  ;;  %v3959_v15 = vmax.f32 %v3917_v31, 0.0 }
 0x8e0   :  { %v4946_v41 = vpop.f32.mrf.mxu1 }
 0x8e1   :  { %v3957_v35 = vmax.f32 %v3909_v20, 0.0  ;;  %v3971_v16 = vpack.c.bf16 %v3959_v15, %v3958_v42  ;;  %v3930_v3 = vadd.f32 %v4946_v41, %v3806_v61 }
 0x8e2   :  { %v3921_v22 = vpop.f32.mrf.mxu1 }
 0x8e3   :  { %v3970_v32 = vpack.c.bf16 %v3957_v35, %v3956_v49  ;;  %v3922_v4 = vadd.f32 %v3921_v22, %v3806_v61  ;;  %v3962_v9 = vmax.f32 %v3930_v3, 0.0 }
 0x8e4   :  { %v4947_v29 = vpop.f32.mrf.mxu1 }
 0x8e5   :  { %v3933_v63 = vadd.f32 %v4947_v29, %v3806_v61  ;;  %4972 = vmatprep.mubr.bf16.mxu0 %v3970_v32  ;;  %v3960_v52 = vmax.f32 %v3922_v4, 0.0 }
 0x8e6   :  { %v3924_v44 = vpop.f32.mrf.mxu1  ;;  %4973 = vmatmul.mubr.bf16.gmra.mxu0 %v3971_v16 }
 0x8e7   :  { %v3925_v30 = vadd.f32 %v3924_v44, %v3806_v61  ;;  %v3963_v6 = vmax.f32 %v3933_v63, 0.0 }
 0x8e8   :  { %v4950_v26 = vpop.f32.mrf.mxu1 }
 0x8e9   :  { %v3961_v1 = vmax.f32 %v3925_v30, 0.0  ;;  %v3973_v48 = vpack.c.bf16 %v3963_v6, %v3962_v9  ;;  %v3946_v37 = vadd.f32 %v4950_v26, %v3806_v61 }
 0x8ea   :  { %v3937_v43 = vpop.f32.mrf.mxu1 }
 0x8eb   :  { %v3972_v34 = vpack.c.bf16 %v3961_v1, %v3960_v52  ;;  %v3938_v53 = vadd.f32 %v3937_v43, %v3806_v61  ;;  %v3966_v56 = vmax.f32 %v3946_v37, 0.0 }
 0x8ec   :  { %v4951_v10 = vpop.f32.mrf.mxu1 }
 0x8ed   :  { %v3949_v13 = vadd.f32 %v4951_v10, %v3806_v61  ;;  %4976 = vmatprep.mubr.bf16.mxu0 %v3972_v34  ;;  %v3964_v27 = vmax.f32 %v3938_v53, 0.0 }
 0x8ee   :  { %v3940_v38 = vpop.f32.mrf.mxu1  ;;  %4977 = vmatmul.mubr.bf16.gmra.mxu0 %v3973_v48 }
 0x8ef   :  { %v3941_v39 = vadd.f32 %v3940_v38, %v3806_v61  ;;  %v3967_v7 = vmax.f32 %v3949_v13, 0.0 }
 0x8f1   :  { %v3965_v40 = vmax.f32 %v3941_v39, 0.0  ;;  %v3975_v18 = vpack.c.bf16 %v3967_v7, %v3966_v56 }
 0x8f3   :  { %v3974_v47 = vpack.c.bf16 %v3965_v40, %v3964_v27 }
 0x8f5   :  { %4980 = vmatprep.mubr.bf16.mxu0 %v3974_v47 }
 0x8f6   :  { %4981 = vmatmul.mubr.bf16.gmra.mxu0 %v3975_v18  ;;  %v6812_v18 = vsub.s32 1, %v5290_v59 }
 0x8f8   :  { %v4186_v8 = vrot.slane %v6745_v11, %v6812_v18 }
 0x99e   :  { %v4970_v54 = vpop.f32.mrf.mxu0 }
 0x99f   :  { %v4088_v28 = vadd.f32 %v4970_v54, %v3996_v57 }
 0x9a0   :  { %v4079_v61 = vpop.f32.mrf.mxu0 }
 0x9a1   :  { %v4080_v19 = vadd.f32 %v4079_v61, %v3996_v57  ;;  %v4144_v36 = vmax.f32 %v4088_v28, 0.0 }
 0x9a2   :  { %v4971_v33 = vpop.f32.mrf.mxu0 }
 0x9a3   :  { %v4091_v0 = vadd.f32 %v4971_v33, %v3996_v57  ;;  %v4142_v46 = vmax.f32 %v4080_v19, 0.0 }
 0x9a4   :  { %v4082_v25 = vpop.f32.mrf.mxu0 }
 0x9a5   :  { %v4083_v45 = vadd.f32 %v4082_v25, %v3996_v57  ;;  %v4145_v5 = vmax.f32 %v4091_v0, 0.0 }
 0x9a6   :  { %v4974_v58 = vpop.f32.mrf.mxu0 }
 0x9a7   :  { %v4143_v17 = vmax.f32 %v4083_v45, 0.0  ;;  %v4159_v21 = vpack.c.bf16 %v4145_v5, %v4144_v36  ;;  %v4104_v31 = vadd.f32 %v4974_v58, %v3996_v57 }
 0x9a8   :  { %v4095_v55 = vpop.f32.mrf.mxu0 }
 0x9a9   :  { %v4158_v24 = vpack.c.bf16 %v4143_v17, %v4142_v46  ;;  %v4096_v50 = vadd.f32 %v4095_v55, %v3996_v57  ;;  %v4148_v35 = vmax.f32 %v4104_v31, 0.0 }
 0x9aa   :  { %v4975_v12 = vpop.f32.mrf.mxu0 }
 0x9ab   :  { %v4107_v2 = vadd.f32 %v4975_v12, %v3996_v57  ;;  %5000 = vmatprep.mubr.bf16.mxu1 %v4158_v24  ;;  %v4146_v41 = vmax.f32 %v4096_v50, 0.0 }
 0x9ac   :  { %v4098_v51 = vpop.f32.mrf.mxu0  ;;  %5001 = vmatmul.mubr.bf16.vlgmr.msra.gmra.mxu1 %v4159_v21 }
 0x9ad   :  { %v4099_v23 = vadd.f32 %v4098_v51, %v3996_v57  ;;  %v4149_v20 = vmax.f32 %v4107_v2, 0.0 }
 0x9ae   :  { %v4978_v15 = vpop.f32.mrf.mxu0 }
 0x9af   :  { %v4147_v49 = vmax.f32 %v4099_v23, 0.0  ;;  %v4161_v32 = vpack.c.bf16 %v4149_v20, %v4148_v35  ;;  %v4120_v63 = vadd.f32 %v4978_v15, %v3996_v57 }
 0x9b0   :  { %v4111_v42 = vpop.f32.mrf.mxu0 }
 0x9b1   :  { %v4160_v22 = vpack.c.bf16 %v4147_v49, %v4146_v41  ;;  %v4112_v29 = vadd.f32 %v4111_v42, %v3996_v57  ;;  %v4152_v1 = vmax.f32 %v4120_v63, 0.0 }
 0x9b2   :  { %v4979_v16 = vpop.f32.mrf.mxu0 }
 0x9b3   :  { %v4123_v4 = vadd.f32 %v4979_v16, %v3996_v57  ;;  %5004 = vmatprep.mubr.bf16.mxu1 %v4160_v22  ;;  %v4150_v26 = vmax.f32 %v4112_v29, 0.0 }
 0x9b4   :  { %v4114_v3 = vpop.f32.mrf.mxu0  ;;  %5005 = vmatmul.mubr.bf16.gmra.mxu1 %v4161_v32 }
 0x9b5   :  { %v4115_v44 = vadd.f32 %v4114_v3, %v3996_v57  ;;  %v4153_v30 = vmax.f32 %v4123_v4, 0.0 }
 0x9b6   :  { %v4982_v6 = vpop.f32.mrf.mxu0 }
 0x9b7   :  { %v4151_v52 = vmax.f32 %v4115_v44, 0.0  ;;  %v4163_v34 = vpack.c.bf16 %v4153_v30, %v4152_v1  ;;  %v4136_v13 = vadd.f32 %v4982_v6, %v3996_v57 }
 0x9b8   :  { %v4127_v9 = vpop.f32.mrf.mxu0 }
 0x9b9   :  { %v4162_v43 = vpack.c.bf16 %v4151_v52, %v4150_v26  ;;  %v4128_v10 = vadd.f32 %v4127_v9, %v3996_v57  ;;  %v4156_v40 = vmax.f32 %v4136_v13, 0.0 }
 0x9ba   :  { %v4983_v48 = vpop.f32.mrf.mxu0 }
 0x9bb   :  { %v4139_v53 = vadd.f32 %v4983_v48, %v3996_v57  ;;  %5008 = vmatprep.mubr.bf16.mxu1 %v4162_v43  ;;  %v4154_v7 = vmax.f32 %v4128_v10, 0.0 }
 0x9bc   :  { %v4130_v37 = vpop.f32.mrf.mxu0  ;;  %5009 = vmatmul.mubr.bf16.gmra.mxu1 %v4163_v34 }
 0x9bd   :  { %v4131_v38 = vadd.f32 %v4130_v37, %v3996_v57  ;;  %v4157_v39 = vmax.f32 %v4139_v53, 0.0 }
 0x9bf   :  { %v4155_v27 = vmax.f32 %v4131_v38, 0.0  ;;  %v4165_v47 = vpack.c.bf16 %v4157_v39, %v4156_v40 }
 0x9c1   :  { %v4164_v56 = vpack.c.bf16 %v4155_v27, %v4154_v7 }
 0x9c3   :  { %5012 = vmatprep.mubr.bf16.mxu1 %v4164_v56 }
 0x9c4   :  { %5013 = vmatmul.mubr.bf16.gmra.mxu1 %v4165_v47 }
 0xa6c   :  { %v5002_v62 = vpop.f32.mrf.mxu1 }
 0xa6d   :  { %v4278_v60 = vadd.f32 %v5002_v62, %v4186_v8 }
 0xa6e   :  { %v4269_v54 = vpop.f32.mrf.mxu1 }
 0xa6f   :  { %4334 = vst [vmem:[%s6805_s4 + $0x10] sm:$0xff] %v4278_v60  ;;  %v4270_v14 = vadd.f32 %v4269_v54, %v4186_v8 }
 0xa70   :  { %v5003_v57 = vpop.f32.mrf.mxu1 }
 0xa71   :  { %4332 = vst [vmem:[%s6805_s4] sm:$0xff] %v4270_v14  ;;  %v4281_v61 = vadd.f32 %v5003_v57, %v4186_v8 }
 0xa72   :  { %v4272_v33 = vpop.f32.mrf.mxu1 }
 0xa73   :  { %4335 = vst [vmem:[%s6805_s4 + $0x18] sm:$0xff] %v4281_v61  ;;  %v4273_v59 = vadd.f32 %v4272_v33, %v4186_v8 }
 0xa74   :  { %v5006_v11 = vpop.f32.mrf.mxu1 }
 0xa75   :  { %4333 = vst [vmem:[%s6805_s4 + $0x8] sm:$0xff] %v4273_v59  ;;  %v4294_v19 = vadd.f32 %v5006_v11, %v4186_v8 }
 0xa76   :  { %v4285_v0 = vpop.f32.mrf.mxu1 }
 0xa77   :  { %4338 = vst [vmem:[%s6805_s4 + $0x30] sm:$0xff] %v4294_v19  ;;  %v4286_v28 = vadd.f32 %v4285_v0, %v4186_v8 }
 0xa78   :  { %v5007_v25 = vpop.f32.mrf.mxu1 }
 0xa79   :  { %4336 = vst [vmem:[%s6805_s4 + $0x20] sm:$0xff] %v4286_v28  ;;  %v4297_v45 = vadd.f32 %v5007_v25, %v4186_v8 }
 0xa7a   :  { %v4288_v5 = vpop.f32.mrf.mxu1 }
 0xa7b   :  { %4339 = vst [vmem:[%s6805_s4 + $0x38] sm:$0xff] %v4297_v45  ;;  %v4289_v58 = vadd.f32 %v4288_v5, %v4186_v8 }
 0xa7c   :  { %v5010_v46 = vpop.f32.mrf.mxu1 }
 0xa7d   :  { %4337 = vst [vmem:[%s6805_s4 + $0x28] sm:$0xff] %v4289_v58  ;;  %v4310_v17 = vadd.f32 %v5010_v46, %v4186_v8 }
 0xa7e   :  { %v4301_v36 = vpop.f32.mrf.mxu1 }
 0xa7f   :  { %4342 = vst [vmem:[%s6805_s4 + $0x50] sm:$0xff] %v4310_v17  ;;  %v4302_v55 = vadd.f32 %v4301_v36, %v4186_v8 }
 0xa80   :  { %v5011_v24 = vpop.f32.mrf.mxu1 }
 0xa81   :  { %4340 = vst [vmem:[%s6805_s4 + $0x40] sm:$0xff] %v4302_v55  ;;  %v4313_v21 = vadd.f32 %v5011_v24, %v4186_v8 }
 0xa82   :  { %v4304_v12 = vpop.f32.mrf.mxu1 }
 0xa83   :  { %4343 = vst [vmem:[%s6805_s4 + $0x58] sm:$0xff] %v4313_v21  ;;  %v4305_v50 = vadd.f32 %v4304_v12, %v4186_v8 }
 0xa84   :  { %v5014_v2 = vpop.f32.mrf.mxu1 }
 0xa85   :  { %4341 = vst [vmem:[%s6805_s4 + $0x48] sm:$0xff] %v4305_v50  ;;  %v4326_v31 = vadd.f32 %v5014_v2, %v4186_v8 }
 0xa86   :  { %v4317_v51 = vpop.f32.mrf.mxu1 }
 0xa87   :  { %4346 = vst [vmem:[%s6805_s4 + $0x70] sm:$0xff] %v4326_v31  ;;  %v4318_v23 = vadd.f32 %v4317_v51, %v4186_v8 }
 0xa88   :  { %v5015_v20 = vpop.f32.mrf.mxu1 }
 0xa89   :  { %4344 = vst [vmem:[%s6805_s4 + $0x60] sm:$0xff] %v4318_v23  ;;  %v4329_v15 = vadd.f32 %v5015_v20, %v4186_v8 }
 0xa8a   :  { %v4320_v41 = vpop.f32.mrf.mxu1 }
 0xa8b   :  { %4347 = vst [vmem:[%s6805_s4 + $0x78] sm:$0xff] %v4329_v15  ;;  %v4321_v49 = vadd.f32 %v4320_v41, %v4186_v8 }
 0xa8d   :  { %4345 = vst [vmem:[%s6805_s4 + $0x68] sm:$0xff] %v4321_v49 }

</bundles_post_ra>
